<compile_context>
chip_gen: v7x
topology: tpu7x:2x2x1
jax: 0.10.0
libtpu: 0.0.40
codegen_flags: <defaults>
</compile_context>

<pallas_src>
import functools
import math

import jax
import jax.numpy as jnp
from jax.experimental import pallas as pl
from jax.experimental.pallas import tpu as pltpu

NEG_INF = -1e30
LN_EPS = 1e-5


# ---------------------------------------------------------------------------
# helpers
# ---------------------------------------------------------------------------

def _round_up(n, m):
    return ((n + m - 1) // m) * m


def _pick_tile(dim, pref):
    """Largest power-of-two tile <= pref (>=128) dividing dim, else full dim."""
    t = pref
    while t >= 128:
        if dim % t == 0:
            return t
        t //= 2
    return dim


def _seq_tile(n, pref):
    """Sequence tiling with padding: returns (tile, padded_n)."""
    if n <= pref:
        t = _round_up(n, 8)
        return t, t
    return pref, _round_up(n, pref)


# ---------------------------------------------------------------------------
# Tiled linear kernel (bias + optional relu + optional residual+LayerNorm)
# ---------------------------------------------------------------------------

def _make_linear_kernel(activation, fuse_ln, eps):
    def kernel(*refs):
        if fuse_ln:
            x_ref, w_ref, b_ref, res_ref, g_ref, bt_ref, o_ref, acc_ref = refs
        else:
            x_ref, w_ref, b_ref, o_ref, acc_ref = refs

        k = pl.program_id(2)

        @pl.when(k == 0)
        def _():
            acc_ref[...] = jnp.zeros_like(acc_ref)

        acc_ref[...] += jnp.dot(x_ref[...], w_ref[...],
                                preferred_element_type=jnp.float32)

        @pl.when(k == pl.num_programs(2) - 1)
        def _():
            y = acc_ref[...] + b_ref[...]
            if activation == "relu":
                y = jnp.maximum(y, 0.0)
            if fuse_ln:
                y = y + res_ref[...].astype(jnp.float32)
                # one-pass mean/var (single cross-lane reduction sweep)
                mu = jnp.mean(y, axis=-1, keepdims=True)
                var = jnp.maximum(
                    jnp.mean(y * y, axis=-1, keepdims=True) - mu * mu, 0.0)
                y = (y - mu) * jax.lax.rsqrt(var + eps)
                y = y * g_ref[...] + bt_ref[...]
            o_ref[...] = y.astype(o_ref.dtype)

    return kernel


def linear(x, w, b, *, activation=None, residual=None, ln_gamma=None,
           ln_beta=None, eps=LN_EPS, out_dtype=jnp.bfloat16):
    """x:(M,K) bf16 @ w:(K,N) bf16 + b, optional relu / residual+LayerNorm."""
    M, K = x.shape
    N = w.shape[1]
    fuse_ln = ln_gamma is not None

    tm = 256 if M > 256 else _round_up(M, 8)
    tk = _pick_tile(K, 512)
    tn = N if fuse_ln else _pick_tile(N, 512)   # LN needs the full row

    # Keep the double-buffered working set under the smallest default
    # scoped-VMEM budget (v5e: 16 MiB scoped, v7x: 64 MiB physical).
    def vmem_est(tm_, tk_, tn_):
        e = 2 * tm_ * tk_ * 2 + 2 * tk_ * tn_ * 2 + 2 * tn_ * 4   # x, w, b
        e += 2 * tm_ * tn_ * 2 + tm_ * tn_ * 4                    # out + acc
        if fuse_ln:
            e += 2 * tm_ * tn_ * 2 + 4 * tn_ * 4                  # res + g/beta
        return e

    budget = 12 * 1024 * 1024
    while vmem_est(tm, tk, tn) > budget and tk > 128 and K % (tk // 2) == 0:
        tk //= 2
    while vmem_est(tm, tk, tn) > budget and tm >= 256:
        tm //= 2

    # pad M to the tile instead of falling back to one giant block
    m_p = _round_up(M, tm)
    if m_p != M:
        x = jnp.pad(x, ((0, m_p - M), (0, 0)))
        if fuse_ln:
            residual = jnp.pad(residual, ((0, m_p - M), (0, 0)))

    k_steps = K // tk
    grid = (m_p // tm, N // tn, k_steps)

    b2 = b.reshape(1, N).astype(jnp.float32)

    # Deeper buffering of the weight stream when there are many K steps
    # (hides HBM latency on bandwidth-poor v5e); plain double-buffer otherwise.
    if k_steps >= 4:
        w_spec = pl.BlockSpec((tk, tn), lambda i, j, kk: (kk, j),
                              pipeline_mode=pl.Buffered(3))
    else:
        w_spec = pl.BlockSpec((tk, tn), lambda i, j, kk: (kk, j))

    in_specs = [
        pl.BlockSpec((tm, tk), lambda i, j, kk: (i, kk)),
        w_spec,
        pl.BlockSpec((1, tn), lambda i, j, kk: (0, j)),
    ]
    args = [x, w, b2]
    if fuse_ln:
        in_specs += [
            pl.BlockSpec((tm, tn), lambda i, j, kk: (i, j)),
            pl.BlockSpec((1, tn), lambda i, j, kk: (0, j)),
            pl.BlockSpec((1, tn), lambda i, j, kk: (0, j)),
        ]
        args += [residual,
                 ln_gamma.reshape(1, N).astype(jnp.float32),
                 ln_beta.reshape(1, N).astype(jnp.float32)]

    out = pl.pallas_call(
        _make_linear_kernel(activation, fuse_ln, eps),
        out_shape=jax.ShapeDtypeStruct((m_p, N), out_dtype),
        grid_spec=pltpu.PrefetchScalarGridSpec(
            num_scalar_prefetch=0,
            grid=grid,
            in_specs=in_specs,
            out_specs=pl.BlockSpec((tm, tn), lambda i, j, kk: (i, j)),
            scratch_shapes=[pltpu.VMEM((tm, tn), jnp.float32)]),
        compiler_params=pltpu.CompilerParams(
            dimension_semantics=("parallel", "parallel", "arbitrary")),
    )(*args)
    if m_p != M:
        out = out[:M]
    return out


# ---------------------------------------------------------------------------
# Flash attention: grid (B, H, Sq//tq, Sk//tk), layout (B, H, S, Dh)
# ---------------------------------------------------------------------------

def _make_flash_kernel(tq, tk, causal, return_lse, scale):
    def kernel(*refs):
        if return_lse:
            len_ref, q_ref, k_ref, v_ref, o_ref, lse_ref, m_sc, l_sc, acc_sc = refs
        else:
            len_ref, q_ref, k_ref, v_ref, o_ref, m_sc, l_sc, acc_sc = refs

        b = pl.program_id(0)
        qi = pl.program_id(2)
        ki = pl.program_id(3)

        @pl.when(ki == 0)
        def _():
            m_sc[...] = jnp.full_like(m_sc, -jnp.inf)
            l_sc[...] = jnp.zeros_like(l_sc)
            acc_sc[...] = jnp.zeros_like(acc_sc)

        kv_len_b = len_ref[b]
        kv_lo = ki * tk
        work = kv_lo < kv_len_b                       # block beyond key length?
        if causal:
            work = jnp.logical_and(work, kv_lo <= qi * tq + (tq - 1))

        @pl.when(work)                                # skip fully-masked blocks
        def _():
            q = q_ref[0, 0]                           # (tq, Dh) bf16
            k = k_ref[0, 0]                           # (tk, Dh) bf16
            v = v_ref[0, 0]

            # QK^T via dot_general (contract last dims) — no .T / XLU transpose
            s = jax.lax.dot_general(
                q, k, (((1,), (1,)), ((), ())),
                preferred_element_type=jnp.float32) * scale

            # mask built once per block (head-invariant; heads are grid steps)
            col = jax.lax.broadcasted_iota(jnp.int32, (tq, tk), 1) + kv_lo
            valid = col < kv_len_b
            if causal:
                row = jax.lax.broadcasted_iota(jnp.int32, (tq, tk), 0) + qi * tq
                valid = jnp.logical_and(valid, col <= row)
            s = jnp.where(valid, s, NEG_INF)

            m_prev = m_sc[...]                        # (tq, 128), lanes equal
            m_next = jnp.maximum(m_prev, jnp.max(s, axis=-1, keepdims=True))
            alpha = jnp.exp(m_prev - m_next)
            p = jnp.exp(s - m_next[:, :1])
            l_sc[...] = alpha * l_sc[...] + jnp.sum(p, axis=-1, keepdims=True)
            m_sc[...] = m_next
            acc_sc[...] = acc_sc[...] * alpha[:, :1] + jnp.dot(
                p.astype(v.dtype), v, preferred_element_type=jnp.float32)

        @pl.when(ki == pl.num_programs(3) - 1)
        def _():
            # rows with no valid keys: l == 0 -> output 0 (no inf/NaN)
            l = jnp.where(l_sc[...] <= 0.0, 1.0, l_sc[...])
            o_ref[0, 0] = (acc_sc[...] / l[:, :1]).astype(o_ref.dtype)
            if return_lse:
                lfin = l_sc[:, :1]
                lse = jnp.where(
                    lfin <= 0.0, 0.0,
                    m_sc[:, :1] + jnp.log(jnp.maximum(lfin, 1e-30)))
                lse_ref[0, 0] = lse

    return kernel


def flash_attention(q, k, v, kv_len, *, causal=False, return_lse=False):
    """q:(B,H,Sq,Dh) k,v:(B,H,Sk,Dh) bf16; kv_len:(B,) int32."""
    B, H, Sq, Dh = q.shape
    Sk = k.shape[2]
    scale = 1.0 / math.sqrt(Dh)

    tq, sq_p = _seq_tile(Sq, 256)
    tk, sk_p = _seq_tile(Sk, 512)
    if sq_p != Sq:
        q = jnp.pad(q, ((0, 0), (0, 0), (0, sq_p - Sq), (0, 0)))
    if sk_p != Sk:
        pad = ((0, 0), (0, 0), (0, sk_p - Sk), (0, 0))
        k = jnp.pad(k, pad)
        v = jnp.pad(v, pad)

    grid = (B, H, sq_p // tq, sk_p // tk)
    kernel = _make_flash_kernel(tq, tk, causal, return_lse, scale)

    o_shape = jax.ShapeDtypeStruct((B, H, sq_p, Dh), jnp.bfloat16)
    o_spec = pl.BlockSpec((1, 1, tq, Dh), lambda b, h, i, j, lens: (b, h, i, 0))
    if return_lse:
        out_shape = (o_shape, jax.ShapeDtypeStruct((B, H, sq_p, 1), jnp.float32))
        out_specs = (o_spec,
                     pl.BlockSpec((1, 1, tq, 1),
                                  lambda b, h, i, j, lens: (b, h, i, 0)))
    else:
        out_shape = o_shape
        out_specs = o_spec

    res = pl.pallas_call(
        kernel,
        out_shape=out_shape,
        grid_spec=pltpu.PrefetchScalarGridSpec(
            num_scalar_prefetch=1,                     # kv_len -> SMEM
            grid=grid,
            in_specs=[
                pl.BlockSpec((1, 1, tq, Dh), lambda b, h, i, j, lens: (b, h, i, 0)),
                pl.BlockSpec((1, 1, tk, Dh), lambda b, h, i, j, lens: (b, h, j, 0)),
                pl.BlockSpec((1, 1, tk, Dh), lambda b, h, i, j, lens: (b, h, j, 0)),
            ],
            out_specs=out_specs,
            scratch_shapes=[
                pltpu.VMEM((tq, 128), jnp.float32),   # m (full-width stores)
                pltpu.VMEM((tq, 128), jnp.float32),   # l
                pltpu.VMEM((tq, Dh), jnp.float32),    # acc
            ]),
        compiler_params=pltpu.CompilerParams(
            dimension_semantics=("parallel", "parallel", "parallel",
                                 "arbitrary")),
    )(kv_len, q, k, v)

    if return_lse:
        o, lse = res
        if sq_p != Sq:
            o, lse = o[:, :, :Sq], lse[:, :, :Sq]
        return o, lse
    o = res
    if sq_p != Sq:
        o = o[:, :, :Sq]
    return o


# ---------------------------------------------------------------------------
# Exact attention probabilities from the LSE (Sk-tiled, last layer only)
# ---------------------------------------------------------------------------

def _make_probs_kernel(tq, tk, scale):
    def kernel(len_ref, q_ref, k_ref, lse_ref, a_ref):
        b = pl.program_id(0)
        ki = pl.program_id(3)
        s = jax.lax.dot_general(
            q_ref[0, 0], k_ref[0, 0], (((1,), (1,)), ((), ())),
            preferred_element_type=jnp.float32) * scale
        col = jax.lax.broadcasted_iota(jnp.int32, (tq, tk), 1) + ki * tk
        valid = col < len_ref[b]
        p = jnp.exp(s - lse_ref[0, 0])
        a_ref[0, 0] = jnp.where(valid, p, 0.0)

    return kernel


def attention_probs(q, k, lse, kv_len):
    """Exact softmax probabilities; q:(B,H,Sq,Dh) k:(B,H,Sk,Dh) lse:(B,H,Sq,1)."""
    B, H, Sq, Dh = q.shape
    Sk = k.shape[2]
    scale = 1.0 / math.sqrt(Dh)
    tq = _pick_tile(Sq, 256)
    tk = _pick_tile(Sk, 512)
    grid = (B, H, Sq // tq, Sk // tk)

    return pl.pallas_call(
        _make_probs_kernel(tq, tk, scale),
        out_shape=jax.ShapeDtypeStruct((B, H, Sq, Sk), jnp.float32),
        grid_spec=pltpu.PrefetchScalarGridSpec(
            num_scalar_prefetch=1,
            grid=grid,
            in_specs=[
                pl.BlockSpec((1, 1, tq, Dh), lambda b, h, i, j, lens: (b, h, i, 0)),
                pl.BlockSpec((1, 1, tk, Dh), lambda b, h, i, j, lens: (b, h, j, 0)),
                pl.BlockSpec((1, 1, tq, 1), lambda b, h, i, j, lens: (b, h, i, 0)),
            ],
            out_specs=pl.BlockSpec((1, 1, tq, tk),
                                   lambda b, h, i, j, lens: (b, h, i, j)),
        ),
        compiler_params=pltpu.CompilerParams(
            dimension_semantics=("parallel", "parallel", "parallel",
                                 "arbitrary")),
    )(kv_len, q, k, lse)


# ---------------------------------------------------------------------------
# Attention output projection: reduces over heads (and over the 2 enc-dec/BERT
# sources), consuming (B,H,S,Dh) directly; residual + LayerNorm in the epilogue
# ---------------------------------------------------------------------------

def _make_attn_out_kernel(n_src, eps):
    def kernel(*refs):
        ctx_refs = refs[:n_src]
        w_refs = refs[n_src:2 * n_src]
        b_ref, res_ref, g_ref, bt_ref, o_ref, acc_ref = refs[2 * n_src:]
        h = pl.program_id(2)

        @pl.when(h == 0)
        def _():
            acc_ref[...] = jnp.zeros_like(acc_ref)

        contrib = jnp.dot(ctx_refs[0][0, 0], w_refs[0][0],
                          preferred_element_type=jnp.float32)
        for s in range(1, n_src):
            contrib += jnp.dot(ctx_refs[s][0, 0], w_refs[s][0],
                               preferred_element_type=jnp.float32)
        acc_ref[...] += contrib

        @pl.when(h == pl.num_programs(2) - 1)
        def _():
            y = acc_ref[...] + b_ref[...] + res_ref[0].astype(jnp.float32)
            mu = jnp.mean(y, axis=-1, keepdims=True)
            var = jnp.maximum(
                jnp.mean(y * y, axis=-1, keepdims=True) - mu * mu, 0.0)
            y = (y - mu) * jax.lax.rsqrt(var + eps)
            y = y * g_ref[...] + bt_ref[...]
            o_ref[0] = y.astype(o_ref.dtype)

    return kernel


def attn_out_ln(ctxs, ws, b, residual, gamma, beta, *, eps=LN_EPS):
    """ctxs: list of (B,H,St,Dh) bf16; ws: list of (H,Dh,N) bf16;
    residual: (B,St,N) bf16.  Returns LN(residual + sum_s ctx_s @ W_s + b)."""
    B, H, St, Dh = ctxs[0].shape
    N = ws[0].shape[-1]
    n_src = len(ctxs)
    tm = _pick_tile(St, 256)
    grid = (B, St // tm, H)

    ctx_spec = pl.BlockSpec((1, 1, tm, Dh), lambda bb, i, h: (bb, h, i, 0))
    w_spec = pl.BlockSpec((1, Dh, N), lambda bb, i, h: (h, 0, 0))
    vec_spec = pl.BlockSpec((1, N), lambda bb, i, h: (0, 0))
    row_spec = pl.BlockSpec((1, tm, N), lambda bb, i, h: (bb, i, 0))
    in_specs = ([ctx_spec] * n_src + [w_spec] * n_src +
                [vec_spec, row_spec, vec_spec, vec_spec])

    args = (list(ctxs) + list(ws) +
            [b.reshape(1, N).astype(jnp.float32), residual,
             gamma.reshape(1, N).astype(jnp.float32),
             beta.reshape(1, N).astype(jnp.float32)])

    return pl.pallas_call(
        _make_attn_out_kernel(n_src, eps),
        out_shape=jax.ShapeDtypeStruct((B, St, N), jnp.bfloat16),
        grid_spec=pltpu.PrefetchScalarGridSpec(
            num_scalar_prefetch=0,
            grid=grid,
            in_specs=in_specs,
            out_specs=row_spec,
            scratch_shapes=[pltpu.VMEM((tm, N), jnp.float32)]),
        compiler_params=pltpu.CompilerParams(
            dimension_semantics=("parallel", "parallel", "arbitrary")),
    )(*args)


# ---------------------------------------------------------------------------
# Parameter preparation (fused / bf16 weights, computed once)
# ---------------------------------------------------------------------------

def init_mha_params(key, d_model):
    ks = jax.random.split(key, 4)
    w = lambda k: jax.random.normal(k, (d_model, d_model), jnp.float32) * 0.02
    z = lambda: jnp.zeros((d_model,), jnp.float32)
    return {"wq": w(ks[0]), "bq": z(), "wk": w(ks[1]), "bk": z(),
            "wv": w(ks[2]), "bv": z(), "wo": w(ks[3]), "bo": z()}


def init_layer_params(key, d_model, d_ff):
    ks = jax.random.split(key, 5)
    return {
        "self_attn": init_mha_params(ks[0], d_model),
        "encdec_attn": init_mha_params(ks[1], d_model),
        "bert_attn": init_mha_params(ks[2], d_model),
        "ln1_g": jnp.ones((d_model,)), "ln1_b": jnp.zeros((d_model,)),
        "ln2_g": jnp.ones((d_model,)), "ln2_b": jnp.zeros((d_model,)),
        "ln3_g": jnp.ones((d_model,)), "ln3_b": jnp.zeros((d_model,)),
        "ff_w1": jax.random.normal(ks[3], (d_model, d_ff), jnp.float32) * 0.02,
        "ff_b1": jnp.zeros((d_ff,), jnp.float32),
        "ff_w2": jax.random.normal(ks[4], (d_ff, d_model), jnp.float32) * 0.02,
        "ff_b2": jnp.zeros((d_model,), jnp.float32),
    }


def prepare_params(p, n_heads):
    d_model = p["ln1_g"].shape[0]
    dh = d_model // n_heads
    bf = lambda a: a.astype(jnp.bfloat16)
    heads = lambda w: bf(w).reshape(n_heads, dh, w.shape[1])   # (D,N)->(H,Dh,N)
    sa, ed, bt = p["self_attn"], p["encdec_attn"], p["bert_attn"]
    out = {
        # self-attention: fused Q|K|V projection, per-head output weights
        "w_qkv": bf(jnp.concatenate([sa["wq"], sa["wk"], sa["wv"]], axis=1)),
        "b_qkv": jnp.concatenate([sa["bq"], sa["bk"], sa["bv"]]),
        "wo_self_h": heads(sa["wo"]), "bo_self": sa["bo"],
        # enc-dec + bert attention: fused Q projections (same input x)
        "w_q2": bf(jnp.concatenate([ed["wq"], bt["wq"]], axis=1)),
        "b_q2": jnp.concatenate([ed["bq"], bt["bq"]]),
        # layer-invariant K|V projections of memory / bert_out
        "w_kv_ed": bf(jnp.concatenate([ed["wk"], ed["wv"]], axis=1)),
        "b_kv_ed": jnp.concatenate([ed["bk"], ed["bv"]]),
        "w_kv_bt": bf(jnp.concatenate([bt["wk"], bt["wv"]], axis=1)),
        "b_kv_bt": jnp.concatenate([bt["bk"], bt["bv"]]),
        # 0.5*(ctx_ed @ Wo_ed + ctx_bt @ Wo_bt), per-head weight views
        "wo_ed_h": heads(0.5 * ed["wo"]),
        "wo_bt_h": heads(0.5 * bt["wo"]),
        "b_o2": 0.5 * (ed["bo"] + bt["bo"]),
        # FFN
        "ff_w1": bf(p["ff_w1"]), "ff_b1": p["ff_b1"],
        "ff_w2": bf(p["ff_w2"]), "ff_b2": p["ff_b2"],
    }
    for name in ("ln1_g", "ln1_b", "ln2_g", "ln2_b", "ln3_g", "ln3_b"):
        out[name] = p[name].astype(jnp.float32)
    return out


# ---------------------------------------------------------------------------
# Decoder layer / forward
# ---------------------------------------------------------------------------

def decoder_layer(pp, x, kv_ed, kv_bt, src_len, trg_len, n_heads, return_attn):
    B, St, D = x.shape
    dh = D // n_heads

    def split_heads(y, n_src):
        # (B*St, n_src*D) -> (n_src, B, H, St, Dh)
        return y.reshape(B, St, n_src, n_heads, dh).transpose(2, 0, 3, 1, 4)

    # --- masked self-attention + residual + LN (LN fused into out-proj) ---
    qkv = split_heads(linear(x.reshape(B * St, D), pp["w_qkv"], pp["b_qkv"]), 3)
    ctx = flash_attention(qkv[0], qkv[1], qkv[2], trg_len, causal=True)
    x = attn_out_ln([ctx], [pp["wo_self_h"]], pp["bo_self"], x,
                    pp["ln1_g"], pp["ln1_b"])

    # --- enc-dec attention fused with BERT attention + residual + LN ---
    q2 = split_heads(linear(x.reshape(B * St, D), pp["w_q2"], pp["b_q2"]), 2)
    q_ed, q_bt = q2[0], q2[1]
    k_ed, v_ed = kv_ed
    k_bt, v_bt = kv_bt
    if return_attn:
        ctx_ed, lse = flash_attention(q_ed, k_ed, v_ed, src_len,
                                      causal=False, return_lse=True)
        attn = attention_probs(q_ed, k_ed, lse, src_len)
    else:
        ctx_ed = flash_attention(q_ed, k_ed, v_ed, src_len)
        attn = None
    ctx_bt = flash_attention(q_bt, k_bt, v_bt, src_len)
    x = attn_out_ln([ctx_ed, ctx_bt], [pp["wo_ed_h"], pp["wo_bt_h"]],
                    pp["b_o2"], x, pp["ln2_g"], pp["ln2_b"])

    # --- position-wise FFN + residual + LN (fused into second matmul) ---
    x2 = x.reshape(B * St, D)
    h = linear(x2, pp["ff_w1"], pp["ff_b1"], activation="relu")
    y = linear(h, pp["ff_w2"], pp["ff_b2"],
               residual=x2, ln_gamma=pp["ln3_g"], ln_beta=pp["ln3_b"])
    return y.reshape(B, St, D), attn


@functools.partial(jax.jit, static_argnames=("n_layers", "n_heads"))
def decoder_forward(pp, memory, trg, bert_out, src_mask, trg_mask, *,
                    n_layers, n_heads):
    B, Ss, D = memory.shape
    St = trg.shape[1]
    dh = D // n_heads

    # compact mask representation: per-batch valid key length (+ causal flag)
    src_len = jnp.sum(src_mask.reshape(B, -1, Ss)[:, -1, :] > 0.5,
                      axis=-1).astype(jnp.int32)
    trg_len = jnp.sum(trg_mask.reshape(B, -1, St)[:, -1, :] > 0.5,
                      axis=-1).astype(jnp.int32)

    x = trg.astype(jnp.bfloat16)
    mem2 = memory.astype(jnp.bfloat16).reshape(B * Ss, D)
    bert2 = bert_out.astype(jnp.bfloat16).reshape(B * Ss, D)

    def split_heads(y, n_src):
        return y.reshape(B, Ss, n_src, n_heads, dh).transpose(2, 0, 3, 1, 4)

    # layer-invariant K/V projections (shared weights) hoisted out of the loop
    kvm = split_heads(linear(mem2, pp["w_kv_ed"], pp["b_kv_ed"]), 2)
    kv_ed = (kvm[0], kvm[1])
    kvb = split_heads(linear(bert2, pp["w_kv_bt"], pp["b_kv_bt"]), 2)
    kv_bt = (kvb[0], kvb[1])

    attn = None
    for li in range(n_layers):      # SAME layer weights reused n_layers times
        x, a = decoder_layer(pp, x, kv_ed, kv_bt, src_len, trg_len, n_heads,
                             return_attn=(li == n_layers - 1))
        if a is not None:
            attn = a
    return x.astype(jnp.float32), attn


# ---------------------------------------------------------------------------
# Main
# ---------------------------------------------------------------------------

if __name__ == "__main__":
    B, S_SRC, S_TRG = 2, 8, 8
    D_MODEL, N_HEADS, D_FF, N_LAYERS = 32, 4, 64, 2
    assert D_MODEL % N_HEADS == 0

    root = jax.random.PRNGKey(0)
    k_param, k_mem, k_trg, k_bert = jax.random.split(root, 4)

    params = init_layer_params(k_param, D_MODEL, D_FF)
    pp = prepare_params(params, N_HEADS)

    memory = jax.random.normal(k_mem, (B, S_SRC, D_MODEL), jnp.float32)
    trg = jax.random.normal(k_trg, (B, S_TRG, D_MODEL), jnp.float32)
    bert_out = jax.random.normal(k_bert, (B, S_SRC, D_MODEL), jnp.float32)

    # src_mask: (B,1,1,S_src) all ones; trg_mask: (B,1,S_trg,S_trg) causal
    src_mask = jnp.ones((B, 1, 1, S_SRC), jnp.float32)
    trg_mask = jnp.tril(jnp.ones((S_TRG, S_TRG), jnp.float32))[None, None]
    trg_mask = jnp.broadcast_to(trg_mask, (B, 1, S_TRG, S_TRG))

    out, attn = decoder_forward(pp, memory, trg, bert_out, src_mask, trg_mask,
                                n_layers=N_LAYERS, n_heads=N_HEADS)
    out = jax.block_until_ready(out)
    attn = jax.block_until_ready(attn)

    assert out.shape == (B, S_TRG, D_MODEL)
    assert attn.shape == (B, N_HEADS, S_TRG, S_SRC)
    assert bool(jnp.all(jnp.isfinite(out)))
    assert bool(jnp.all(jnp.isfinite(attn)))
    print("KERNEL_OK")
</pallas_src>

<mosaic_0001>
module attributes {stable_mosaic.version = 11 : i64} {
  func.func @kernel(%arg0: i32, %arg1: i32, %arg2: i32, %arg3: memref<16x32xbf16, #tpu.memory_space<vmem>>, %arg4: memref<32x64xbf16, #tpu.memory_space<vmem>>, %arg5: memref<1x64xf32, #tpu.memory_space<vmem>>, %arg6: memref<16x64xbf16, #tpu.memory_space<vmem>>, %arg7: memref<16x64xf32, #tpu.memory_space<vmem>>) attributes {dimension_semantics = [#tpu.dimension_semantics<parallel>, #tpu.dimension_semantics<parallel>, #tpu.dimension_semantics<arbitrary>], iteration_bounds = array<i64: 1, 1, 1>, scalar_prefetch = 0 : i64, scratch_operands = 1 : i64, tpu.core_type = #tpu.core_type<tc>, window_params = [{transform_indices = @transform_0, window_bounds = array<i64: 16, 32>}, {transform_indices = @transform_1, window_bounds = array<i64: 32, 64>}, {transform_indices = @transform_2, window_bounds = array<i64: 1, 64>}, {transform_indices = @transform_3, window_bounds = array<i64: 16, 64>}]} {
    %c0_i32 = arith.constant 0 : i32
    %0 = arith.cmpi eq, %arg2, %c0_i32 : i32
    %1 = arith.extui %0 : i1 to i32
    %c0_i32_0 = arith.constant 0 : i32
    %2 = arith.cmpi ne, %1, %c0_i32_0 : i32
    scf.if %2 {
      %cst_10 = arith.constant 0.000000e+00 : f32
      %12 = vector.broadcast %cst_10 : f32 to vector<16x64xf32>
      %c0_11 = arith.constant 0 : index
      %c0_12 = arith.constant 0 : index
      %13 = vector.load %arg7[%c0_11, %c0_12] : memref<16x64xf32, #tpu.memory_space<vmem>>, vector<16x64xf32>
      tpu.vector_store %arg7[%c0_11, %c0_12], %12 {strides = array<i32>} : memref<16x64xf32, #tpu.memory_space<vmem>>, vector<16x64xf32>,
    } else {
    }
    %c0 = arith.constant 0 : index
    %c0_1 = arith.constant 0 : index
    %3 = vector.load %arg7[%c0, %c0_1] : memref<16x64xf32, #tpu.memory_space<vmem>>, vector<16x64xf32>
    %c0_2 = arith.constant 0 : index
    %c0_3 = arith.constant 0 : index
    %4 = vector.load %arg3[%c0_2, %c0_3] : memref<16x32xbf16, #tpu.memory_space<vmem>>, vector<16x32xbf16>
    %c0_4 = arith.constant 0 : index
    %c0_5 = arith.constant 0 : index
    %5 = vector.load %arg4[%c0_4, %c0_5] : memref<32x64xbf16, #tpu.memory_space<vmem>>, vector<32x64xbf16>
    %cst = arith.constant dense<0.000000e+00> : vector<16x64xf32>
    %6 = tpu.matmul %4, %5, %cst {dimension_numbers = #tpu.dot_dimension_numbers<[1], [0], [0], [1], [0, 0, 1, 1], [], []>} : vector<16x32xbf16>, vector<32x64xbf16>, vector<16x64xf32> -> vector<16x64xf32>
    %7 = arith.addf %3, %6 : vector<16x64xf32>
    %c0_6 = arith.constant 0 : index
    %c0_7 = arith.constant 0 : index
    %8 = vector.load %arg7[%c0_6, %c0_7] : memref<16x64xf32, #tpu.memory_space<vmem>>, vector<16x64xf32>
    tpu.vector_store %arg7[%c0_6, %c0_7], %7 {strides = array<i32>} : memref<16x64xf32, #tpu.memory_space<vmem>>, vector<16x64xf32>,
    %c0_i32_8 = arith.constant 0 : i32
    %9 = arith.cmpi eq, %arg2, %c0_i32_8 : i32
    %10 = arith.extui %9 : i1 to i32
    %c0_i32_9 = arith.constant 0 : i32
    %11 = arith.cmpi ne, %10, %c0_i32_9 : i32
    scf.if %11 {
      %c0_10 = arith.constant 0 : index
      %c0_11 = arith.constant 0 : index
      %12 = vector.load %arg7[%c0_10, %c0_11] : memref<16x64xf32, #tpu.memory_space<vmem>>, vector<16x64xf32>
      %c0_12 = arith.constant 0 : index
      %c0_13 = arith.constant 0 : index
      %13 = vector.load %arg5[%c0_12, %c0_13] : memref<1x64xf32, #tpu.memory_space<vmem>>, vector<1x64xf32>
      %14 = vector.broadcast %13 : vector<1x64xf32> to vector<16x64xf32>
      %15 = arith.addf %12, %14 : vector<16x64xf32>
      %16 = arith.truncf %15 : vector<16x64xf32> to vector<16x64xbf16>
      %c0_14 = arith.constant 0 : index
      %c0_15 = arith.constant 0 : index
      %17 = vector.load %arg6[%c0_14, %c0_15] : memref<16x64xbf16, #tpu.memory_space<vmem>>, vector<16x64xbf16>
      tpu.vector_store %arg6[%c0_14, %c0_15], %16 {strides = array<i32>} : memref<16x64xbf16, #tpu.memory_space<vmem>>, vector<16x64xbf16>,
    } else {
    }
    return
  }
  func.func @transform_0(%arg0: i32, %arg1: i32, %arg2: i32) -> (i32, i32) {
    %c0_i32 = arith.constant 0 : i32
    return %arg0, %arg2 : i32, i32
  }
  func.func @transform_1(%arg0: i32, %arg1: i32, %arg2: i32) -> (i32, i32) {
    %c0_i32 = arith.constant 0 : i32
    return %arg2, %arg1 : i32, i32
  }
  func.func @transform_2(%arg0: i32, %arg1: i32, %arg2: i32) -> (i32, i32) {
    %c0_i32 = arith.constant 0 : i32
    %c0_i32_0 = arith.constant 0 : i32
    return %c0_i32, %arg1 : i32, i32
  }
  func.func @transform_3(%arg0: i32, %arg1: i32, %arg2: i32) -> (i32, i32) {
    %c0_i32 = arith.constant 0 : i32
    return %arg0, %arg1 : i32, i32
  }
}

module attributes {stable_mosaic.version = 11 : i64} {
  func.func @kernel(%arg0: i32, %arg1: i32, %arg2: i32, %arg3: memref<16x32xbf16, #tpu.memory_space<vmem>>, %arg4: memref<32x96xbf16, #tpu.memory_space<vmem>>, %arg5: memref<1x96xf32, #tpu.memory_space<vmem>>, %arg6: memref<16x96xbf16, #tpu.memory_space<vmem>>, %arg7: memref<16x96xf32, #tpu.memory_space<vmem>>) attributes {dimension_semantics = [#tpu.dimension_semantics<parallel>, #tpu.dimension_semantics<parallel>, #tpu.dimension_semantics<arbitrary>], iteration_bounds = array<i64: 1, 1, 1>, scalar_prefetch = 0 : i64, scratch_operands = 1 : i64, tpu.core_type = #tpu.core_type<tc>, window_params = [{transform_indices = @transform_0, window_bounds = array<i64: 16, 32>}, {transform_indices = @transform_1, window_bounds = array<i64: 32, 96>}, {transform_indices = @transform_2, window_bounds = array<i64: 1, 96>}, {transform_indices = @transform_3, window_bounds = array<i64: 16, 96>}]} {
    %c0_i32 = arith.constant 0 : i32
    %0 = arith.cmpi eq, %arg2, %c0_i32 : i32
    %1 = arith.extui %0 : i1 to i32
    %c0_i32_0 = arith.constant 0 : i32
    %2 = arith.cmpi ne, %1, %c0_i32_0 : i32
    scf.if %2 {
      %cst_10 = arith.constant 0.000000e+00 : f32
      %12 = vector.broadcast %cst_10 : f32 to vector<16x96xf32>
      %c0_11 = arith.constant 0 : index
      %c0_12 = arith.constant 0 : index
      %13 = vector.load %arg7[%c0_11, %c0_12] : memref<16x96xf32, #tpu.memory_space<vmem>>, vector<16x96xf32>
      tpu.vector_store %arg7[%c0_11, %c0_12], %12 {strides = array<i32>} : memref<16x96xf32, #tpu.memory_space<vmem>>, vector<16x96xf32>,
    } else {
    }
    %c0 = arith.constant 0 : index
    %c0_1 = arith.constant 0 : index
    %3 = vector.load %arg7[%c0, %c0_1] : memref<16x96xf32, #tpu.memory_space<vmem>>, vector<16x96xf32>
    %c0_2 = arith.constant 0 : index
    %c0_3 = arith.constant 0 : index
    %4 = vector.load %arg3[%c0_2, %c0_3] : memref<16x32xbf16, #tpu.memory_space<vmem>>, vector<16x32xbf16>
    %c0_4 = arith.constant 0 : index
    %c0_5 = arith.constant 0 : index
    %5 = vector.load %arg4[%c0_4, %c0_5] : memref<32x96xbf16, #tpu.memory_space<vmem>>, vector<32x96xbf16>
    %cst = arith.constant dense<0.000000e+00> : vector<16x96xf32>
    %6 = tpu.matmul %4, %5, %cst {dimension_numbers = #tpu.dot_dimension_numbers<[1], [0], [0], [1], [0, 0, 1, 1], [], []>} : vector<16x32xbf16>, vector<32x96xbf16>, vector<16x96xf32> -> vector<16x96xf32>
    %7 = arith.addf %3, %6 : vector<16x96xf32>
    %c0_6 = arith.constant 0 : index
    %c0_7 = arith.constant 0 : index
    %8 = vector.load %arg7[%c0_6, %c0_7] : memref<16x96xf32, #tpu.memory_space<vmem>>, vector<16x96xf32>
    tpu.vector_store %arg7[%c0_6, %c0_7], %7 {strides = array<i32>} : memref<16x96xf32, #tpu.memory_space<vmem>>, vector<16x96xf32>,
    %c0_i32_8 = arith.constant 0 : i32
    %9 = arith.cmpi eq, %arg2, %c0_i32_8 : i32
    %10 = arith.extui %9 : i1 to i32
    %c0_i32_9 = arith.constant 0 : i32
    %11 = arith.cmpi ne, %10, %c0_i32_9 : i32
    scf.if %11 {
      %c0_10 = arith.constant 0 : index
      %c0_11 = arith.constant 0 : index
      %12 = vector.load %arg7[%c0_10, %c0_11] : memref<16x96xf32, #tpu.memory_space<vmem>>, vector<16x96xf32>
      %c0_12 = arith.constant 0 : index
      %c0_13 = arith.constant 0 : index
      %13 = vector.load %arg5[%c0_12, %c0_13] : memref<1x96xf32, #tpu.memory_space<vmem>>, vector<1x96xf32>
      %14 = vector.broadcast %13 : vector<1x96xf32> to vector<16x96xf32>
      %15 = arith.addf %12, %14 : vector<16x96xf32>
      %16 = arith.truncf %15 : vector<16x96xf32> to vector<16x96xbf16>
      %c0_14 = arith.constant 0 : index
      %c0_15 = arith.constant 0 : index
      %17 = vector.load %arg6[%c0_14, %c0_15] : memref<16x96xbf16, #tpu.memory_space<vmem>>, vector<16x96xbf16>
      tpu.vector_store %arg6[%c0_14, %c0_15], %16 {strides = array<i32>} : memref<16x96xbf16, #tpu.memory_space<vmem>>, vector<16x96xbf16>,
    } else {
    }
    return
  }
  func.func @transform_0(%arg0: i32, %arg1: i32, %arg2: i32) -> (i32, i32) {
    %c0_i32 = arith.constant 0 : i32
    return %arg0, %arg2 : i32, i32
  }
  func.func @transform_1(%arg0: i32, %arg1: i32, %arg2: i32) -> (i32, i32) {
    %c0_i32 = arith.constant 0 : i32
    return %arg2, %arg1 : i32, i32
  }
  func.func @transform_2(%arg0: i32, %arg1: i32, %arg2: i32) -> (i32, i32) {
    %c0_i32 = arith.constant 0 : i32
    %c0_i32_0 = arith.constant 0 : i32
    return %c0_i32, %arg1 : i32, i32
  }
  func.func @transform_3(%arg0: i32, %arg1: i32, %arg2: i32) -> (i32, i32) {
    %c0_i32 = arith.constant 0 : i32
    return %arg0, %arg1 : i32, i32
  }
}

module attributes {stable_mosaic.version = 11 : i64} {
  func.func @kernel(%arg0: i32, %arg1: i32, %arg2: i32, %arg3: memref<1x1x8x8xbf16, #tpu.memory_space<vmem>>, %arg4: memref<1x8x32xbf16, #tpu.memory_space<vmem>>, %arg5: memref<1x32xf32, #tpu.memory_space<vmem>>, %arg6: memref<1x8x32xbf16, #tpu.memory_space<vmem>>, %arg7: memref<1x32xf32, #tpu.memory_space<vmem>>, %arg8: memref<1x32xf32, #tpu.memory_space<vmem>>, %arg9: memref<1x8x32xbf16, #tpu.memory_space<vmem>>, %arg10: memref<8x32xf32, #tpu.memory_space<vmem>>) attributes {dimension_semantics = [#tpu.dimension_semantics<parallel>, #tpu.dimension_semantics<parallel>, #tpu.dimension_semantics<arbitrary>], iteration_bounds = array<i64: 2, 1, 4>, scalar_prefetch = 0 : i64, scratch_operands = 1 : i64, tpu.core_type = #tpu.core_type<tc>, window_params = [{transform_indices = @transform_0, window_bounds = array<i64: 1, 1, 8, 8>}, {transform_indices = @transform_1, window_bounds = array<i64: 1, 8, 32>}, {pipeline_mode = #tpu.pipeline_mode<synchronous>, transform_indices = @transform_2, window_bounds = array<i64: 1, 32>}, {transform_indices = @transform_3, window_bounds = array<i64: 1, 8, 32>}, {pipeline_mode = #tpu.pipeline_mode<synchronous>, transform_indices = @transform_4, window_bounds = array<i64: 1, 32>}, {pipeline_mode = #tpu.pipeline_mode<synchronous>, transform_indices = @transform_5, window_bounds = array<i64: 1, 32>}, {transform_indices = @transform_6, window_bounds = array<i64: 1, 8, 32>}]} {
    %c0_i32 = arith.constant 0 : i32
    %0 = arith.cmpi eq, %arg2, %c0_i32 : i32
    %1 = arith.extui %0 : i1 to i32
    %c0_i32_0 = arith.constant 0 : i32
    %2 = arith.cmpi ne, %1, %c0_i32_0 : i32
    scf.if %2 {
      %cst_12 = arith.constant 0.000000e+00 : f32
      %14 = vector.broadcast %cst_12 : f32 to vector<8x32xf32>
      %c0_13 = arith.constant 0 : index
      %c0_14 = arith.constant 0 : index
      %15 = vector.load %arg10[%c0_13, %c0_14] : memref<8x32xf32, #tpu.memory_space<vmem>>, vector<8x32xf32>
      tpu.vector_store %arg10[%c0_13, %c0_14], %14 {strides = array<i32>} : memref<8x32xf32, #tpu.memory_space<vmem>>, vector<8x32xf32>,
    } else {
    }
    %c0 = arith.constant 0 : index
    %c0_1 = arith.constant 0 : index
    %c0_2 = arith.constant 0 : index
    %c0_3 = arith.constant 0 : index
    %3 = vector.load %arg3[%c0, %c0_1, %c0_2, %c0_3] : memref<1x1x8x8xbf16, #tpu.memory_space<vmem>>, vector<1x1x8x8xbf16>
    %4 = vector.shape_cast %3 : vector<1x1x8x8xbf16> to vector<8x8xbf16>
    %c0_4 = arith.constant 0 : index
    %c0_5 = arith.constant 0 : index
    %c0_6 = arith.constant 0 : index
    %5 = vector.load %arg4[%c0_4, %c0_5, %c0_6] : memref<1x8x32xbf16, #tpu.memory_space<vmem>>, vector<1x8x32xbf16>
    %6 = vector.shape_cast %5 : vector<1x8x32xbf16> to vector<8x32xbf16>
    %cst = arith.constant dense<0.000000e+00> : vector<8x32xf32>
    %7 = tpu.matmul %4, %6, %cst {dimension_numbers = #tpu.dot_dimension_numbers<[1], [0], [0], [1], [0, 0, 1, 1], [], []>} : vector<8x8xbf16>, vector<8x32xbf16>, vector<8x32xf32> -> vector<8x32xf32>
    %c0_7 = arith.constant 0 : index
    %c0_8 = arith.constant 0 : index
    %8 = vector.load %arg10[%c0_7, %c0_8] : memref<8x32xf32, #tpu.memory_space<vmem>>, vector<8x32xf32>
    %9 = arith.addf %8, %7 : vector<8x32xf32>
    %c0_9 = arith.constant 0 : index
    %c0_10 = arith.constant 0 : index
    %10 = vector.load %arg10[%c0_9, %c0_10] : memref<8x32xf32, #tpu.memory_space<vmem>>, vector<8x32xf32>
    tpu.vector_store %arg10[%c0_9, %c0_10], %9 {strides = array<i32>} : memref<8x32xf32, #tpu.memory_space<vmem>>, vector<8x32xf32>,
    %c3_i32 = arith.constant 3 : i32
    %11 = arith.cmpi eq, %arg2, %c3_i32 : i32
    %12 = arith.extui %11 : i1 to i32
    %c0_i32_11 = arith.constant 0 : i32
    %13 = arith.cmpi ne, %12, %c0_i32_11 : i32
    scf.if %13 {
      %c0_12 = arith.constant 0 : index
      %c0_13 = arith.constant 0 : index
      %14 = vector.load %arg10[%c0_12, %c0_13] : memref<8x32xf32, #tpu.memory_space<vmem>>, vector<8x32xf32>
      %c0_14 = arith.constant 0 : index
      %c0_15 = arith.constant 0 : index
      %15 = vector.load %arg5[%c0_14, %c0_15] : memref<1x32xf32, #tpu.memory_space<vmem>>, vector<1x32xf32>
      %16 = vector.broadcast %15 : vector<1x32xf32> to vector<8x32xf32>
      %17 = arith.addf %14, %16 : vector<8x32xf32>
      %c0_16 = arith.constant 0 : index
      %c0_17 = arith.constant 0 : index
      %c0_18 = arith.constant 0 : index
      %18 = vector.load %arg6[%c0_16, %c0_17, %c0_18] : memref<1x8x32xbf16, #tpu.memory_space<vmem>>, vector<1x8x32xbf16>
      %19 = vector.shape_cast %18 : vector<1x8x32xbf16> to vector<8x32xbf16>
      %20 = arith.extf %19 : vector<8x32xbf16> to vector<8x32xf32>
      %21 = arith.addf %17, %20 : vector<8x32xf32>
      %cst_19 = arith.constant dense<0.000000e+00> : vector<8xf32>
      %22 = vector.multi_reduction <add>, %21, %cst_19 [1] : vector<8x32xf32> to vector<8xf32>
      %23 = vector.shape_cast %22 : vector<8xf32> to vector<8x1xf32>
      %cst_20 = arith.constant 3.200000e+01 : f32
      %24 = vector.broadcast %cst_20 : f32 to vector<8x1xf32>
      %25 = arith.divf %23, %24 : vector<8x1xf32>
      %26 = arith.mulf %21, %21 : vector<8x32xf32>
      %cst_21 = arith.constant dense<0.000000e+00> : vector<8xf32>
      %27 = vector.multi_reduction <add>, %26, %cst_21 [1] : vector<8x32xf32> to vector<8xf32>
      %28 = vector.shape_cast %27 : vector<8xf32> to vector<8x1xf32>
      %cst_22 = arith.constant 3.200000e+01 : f32
      %29 = vector.broadcast %cst_22 : f32 to vector<8x1xf32>
      %30 = arith.divf %28, %29 : vector<8x1xf32>
      %31 = arith.mulf %25, %25 : vector<8x1xf32>
      %32 = arith.subf %30, %31 : vector<8x1xf32>
      %cst_23 = arith.constant 0.000000e+00 : f32
      %33 = vector.broadcast %cst_23 : f32 to vector<8x1xf32>
      %34 = arith.maximumf %32, %33 : vector<8x1xf32>
      %35 = vector.broadcast %25 : vector<8x1xf32> to vector<8x32xf32>
      %36 = arith.subf %21, %35 : vector<8x32xf32>
      %cst_24 = arith.constant 9.99999974E-6 : f32
      %37 = vector.broadcast %cst_24 : f32 to vector<8x1xf32>
      %38 = arith.addf %34, %37 : vector<8x1xf32>
      %39 = math.rsqrt %38 : vector<8x1xf32>
      %40 = vector.broadcast %39 : vector<8x1xf32> to vector<8x32xf32>
      %41 = arith.mulf %36, %40 : vector<8x32xf32>
      %c0_25 = arith.constant 0 : index
      %c0_26 = arith.constant 0 : index
      %42 = vector.load %arg7[%c0_25, %c0_26] : memref<1x32xf32, #tpu.memory_space<vmem>>, vector<1x32xf32>
      %43 = vector.broadcast %42 : vector<1x32xf32> to vector<8x32xf32>
      %44 = arith.mulf %41, %43 : vector<8x32xf32>
      %c0_27 = arith.constant 0 : index
      %c0_28 = arith.constant 0 : index
      %45 = vector.load %arg8[%c0_27, %c0_28] : memref<1x32xf32, #tpu.memory_space<vmem>>, vector<1x32xf32>
      %46 = vector.broadcast %45 : vector<1x32xf32> to vector<8x32xf32>
      %47 = arith.addf %44, %46 : vector<8x32xf32>
      %48 = arith.truncf %47 : vector<8x32xf32> to vector<8x32xbf16>
      %c0_29 = arith.constant 0 : index
      %c0_30 = arith.constant 0 : index
      %c0_31 = arith.constant 0 : index
      %49 = vector.load %arg9[%c0_29, %c0_30, %c0_31] : memref<1x8x32xbf16, #tpu.memory_space<vmem>>, vector<1x8x32xbf16>
      %50 = vector.shape_cast %49 : vector<1x8x32xbf16> to vector<8x32xbf16>
      %51 = vector.shape_cast %48 : vector<8x32xbf16> to vector<1x8x32xbf16>
      tpu.vector_store %arg9[%c0_29, %c0_30, %c0_31], %51 {strides = array<i32>} : memref<1x8x32xbf16, #tpu.memory_space<vmem>>, vector<1x8x32xbf16>,
    } else {
    }
    return
  }
  func.func @transform_0(%arg0: i32, %arg1: i32, %arg2: i32) -> (i32, i32, i32, i32) {
    %c0_i32 = arith.constant 0 : i32
    %c0_i32_0 = arith.constant 0 : i32
    return %arg0, %arg2, %arg1, %c0_i32 : i32, i32, i32, i32
  }
  func.func @transform_1(%arg0: i32, %arg1: i32, %arg2: i32) -> (i32, i32, i32) {
    %c0_i32 = arith.constant 0 : i32
    %c0_i32_0 = arith.constant 0 : i32
    %c0_i32_1 = arith.constant 0 : i32
    return %arg2, %c0_i32, %c0_i32_0 : i32, i32, i32
  }
  func.func @transform_2(%arg0: i32, %arg1: i32, %arg2: i32) -> (i32, i32) {
    %c0_i32 = arith.constant 0 : i32
    %c0_i32_0 = arith.constant 0 : i32
    %c0_i32_1 = arith.constant 0 : i32
    return %c0_i32, %c0_i32_0 : i32, i32
  }
  func.func @transform_3(%arg0: i32, %arg1: i32, %arg2: i32) -> (i32, i32, i32) {
    %c0_i32 = arith.constant 0 : i32
    %c0_i32_0 = arith.constant 0 : i32
    return %arg0, %arg1, %c0_i32 : i32, i32, i32
  }
  func.func @transform_4(%arg0: i32, %arg1: i32, %arg2: i32) -> (i32, i32) {
    %c0_i32 = arith.constant 0 : i32
    %c0_i32_0 = arith.constant 0 : i32
    %c0_i32_1 = arith.constant 0 : i32
    return %c0_i32, %c0_i32_0 : i32, i32
  }
  func.func @transform_5(%arg0: i32, %arg1: i32, %arg2: i32) -> (i32, i32) {
    %c0_i32 = arith.constant 0 : i32
    %c0_i32_0 = arith.constant 0 : i32
    %c0_i32_1 = arith.constant 0 : i32
    return %c0_i32, %c0_i32_0 : i32, i32
  }
  func.func @transform_6(%arg0: i32, %arg1: i32, %arg2: i32) -> (i32, i32, i32) {
    %c0_i32 = arith.constant 0 : i32
    %c0_i32_0 = arith.constant 0 : i32
    return %arg0, %arg1, %c0_i32 : i32, i32, i32
  }
}

module attributes {stable_mosaic.version = 11 : i64} {
  func.func @kernel(%arg0: i32, %arg1: i32, %arg2: i32, %arg3: i32, %arg4: memref<2xi32, #tpu.memory_space<smem>>, %arg5: memref<1x1x8x8xbf16, #tpu.memory_space<vmem>>, %arg6: memref<1x1x8x8xbf16, #tpu.memory_space<vmem>>, %arg7: memref<1x1x8x8xbf16, #tpu.memory_space<vmem>>, %arg8: memref<1x1x8x8xbf16, #tpu.memory_space<vmem>>, %arg9: memref<8x128xf32, #tpu.memory_space<vmem>>, %arg10: memref<8x128xf32, #tpu.memory_space<vmem>>, %arg11: memref<8x8xf32, #tpu.memory_space<vmem>>) attributes {dimension_semantics = [#tpu.dimension_semantics<parallel>, #tpu.dimension_semantics<parallel>, #tpu.dimension_semantics<parallel>, #tpu.dimension_semantics<arbitrary>], iteration_bounds = array<i64: 2, 4, 1, 1>, scalar_prefetch = 1 : i64, scratch_operands = 3 : i64, tpu.core_type = #tpu.core_type<tc>, window_params = [{transform_indices = @transform_0, window_bounds = array<i64: 1, 1, 8, 8>}, {transform_indices = @transform_1, window_bounds = array<i64: 1, 1, 8, 8>}, {transform_indices = @transform_2, window_bounds = array<i64: 1, 1, 8, 8>}, {transform_indices = @transform_3, window_bounds = array<i64: 1, 1, 8, 8>}]} {
    %c0_i32 = arith.constant 0 : i32
    %0 = arith.cmpi eq, %arg3, %c0_i32 : i32
    %1 = arith.extui %0 : i1 to i32
    %c0_i32_0 = arith.constant 0 : i32
    %2 = arith.cmpi ne, %1, %c0_i32_0 : i32
    scf.if %2 {
      %cst = arith.constant 0xFF800000 : f32
      %16 = vector.broadcast %cst : f32 to vector<8x128xf32>
      %c0 = arith.constant 0 : index
      %c0_5 = arith.constant 0 : index
      %17 = vector.load %arg9[%c0, %c0_5] : memref<8x128xf32, #tpu.memory_space<vmem>>, vector<8x128xf32>
      tpu.vector_store %arg9[%c0, %c0_5], %16 {strides = array<i32>} : memref<8x128xf32, #tpu.memory_space<vmem>>, vector<8x128xf32>,
      %cst_6 = arith.constant 0.000000e+00 : f32
      %18 = vector.broadcast %cst_6 : f32 to vector<8x128xf32>
      %c0_7 = arith.constant 0 : index
      %c0_8 = arith.constant 0 : index
      %19 = vector.load %arg10[%c0_7, %c0_8] : memref<8x128xf32, #tpu.memory_space<vmem>>, vector<8x128xf32>
      tpu.vector_store %arg10[%c0_7, %c0_8], %18 {strides = array<i32>} : memref<8x128xf32, #tpu.memory_space<vmem>>, vector<8x128xf32>,
      %cst_9 = arith.constant 0.000000e+00 : f32
      %20 = vector.broadcast %cst_9 : f32 to vector<8x8xf32>
      %c0_10 = arith.constant 0 : index
      %c0_11 = arith.constant 0 : index
      %21 = vector.load %arg11[%c0_10, %c0_11] : memref<8x8xf32, #tpu.memory_space<vmem>>, vector<8x8xf32>
      tpu.vector_store %arg11[%c0_10, %c0_11], %20 {strides = array<i32>} : memref<8x8xf32, #tpu.memory_space<vmem>>, vector<8x8xf32>,
    } else {
    }
    %3 = arith.index_cast %arg0 : i32 to index
    %4 = memref.load %arg4[%3] : memref<2xi32, #tpu.memory_space<smem>>
    %c8_i32 = arith.constant 8 : i32
    %5 = arith.muli %arg3, %c8_i32 : i32
    %6 = arith.cmpi slt, %5, %4 : i32
    %c8_i32_1 = arith.constant 8 : i32
    %7 = arith.muli %arg2, %c8_i32_1 : i32
    %c7_i32 = arith.constant 7 : i32
    %8 = arith.addi %7, %c7_i32 : i32
    %9 = arith.cmpi sle, %5, %8 : i32
    %10 = arith.andi %6, %9 : i1
    %11 = arith.extui %10 : i1 to i32
    %c0_i32_2 = arith.constant 0 : i32
    %12 = arith.cmpi ne, %11, %c0_i32_2 : i32
    scf.if %12 {
      %c0 = arith.constant 0 : index
      %c0_5 = arith.constant 0 : index
      %c0_6 = arith.constant 0 : index
      %c0_7 = arith.constant 0 : index
      %16 = vector.load %arg5[%c0, %c0_5, %c0_6, %c0_7] : memref<1x1x8x8xbf16, #tpu.memory_space<vmem>>, vector<1x1x8x8xbf16>
      %17 = vector.shape_cast %16 : vector<1x1x8x8xbf16> to vector<8x8xbf16>
      %c0_8 = arith.constant 0 : index
      %c0_9 = arith.constant 0 : index
      %c0_10 = arith.constant 0 : index
      %c0_11 = arith.constant 0 : index
      %18 = vector.load %arg6[%c0_8, %c0_9, %c0_10, %c0_11] : memref<1x1x8x8xbf16, #tpu.memory_space<vmem>>, vector<1x1x8x8xbf16>
      %19 = vector.shape_cast %18 : vector<1x1x8x8xbf16> to vector<8x8xbf16>
      %c0_12 = arith.constant 0 : index
      %c0_13 = arith.constant 0 : index
      %c0_14 = arith.constant 0 : index
      %c0_15 = arith.constant 0 : index
      %20 = vector.load %arg7[%c0_12, %c0_13, %c0_14, %c0_15] : memref<1x1x8x8xbf16, #tpu.memory_space<vmem>>, vector<1x1x8x8xbf16>
      %21 = vector.shape_cast %20 : vector<1x1x8x8xbf16> to vector<8x8xbf16>
      %cst = arith.constant dense<0.000000e+00> : vector<8x8xf32>
      %22 = tpu.matmul %17, %19, %cst {dimension_numbers = #tpu.dot_dimension_numbers<[1], [1], [0], [0], [0, 0, 1, 0], [], []>} : vector<8x8xbf16>, vector<8x8xbf16>, vector<8x8xf32> -> vector<8x8xf32>
      %cst_16 = arith.constant 0.353553385 : f32
      %23 = vector.broadcast %cst_16 : f32 to vector<8x8xf32>
      %24 = arith.mulf %22, %23 : vector<8x8xf32>
      %25 = tpu.iota {dimensions = array<i32: 1>} : vector<8x8xi32>
      %26 = vector.broadcast %5 : i32 to vector<8x8xi32>
      %27 = arith.addi %25, %26 : vector<8x8xi32>
      %28 = vector.broadcast %4 : i32 to vector<8x8xi32>
      %29 = arith.cmpi slt, %27, %28 : vector<8x8xi32>
      %30 = tpu.iota {dimensions = array<i32: 0>} : vector<8x8xi32>
      %c8_i32_17 = arith.constant 8 : i32
      %31 = arith.muli %arg2, %c8_i32_17 : i32
      %32 = vector.broadcast %31 : i32 to vector<8x8xi32>
      %33 = arith.addi %30, %32 : vector<8x8xi32>
      %34 = arith.cmpi sle, %27, %33 : vector<8x8xi32>
      %35 = arith.andi %29, %34 : vector<8x8xi1>
      %cst_18 = arith.constant -1.000000e+30 : f32
      %36 = vector.broadcast %cst_18 : f32 to vector<8x8xf32>
      %37 = arith.select %35, %24, %36 : vector<8x8xi1>, vector<8x8xf32>
      %c0_19 = arith.constant 0 : index
      %c0_20 = arith.constant 0 : index
      %38 = vector.load %arg9[%c0_19, %c0_20] : memref<8x128xf32, #tpu.memory_space<vmem>>, vector<8x128xf32>
      %cst_21 = arith.constant dense<0xFF800000> : vector<8xf32>
      %39 = vector.multi_reduction <maximumf>, %37, %cst_21 [1] : vector<8x8xf32> to vector<8xf32>
      %40 = vector.shape_cast %39 : vector<8xf32> to vector<8x1xf32>
      %41 = vector.broadcast %40 : vector<8x1xf32> to vector<8x128xf32>
      %42 = arith.maximumf %38, %41 : vector<8x128xf32>
      %43 = arith.subf %38, %42 : vector<8x128xf32>
      %44 = math.exp %43 : vector<8x128xf32>
      %45 = vector.extract_strided_slice %42 {offsets = [0, 0], sizes = [8, 1], strides = [1, 1]} : vector<8x128xf32> to vector<8x1xf32>
      %46 = vector.broadcast %45 : vector<8x1xf32> to vector<8x8xf32>
      %47 = arith.subf %37, %46 : vector<8x8xf32>
      %48 = math.exp %47 : vector<8x8xf32>
      %c0_22 = arith.constant 0 : index
      %c0_23 = arith.constant 0 : index
      %49 = vector.load %arg10[%c0_22, %c0_23] : memref<8x128xf32, #tpu.memory_space<vmem>>, vector<8x128xf32>
      %50 = arith.mulf %44, %49 : vector<8x128xf32>
      %cst_24 = arith.constant dense<0.000000e+00> : vector<8xf32>
      %51 = vector.multi_reduction <add>, %48, %cst_24 [1] : vector<8x8xf32> to vector<8xf32>
      %52 = vector.shape_cast %51 : vector<8xf32> to vector<8x1xf32>
      %53 = vector.broadcast %52 : vector<8x1xf32> to vector<8x128xf32>
      %54 = arith.addf %50, %53 : vector<8x128xf32>
      %c0_25 = arith.constant 0 : index
      %c0_26 = arith.constant 0 : index
      %55 = vector.load %arg10[%c0_25, %c0_26] : memref<8x128xf32, #tpu.memory_space<vmem>>, vector<8x128xf32>
      tpu.vector_store %arg10[%c0_25, %c0_26], %54 {strides = array<i32>} : memref<8x128xf32, #tpu.memory_space<vmem>>, vector<8x128xf32>,
      %c0_27 = arith.constant 0 : index
      %c0_28 = arith.constant 0 : index
      %56 = vector.load %arg9[%c0_27, %c0_28] : memref<8x128xf32, #tpu.memory_space<vmem>>, vector<8x128xf32>
      tpu.vector_store %arg9[%c0_27, %c0_28], %42 {strides = array<i32>} : memref<8x128xf32, #tpu.memory_space<vmem>>, vector<8x128xf32>,
      %c0_29 = arith.constant 0 : index
      %c0_30 = arith.constant 0 : index
      %57 = vector.load %arg11[%c0_29, %c0_30] : memref<8x8xf32, #tpu.memory_space<vmem>>, vector<8x8xf32>
      %58 = vector.extract_strided_slice %44 {offsets = [0, 0], sizes = [8, 1], strides = [1, 1]} : vector<8x128xf32> to vector<8x1xf32>
      %59 = vector.broadcast %58 : vector<8x1xf32> to vector<8x8xf32>
      %60 = arith.mulf %57, %59 : vector<8x8xf32>
      %61 = arith.truncf %48 : vector<8x8xf32> to vector<8x8xbf16>
      %cst_31 = arith.constant dense<0.000000e+00> : vector<8x8xf32>
      %62 = tpu.matmul %61, %21, %cst_31 {dimension_numbers = #tpu.dot_dimension_numbers<[1], [0], [0], [1], [0, 0, 1, 1], [], []>} : vector<8x8xbf16>, vector<8x8xbf16>, vector<8x8xf32> -> vector<8x8xf32>
      %63 = arith.addf %60, %62 : vector<8x8xf32>
      %c0_32 = arith.constant 0 : index
      %c0_33 = arith.constant 0 : index
      %64 = vector.load %arg11[%c0_32, %c0_33] : memref<8x8xf32, #tpu.memory_space<vmem>>, vector<8x8xf32>
      tpu.vector_store %arg11[%c0_32, %c0_33], %63 {strides = array<i32>} : memref<8x8xf32, #tpu.memory_space<vmem>>, vector<8x8xf32>,
    } else {
    }
    %c0_i32_3 = arith.constant 0 : i32
    %13 = arith.cmpi eq, %arg3, %c0_i32_3 : i32
    %14 = arith.extui %13 : i1 to i32
    %c0_i32_4 = arith.constant 0 : i32
    %15 = arith.cmpi ne, %14, %c0_i32_4 : i32
    scf.if %15 {
      %c0 = arith.constant 0 : index
      %c0_5 = arith.constant 0 : index
      %16 = vector.load %arg10[%c0, %c0_5] : memref<8x128xf32, #tpu.memory_space<vmem>>, vector<8x128xf32>
      %cst = arith.constant 0.000000e+00 : f32
      %17 = vector.broadcast %cst : f32 to vector<8x128xf32>
      %18 = arith.cmpf ole, %16, %17 : vector<8x128xf32>
      %c0_6 = arith.constant 0 : index
      %c0_7 = arith.constant 0 : index
      %19 = vector.load %arg10[%c0_6, %c0_7] : memref<8x128xf32, #tpu.memory_space<vmem>>, vector<8x128xf32>
      %cst_8 = arith.constant 1.000000e+00 : f32
      %20 = vector.broadcast %cst_8 : f32 to vector<8x128xf32>
      %21 = arith.select %18, %20, %19 : vector<8x128xi1>, vector<8x128xf32>
      %c0_9 = arith.constant 0 : index
      %c0_10 = arith.constant 0 : index
      %22 = vector.load %arg11[%c0_9, %c0_10] : memref<8x8xf32, #tpu.memory_space<vmem>>, vector<8x8xf32>
      %23 = vector.extract_strided_slice %21 {offsets = [0, 0], sizes = [8, 1], strides = [1, 1]} : vector<8x128xf32> to vector<8x1xf32>
      %24 = vector.broadcast %23 : vector<8x1xf32> to vector<8x8xf32>
      %25 = arith.divf %22, %24 : vector<8x8xf32>
      %26 = arith.truncf %25 : vector<8x8xf32> to vector<8x8xbf16>
      %c0_11 = arith.constant 0 : index
      %c0_12 = arith.constant 0 : index
      %c0_13 = arith.constant 0 : index
      %c0_14 = arith.constant 0 : index
      %27 = vector.load %arg8[%c0_11, %c0_12, %c0_13, %c0_14] : memref<1x1x8x8xbf16, #tpu.memory_space<vmem>>, vector<1x1x8x8xbf16>
      %28 = vector.shape_cast %27 : vector<1x1x8x8xbf16> to vector<8x8xbf16>
      %29 = vector.shape_cast %26 : vector<8x8xbf16> to vector<1x1x8x8xbf16>
      tpu.vector_store %arg8[%c0_11, %c0_12, %c0_13, %c0_14], %29 {strides = array<i32>} : memref<1x1x8x8xbf16, #tpu.memory_space<vmem>>, vector<1x1x8x8xbf16>,
    } else {
    }
    return
  }
  func.func @transform_0(%arg0: i32, %arg1: i32, %arg2: i32, %arg3: i32, %arg4: memref<2xi32, #tpu.memory_space<smem>>) -> (i32, i32, i32, i32) {
    %c0_i32 = arith.constant 0 : i32
    %c0_i32_0 = arith.constant 0 : i32
    return %arg0, %arg1, %arg2, %c0_i32 : i32, i32, i32, i32
  }
  func.func @transform_1(%arg0: i32, %arg1: i32, %arg2: i32, %arg3: i32, %arg4: memref<2xi32, #tpu.memory_space<smem>>) -> (i32, i32, i32, i32) {
    %c0_i32 = arith.constant 0 : i32
    %c0_i32_0 = arith.constant 0 : i32
    return %arg0, %arg1, %arg3, %c0_i32 : i32, i32, i32, i32
  }
  func.func @transform_2(%arg0: i32, %arg1: i32, %arg2: i32, %arg3: i32, %arg4: memref<2xi32, #tpu.memory_space<smem>>) -> (i32, i32, i32, i32) {
    %c0_i32 = arith.constant 0 : i32
    %c0_i32_0 = arith.constant 0 : i32
    return %arg0, %arg1, %arg3, %c0_i32 : i32, i32, i32, i32
  }
  func.func @transform_3(%arg0: i32, %arg1: i32, %arg2: i32, %arg3: i32, %arg4: memref<2xi32, #tpu.memory_space<smem>>) -> (i32, i32, i32, i32) {
    %c0_i32 = arith.constant 0 : i32
    %c0_i32_0 = arith.constant 0 : i32
    return %arg0, %arg1, %arg2, %c0_i32 : i32, i32, i32, i32
  }
}

module attributes {stable_mosaic.version = 11 : i64} {
  func.func @kernel(%arg0: i32, %arg1: i32, %arg2: i32, %arg3: memref<1x1x8x8xbf16, #tpu.memory_space<vmem>>, %arg4: memref<1x1x8x8xbf16, #tpu.memory_space<vmem>>, %arg5: memref<1x8x32xbf16, #tpu.memory_space<vmem>>, %arg6: memref<1x8x32xbf16, #tpu.memory_space<vmem>>, %arg7: memref<1x32xf32, #tpu.memory_space<vmem>>, %arg8: memref<1x8x32xbf16, #tpu.memory_space<vmem>>, %arg9: memref<1x32xf32, #tpu.memory_space<vmem>>, %arg10: memref<1x32xf32, #tpu.memory_space<vmem>>, %arg11: memref<1x8x32xbf16, #tpu.memory_space<vmem>>, %arg12: memref<8x32xf32, #tpu.memory_space<vmem>>) attributes {dimension_semantics = [#tpu.dimension_semantics<parallel>, #tpu.dimension_semantics<parallel>, #tpu.dimension_semantics<arbitrary>], iteration_bounds = array<i64: 2, 1, 4>, scalar_prefetch = 0 : i64, scratch_operands = 1 : i64, tpu.core_type = #tpu.core_type<tc>, window_params = [{transform_indices = @transform_0, window_bounds = array<i64: 1, 1, 8, 8>}, {transform_indices = @transform_1, window_bounds = array<i64: 1, 1, 8, 8>}, {transform_indices = @transform_2, window_bounds = array<i64: 1, 8, 32>}, {transform_indices = @transform_3, window_bounds = array<i64: 1, 8, 32>}, {pipeline_mode = #tpu.pipeline_mode<synchronous>, transform_indices = @transform_4, window_bounds = array<i64: 1, 32>}, {transform_indices = @transform_5, window_bounds = array<i64: 1, 8, 32>}, {pipeline_mode = #tpu.pipeline_mode<synchronous>, transform_indices = @transform_6, window_bounds = array<i64: 1, 32>}, {pipeline_mode = #tpu.pipeline_mode<synchronous>, transform_indices = @transform_7, window_bounds = array<i64: 1, 32>}, {transform_indices = @transform_8, window_bounds = array<i64: 1, 8, 32>}]} {
    %c0_i32 = arith.constant 0 : i32
    %0 = arith.cmpi eq, %arg2, %c0_i32 : i32
    %1 = arith.extui %0 : i1 to i32
    %c0_i32_0 = arith.constant 0 : i32
    %2 = arith.cmpi ne, %1, %c0_i32_0 : i32
    scf.if %2 {
      %cst_20 = arith.constant 0.000000e+00 : f32
      %20 = vector.broadcast %cst_20 : f32 to vector<8x32xf32>
      %c0_21 = arith.constant 0 : index
      %c0_22 = arith.constant 0 : index
      %21 = vector.load %arg12[%c0_21, %c0_22] : memref<8x32xf32, #tpu.memory_space<vmem>>, vector<8x32xf32>
      tpu.vector_store %arg12[%c0_21, %c0_22], %20 {strides = array<i32>} : memref<8x32xf32, #tpu.memory_space<vmem>>, vector<8x32xf32>,
    } else {
    }
    %c0 = arith.constant 0 : index
    %c0_1 = arith.constant 0 : index
    %c0_2 = arith.constant 0 : index
    %c0_3 = arith.constant 0 : index
    %3 = vector.load %arg3[%c0, %c0_1, %c0_2, %c0_3] : memref<1x1x8x8xbf16, #tpu.memory_space<vmem>>, vector<1x1x8x8xbf16>
    %4 = vector.shape_cast %3 : vector<1x1x8x8xbf16> to vector<8x8xbf16>
    %c0_4 = arith.constant 0 : index
    %c0_5 = arith.constant 0 : index
    %c0_6 = arith.constant 0 : index
    %5 = vector.load %arg5[%c0_4, %c0_5, %c0_6] : memref<1x8x32xbf16, #tpu.memory_space<vmem>>, vector<1x8x32xbf16>
    %6 = vector.shape_cast %5 : vector<1x8x32xbf16> to vector<8x32xbf16>
    %cst = arith.constant dense<0.000000e+00> : vector<8x32xf32>
    %7 = tpu.matmul %4, %6, %cst {dimension_numbers = #tpu.dot_dimension_numbers<[1], [0], [0], [1], [0, 0, 1, 1], [], []>} : vector<8x8xbf16>, vector<8x32xbf16>, vector<8x32xf32> -> vector<8x32xf32>
    %c0_7 = arith.constant 0 : index
    %c0_8 = arith.constant 0 : index
    %c0_9 = arith.constant 0 : index
    %c0_10 = arith.constant 0 : index
    %8 = vector.load %arg4[%c0_7, %c0_8, %c0_9, %c0_10] : memref<1x1x8x8xbf16, #tpu.memory_space<vmem>>, vector<1x1x8x8xbf16>
    %9 = vector.shape_cast %8 : vector<1x1x8x8xbf16> to vector<8x8xbf16>
    %c0_11 = arith.constant 0 : index
    %c0_12 = arith.constant 0 : index
    %c0_13 = arith.constant 0 : index
    %10 = vector.load %arg6[%c0_11, %c0_12, %c0_13] : memref<1x8x32xbf16, #tpu.memory_space<vmem>>, vector<1x8x32xbf16>
    %11 = vector.shape_cast %10 : vector<1x8x32xbf16> to vector<8x32xbf16>
    %cst_14 = arith.constant dense<0.000000e+00> : vector<8x32xf32>
    %12 = tpu.matmul %9, %11, %cst_14 {dimension_numbers = #tpu.dot_dimension_numbers<[1], [0], [0], [1], [0, 0, 1, 1], [], []>} : vector<8x8xbf16>, vector<8x32xbf16>, vector<8x32xf32> -> vector<8x32xf32>
    %13 = arith.addf %7, %12 : vector<8x32xf32>
    %c0_15 = arith.constant 0 : index
    %c0_16 = arith.constant 0 : index
    %14 = vector.load %arg12[%c0_15, %c0_16] : memref<8x32xf32, #tpu.memory_space<vmem>>, vector<8x32xf32>
    %15 = arith.addf %14, %13 : vector<8x32xf32>
    %c0_17 = arith.constant 0 : index
    %c0_18 = arith.constant 0 : index
    %16 = vector.load %arg12[%c0_17, %c0_18] : memref<8x32xf32, #tpu.memory_space<vmem>>, vector<8x32xf32>
    tpu.vector_store %arg12[%c0_17, %c0_18], %15 {strides = array<i32>} : memref<8x32xf32, #tpu.memory_space<vmem>>, vector<8x32xf32>,
    %c3_i32 = arith.constant 3 : i32
    %17 = arith.cmpi eq, %arg2, %c3_i32 : i32
    %18 = arith.extui %17 : i1 to i32
    %c0_i32_19 = arith.constant 0 : i32
    %19 = arith.cmpi ne, %18, %c0_i32_19 : i32
    scf.if %19 {
      %c0_20 = arith.constant 0 : index
      %c0_21 = arith.constant 0 : index
      %20 = vector.load %arg12[%c0_20, %c0_21] : memref<8x32xf32, #tpu.memory_space<vmem>>, vector<8x32xf32>
      %c0_22 = arith.constant 0 : index
      %c0_23 = arith.constant 0 : index
      %21 = vector.load %arg7[%c0_22, %c0_23] : memref<1x32xf32, #tpu.memory_space<vmem>>, vector<1x32xf32>
      %22 = vector.broadcast %21 : vector<1x32xf32> to vector<8x32xf32>
      %23 = arith.addf %20, %22 : vector<8x32xf32>
      %c0_24 = arith.constant 0 : index
      %c0_25 = arith.constant 0 : index
      %c0_26 = arith.constant 0 : index
      %24 = vector.load %arg8[%c0_24, %c0_25, %c0_26] : memref<1x8x32xbf16, #tpu.memory_space<vmem>>, vector<1x8x32xbf16>
      %25 = vector.shape_cast %24 : vector<1x8x32xbf16> to vector<8x32xbf16>
      %26 = arith.extf %25 : vector<8x32xbf16> to vector<8x32xf32>
      %27 = arith.addf %23, %26 : vector<8x32xf32>
      %cst_27 = arith.constant dense<0.000000e+00> : vector<8xf32>
      %28 = vector.multi_reduction <add>, %27, %cst_27 [1] : vector<8x32xf32> to vector<8xf32>
      %29 = vector.shape_cast %28 : vector<8xf32> to vector<8x1xf32>
      %cst_28 = arith.constant 3.200000e+01 : f32
      %30 = vector.broadcast %cst_28 : f32 to vector<8x1xf32>
      %31 = arith.divf %29, %30 : vector<8x1xf32>
      %32 = arith.mulf %27, %27 : vector<8x32xf32>
      %cst_29 = arith.constant dense<0.000000e+00> : vector<8xf32>
      %33 = vector.multi_reduction <add>, %32, %cst_29 [1] : vector<8x32xf32> to vector<8xf32>
      %34 = vector.shape_cast %33 : vector<8xf32> to vector<8x1xf32>
      %cst_30 = arith.constant 3.200000e+01 : f32
      %35 = vector.broadcast %cst_30 : f32 to vector<8x1xf32>
      %36 = arith.divf %34, %35 : vector<8x1xf32>
      %37 = arith.mulf %31, %31 : vector<8x1xf32>
      %38 = arith.subf %36, %37 : vector<8x1xf32>
      %cst_31 = arith.constant 0.000000e+00 : f32
      %39 = vector.broadcast %cst_31 : f32 to vector<8x1xf32>
      %40 = arith.maximumf %38, %39 : vector<8x1xf32>
      %41 = vector.broadcast %31 : vector<8x1xf32> to vector<8x32xf32>
      %42 = arith.subf %27, %41 : vector<8x32xf32>
      %cst_32 = arith.constant 9.99999974E-6 : f32
      %43 = vector.broadcast %cst_32 : f32 to vector<8x1xf32>
      %44 = arith.addf %40, %43 : vector<8x1xf32>
      %45 = math.rsqrt %44 : vector<8x1xf32>
      %46 = vector.broadcast %45 : vector<8x1xf32> to vector<8x32xf32>
      %47 = arith.mulf %42, %46 : vector<8x32xf32>
      %c0_33 = arith.constant 0 : index
      %c0_34 = arith.constant 0 : index
      %48 = vector.load %arg9[%c0_33, %c0_34] : memref<1x32xf32, #tpu.memory_space<vmem>>, vector<1x32xf32>
      %49 = vector.broadcast %48 : vector<1x32xf32> to vector<8x32xf32>
      %50 = arith.mulf %47, %49 : vector<8x32xf32>
      %c0_35 = arith.constant 0 : index
      %c0_36 = arith.constant 0 : index
      %51 = vector.load %arg10[%c0_35, %c0_36] : memref<1x32xf32, #tpu.memory_space<vmem>>, vector<1x32xf32>
      %52 = vector.broadcast %51 : vector<1x32xf32> to vector<8x32xf32>
      %53 = arith.addf %50, %52 : vector<8x32xf32>
      %54 = arith.truncf %53 : vector<8x32xf32> to vector<8x32xbf16>
      %c0_37 = arith.constant 0 : index
      %c0_38 = arith.constant 0 : index
      %c0_39 = arith.constant 0 : index
      %55 = vector.load %arg11[%c0_37, %c0_38, %c0_39] : memref<1x8x32xbf16, #tpu.memory_space<vmem>>, vector<1x8x32xbf16>
      %56 = vector.shape_cast %55 : vector<1x8x32xbf16> to vector<8x32xbf16>
      %57 = vector.shape_cast %54 : vector<8x32xbf16> to vector<1x8x32xbf16>
      tpu.vector_store %arg11[%c0_37, %c0_38, %c0_39], %57 {strides = array<i32>} : memref<1x8x32xbf16, #tpu.memory_space<vmem>>, vector<1x8x32xbf16>,
    } else {
    }
    return
  }
  func.func @transform_0(%arg0: i32, %arg1: i32, %arg2: i32) -> (i32, i32, i32, i32) {
    %c0_i32 = arith.constant 0 : i32
    %c0_i32_0 = arith.constant 0 : i32
    return %arg0, %arg2, %arg1, %c0_i32 : i32, i32, i32, i32
  }
  func.func @transform_1(%arg0: i32, %arg1: i32, %arg2: i32) -> (i32, i32, i32, i32) {
    %c0_i32 = arith.constant 0 : i32
    %c0_i32_0 = arith.constant 0 : i32
    return %arg0, %arg2, %arg1, %c0_i32 : i32, i32, i32, i32
  }
  func.func @transform_2(%arg0: i32, %arg1: i32, %arg2: i32) -> (i32, i32, i32) {
    %c0_i32 = arith.constant 0 : i32
    %c0_i32_0 = arith.constant 0 : i32
    %c0_i32_1 = arith.constant 0 : i32
    return %arg2, %c0_i32, %c0_i32_0 : i32, i32, i32
  }
  func.func @transform_3(%arg0: i32, %arg1: i32, %arg2: i32) -> (i32, i32, i32) {
    %c0_i32 = arith.constant 0 : i32
    %c0_i32_0 = arith.constant 0 : i32
    %c0_i32_1 = arith.constant 0 : i32
    return %arg2, %c0_i32, %c0_i32_0 : i32, i32, i32
  }
  func.func @transform_4(%arg0: i32, %arg1: i32, %arg2: i32) -> (i32, i32) {
    %c0_i32 = arith.constant 0 : i32
    %c0_i32_0 = arith.constant 0 : i32
    %c0_i32_1 = arith.constant 0 : i32
    return %c0_i32, %c0_i32_0 : i32, i32
  }
  func.func @transform_5(%arg0: i32, %arg1: i32, %arg2: i32) -> (i32, i32, i32) {
    %c0_i32 = arith.constant 0 : i32
    %c0_i32_0 = arith.constant 0 : i32
    return %arg0, %arg1, %c0_i32 : i32, i32, i32
  }
  func.func @transform_6(%arg0: i32, %arg1: i32, %arg2: i32) -> (i32, i32) {
    %c0_i32 = arith.constant 0 : i32
    %c0_i32_0 = arith.constant 0 : i32
    %c0_i32_1 = arith.constant 0 : i32
    return %c0_i32, %c0_i32_0 : i32, i32
  }
  func.func @transform_7(%arg0: i32, %arg1: i32, %arg2: i32) -> (i32, i32) {
    %c0_i32 = arith.constant 0 : i32
    %c0_i32_0 = arith.constant 0 : i32
    %c0_i32_1 = arith.constant 0 : i32
    return %c0_i32, %c0_i32_0 : i32, i32
  }
  func.func @transform_8(%arg0: i32, %arg1: i32, %arg2: i32) -> (i32, i32, i32) {
    %c0_i32 = arith.constant 0 : i32
    %c0_i32_0 = arith.constant 0 : i32
    return %arg0, %arg1, %c0_i32 : i32, i32, i32
  }
}

module attributes {stable_mosaic.version = 11 : i64} {
  func.func @kernel(%arg0: i32, %arg1: i32, %arg2: i32, %arg3: i32, %arg4: memref<2xi32, #tpu.memory_space<smem>>, %arg5: memref<1x1x8x8xbf16, #tpu.memory_space<vmem>>, %arg6: memref<1x1x8x8xbf16, #tpu.memory_space<vmem>>, %arg7: memref<1x1x8x8xbf16, #tpu.memory_space<vmem>>, %arg8: memref<1x1x8x8xbf16, #tpu.memory_space<vmem>>, %arg9: memref<8x128xf32, #tpu.memory_space<vmem>>, %arg10: memref<8x128xf32, #tpu.memory_space<vmem>>, %arg11: memref<8x8xf32, #tpu.memory_space<vmem>>) attributes {dimension_semantics = [#tpu.dimension_semantics<parallel>, #tpu.dimension_semantics<parallel>, #tpu.dimension_semantics<parallel>, #tpu.dimension_semantics<arbitrary>], iteration_bounds = array<i64: 2, 4, 1, 1>, scalar_prefetch = 1 : i64, scratch_operands = 3 : i64, tpu.core_type = #tpu.core_type<tc>, window_params = [{transform_indices = @transform_0, window_bounds = array<i64: 1, 1, 8, 8>}, {transform_indices = @transform_1, window_bounds = array<i64: 1, 1, 8, 8>}, {transform_indices = @transform_2, window_bounds = array<i64: 1, 1, 8, 8>}, {transform_indices = @transform_3, window_bounds = array<i64: 1, 1, 8, 8>}]} {
    %c0_i32 = arith.constant 0 : i32
    %0 = arith.cmpi eq, %arg3, %c0_i32 : i32
    %1 = arith.extui %0 : i1 to i32
    %c0_i32_0 = arith.constant 0 : i32
    %2 = arith.cmpi ne, %1, %c0_i32_0 : i32
    scf.if %2 {
      %cst = arith.constant 0xFF800000 : f32
      %12 = vector.broadcast %cst : f32 to vector<8x128xf32>
      %c0 = arith.constant 0 : index
      %c0_4 = arith.constant 0 : index
      %13 = vector.load %arg9[%c0, %c0_4] : memref<8x128xf32, #tpu.memory_space<vmem>>, vector<8x128xf32>
      tpu.vector_store %arg9[%c0, %c0_4], %12 {strides = array<i32>} : memref<8x128xf32, #tpu.memory_space<vmem>>, vector<8x128xf32>,
      %cst_5 = arith.constant 0.000000e+00 : f32
      %14 = vector.broadcast %cst_5 : f32 to vector<8x128xf32>
      %c0_6 = arith.constant 0 : index
      %c0_7 = arith.constant 0 : index
      %15 = vector.load %arg10[%c0_6, %c0_7] : memref<8x128xf32, #tpu.memory_space<vmem>>, vector<8x128xf32>
      tpu.vector_store %arg10[%c0_6, %c0_7], %14 {strides = array<i32>} : memref<8x128xf32, #tpu.memory_space<vmem>>, vector<8x128xf32>,
      %cst_8 = arith.constant 0.000000e+00 : f32
      %16 = vector.broadcast %cst_8 : f32 to vector<8x8xf32>
      %c0_9 = arith.constant 0 : index
      %c0_10 = arith.constant 0 : index
      %17 = vector.load %arg11[%c0_9, %c0_10] : memref<8x8xf32, #tpu.memory_space<vmem>>, vector<8x8xf32>
      tpu.vector_store %arg11[%c0_9, %c0_10], %16 {strides = array<i32>} : memref<8x8xf32, #tpu.memory_space<vmem>>, vector<8x8xf32>,
    } else {
    }
    %3 = arith.index_cast %arg0 : i32 to index
    %4 = memref.load %arg4[%3] : memref<2xi32, #tpu.memory_space<smem>>
    %c8_i32 = arith.constant 8 : i32
    %5 = arith.muli %arg3, %c8_i32 : i32
    %6 = arith.cmpi slt, %5, %4 : i32
    %7 = arith.extui %6 : i1 to i32
    %c0_i32_1 = arith.constant 0 : i32
    %8 = arith.cmpi ne, %7, %c0_i32_1 : i32
    scf.if %8 {
      %c0 = arith.constant 0 : index
      %c0_4 = arith.constant 0 : index
      %c0_5 = arith.constant 0 : index
      %c0_6 = arith.constant 0 : index
      %12 = vector.load %arg5[%c0, %c0_4, %c0_5, %c0_6] : memref<1x1x8x8xbf16, #tpu.memory_space<vmem>>, vector<1x1x8x8xbf16>
      %13 = vector.shape_cast %12 : vector<1x1x8x8xbf16> to vector<8x8xbf16>
      %c0_7 = arith.constant 0 : index
      %c0_8 = arith.constant 0 : index
      %c0_9 = arith.constant 0 : index
      %c0_10 = arith.constant 0 : index
      %14 = vector.load %arg6[%c0_7, %c0_8, %c0_9, %c0_10] : memref<1x1x8x8xbf16, #tpu.memory_space<vmem>>, vector<1x1x8x8xbf16>
      %15 = vector.shape_cast %14 : vector<1x1x8x8xbf16> to vector<8x8xbf16>
      %c0_11 = arith.constant 0 : index
      %c0_12 = arith.constant 0 : index
      %c0_13 = arith.constant 0 : index
      %c0_14 = arith.constant 0 : index
      %16 = vector.load %arg7[%c0_11, %c0_12, %c0_13, %c0_14] : memref<1x1x8x8xbf16, #tpu.memory_space<vmem>>, vector<1x1x8x8xbf16>
      %17 = vector.shape_cast %16 : vector<1x1x8x8xbf16> to vector<8x8xbf16>
      %cst = arith.constant dense<0.000000e+00> : vector<8x8xf32>
      %18 = tpu.matmul %13, %15, %cst {dimension_numbers = #tpu.dot_dimension_numbers<[1], [1], [0], [0], [0, 0, 1, 0], [], []>} : vector<8x8xbf16>, vector<8x8xbf16>, vector<8x8xf32> -> vector<8x8xf32>
      %cst_15 = arith.constant 0.353553385 : f32
      %19 = vector.broadcast %cst_15 : f32 to vector<8x8xf32>
      %20 = arith.mulf %18, %19 : vector<8x8xf32>
      %21 = tpu.iota {dimensions = array<i32: 1>} : vector<8x8xi32>
      %22 = vector.broadcast %5 : i32 to vector<8x8xi32>
      %23 = arith.addi %21, %22 : vector<8x8xi32>
      %24 = vector.broadcast %4 : i32 to vector<8x8xi32>
      %25 = arith.cmpi slt, %23, %24 : vector<8x8xi32>
      %cst_16 = arith.constant -1.000000e+30 : f32
      %26 = vector.broadcast %cst_16 : f32 to vector<8x8xf32>
      %27 = arith.select %25, %20, %26 : vector<8x8xi1>, vector<8x8xf32>
      %c0_17 = arith.constant 0 : index
      %c0_18 = arith.constant 0 : index
      %28 = vector.load %arg9[%c0_17, %c0_18] : memref<8x128xf32, #tpu.memory_space<vmem>>, vector<8x128xf32>
      %cst_19 = arith.constant dense<0xFF800000> : vector<8xf32>
      %29 = vector.multi_reduction <maximumf>, %27, %cst_19 [1] : vector<8x8xf32> to vector<8xf32>
      %30 = vector.shape_cast %29 : vector<8xf32> to vector<8x1xf32>
      %31 = vector.broadcast %30 : vector<8x1xf32> to vector<8x128xf32>
      %32 = arith.maximumf %28, %31 : vector<8x128xf32>
      %33 = arith.subf %28, %32 : vector<8x128xf32>
      %34 = math.exp %33 : vector<8x128xf32>
      %35 = vector.extract_strided_slice %32 {offsets = [0, 0], sizes = [8, 1], strides = [1, 1]} : vector<8x128xf32> to vector<8x1xf32>
      %36 = vector.broadcast %35 : vector<8x1xf32> to vector<8x8xf32>
      %37 = arith.subf %27, %36 : vector<8x8xf32>
      %38 = math.exp %37 : vector<8x8xf32>
      %c0_20 = arith.constant 0 : index
      %c0_21 = arith.constant 0 : index
      %39 = vector.load %arg10[%c0_20, %c0_21] : memref<8x128xf32, #tpu.memory_space<vmem>>, vector<8x128xf32>
      %40 = arith.mulf %34, %39 : vector<8x128xf32>
      %cst_22 = arith.constant dense<0.000000e+00> : vector<8xf32>
      %41 = vector.multi_reduction <add>, %38, %cst_22 [1] : vector<8x8xf32> to vector<8xf32>
      %42 = vector.shape_cast %41 : vector<8xf32> to vector<8x1xf32>
      %43 = vector.broadcast %42 : vector<8x1xf32> to vector<8x128xf32>
      %44 = arith.addf %40, %43 : vector<8x128xf32>
      %c0_23 = arith.constant 0 : index
      %c0_24 = arith.constant 0 : index
      %45 = vector.load %arg10[%c0_23, %c0_24] : memref<8x128xf32, #tpu.memory_space<vmem>>, vector<8x128xf32>
      tpu.vector_store %arg10[%c0_23, %c0_24], %44 {strides = array<i32>} : memref<8x128xf32, #tpu.memory_space<vmem>>, vector<8x128xf32>,
      %c0_25 = arith.constant 0 : index
      %c0_26 = arith.constant 0 : index
      %46 = vector.load %arg9[%c0_25, %c0_26] : memref<8x128xf32, #tpu.memory_space<vmem>>, vector<8x128xf32>
      tpu.vector_store %arg9[%c0_25, %c0_26], %32 {strides = array<i32>} : memref<8x128xf32, #tpu.memory_space<vmem>>, vector<8x128xf32>,
      %c0_27 = arith.constant 0 : index
      %c0_28 = arith.constant 0 : index
      %47 = vector.load %arg11[%c0_27, %c0_28] : memref<8x8xf32, #tpu.memory_space<vmem>>, vector<8x8xf32>
      %48 = vector.extract_strided_slice %34 {offsets = [0, 0], sizes = [8, 1], strides = [1, 1]} : vector<8x128xf32> to vector<8x1xf32>
      %49 = vector.broadcast %48 : vector<8x1xf32> to vector<8x8xf32>
      %50 = arith.mulf %47, %49 : vector<8x8xf32>
      %51 = arith.truncf %38 : vector<8x8xf32> to vector<8x8xbf16>
      %cst_29 = arith.constant dense<0.000000e+00> : vector<8x8xf32>
      %52 = tpu.matmul %51, %17, %cst_29 {dimension_numbers = #tpu.dot_dimension_numbers<[1], [0], [0], [1], [0, 0, 1, 1], [], []>} : vector<8x8xbf16>, vector<8x8xbf16>, vector<8x8xf32> -> vector<8x8xf32>
      %53 = arith.addf %50, %52 : vector<8x8xf32>
      %c0_30 = arith.constant 0 : index
      %c0_31 = arith.constant 0 : index
      %54 = vector.load %arg11[%c0_30, %c0_31] : memref<8x8xf32, #tpu.memory_space<vmem>>, vector<8x8xf32>
      tpu.vector_store %arg11[%c0_30, %c0_31], %53 {strides = array<i32>} : memref<8x8xf32, #tpu.memory_space<vmem>>, vector<8x8xf32>,
    } else {
    }
    %c0_i32_2 = arith.constant 0 : i32
    %9 = arith.cmpi eq, %arg3, %c0_i32_2 : i32
    %10 = arith.extui %9 : i1 to i32
    %c0_i32_3 = arith.constant 0 : i32
    %11 = arith.cmpi ne, %10, %c0_i32_3 : i32
    scf.if %11 {
      %c0 = arith.constant 0 : index
      %c0_4 = arith.constant 0 : index
      %12 = vector.load %arg10[%c0, %c0_4] : memref<8x128xf32, #tpu.memory_space<vmem>>, vector<8x128xf32>
      %cst = arith.constant 0.000000e+00 : f32
      %13 = vector.broadcast %cst : f32 to vector<8x128xf32>
      %14 = arith.cmpf ole, %12, %13 : vector<8x128xf32>
      %c0_5 = arith.constant 0 : index
      %c0_6 = arith.constant 0 : index
      %15 = vector.load %arg10[%c0_5, %c0_6] : memref<8x128xf32, #tpu.memory_space<vmem>>, vector<8x128xf32>
      %cst_7 = arith.constant 1.000000e+00 : f32
      %16 = vector.broadcast %cst_7 : f32 to vector<8x128xf32>
      %17 = arith.select %14, %16, %15 : vector<8x128xi1>, vector<8x128xf32>
      %c0_8 = arith.constant 0 : index
      %c0_9 = arith.constant 0 : index
      %18 = vector.load %arg11[%c0_8, %c0_9] : memref<8x8xf32, #tpu.memory_space<vmem>>, vector<8x8xf32>
      %19 = vector.extract_strided_slice %17 {offsets = [0, 0], sizes = [8, 1], strides = [1, 1]} : vector<8x128xf32> to vector<8x1xf32>
      %20 = vector.broadcast %19 : vector<8x1xf32> to vector<8x8xf32>
      %21 = arith.divf %18, %20 : vector<8x8xf32>
      %22 = arith.truncf %21 : vector<8x8xf32> to vector<8x8xbf16>
      %c0_10 = arith.constant 0 : index
      %c0_11 = arith.constant 0 : index
      %c0_12 = arith.constant 0 : index
      %c0_13 = arith.constant 0 : index
      %23 = vector.load %arg8[%c0_10, %c0_11, %c0_12, %c0_13] : memref<1x1x8x8xbf16, #tpu.memory_space<vmem>>, vector<1x1x8x8xbf16>
      %24 = vector.shape_cast %23 : vector<1x1x8x8xbf16> to vector<8x8xbf16>
      %25 = vector.shape_cast %22 : vector<8x8xbf16> to vector<1x1x8x8xbf16>
      tpu.vector_store %arg8[%c0_10, %c0_11, %c0_12, %c0_13], %25 {strides = array<i32>} : memref<1x1x8x8xbf16, #tpu.memory_space<vmem>>, vector<1x1x8x8xbf16>,
    } else {
    }
    return
  }
  func.func @transform_0(%arg0: i32, %arg1: i32, %arg2: i32, %arg3: i32, %arg4: memref<2xi32, #tpu.memory_space<smem>>) -> (i32, i32, i32, i32) {
    %c0_i32 = arith.constant 0 : i32
    %c0_i32_0 = arith.constant 0 : i32
    return %arg0, %arg1, %arg2, %c0_i32 : i32, i32, i32, i32
  }
  func.func @transform_1(%arg0: i32, %arg1: i32, %arg2: i32, %arg3: i32, %arg4: memref<2xi32, #tpu.memory_space<smem>>) -> (i32, i32, i32, i32) {
    %c0_i32 = arith.constant 0 : i32
    %c0_i32_0 = arith.constant 0 : i32
    return %arg0, %arg1, %arg3, %c0_i32 : i32, i32, i32, i32
  }
  func.func @transform_2(%arg0: i32, %arg1: i32, %arg2: i32, %arg3: i32, %arg4: memref<2xi32, #tpu.memory_space<smem>>) -> (i32, i32, i32, i32) {
    %c0_i32 = arith.constant 0 : i32
    %c0_i32_0 = arith.constant 0 : i32
    return %arg0, %arg1, %arg3, %c0_i32 : i32, i32, i32, i32
  }
  func.func @transform_3(%arg0: i32, %arg1: i32, %arg2: i32, %arg3: i32, %arg4: memref<2xi32, #tpu.memory_space<smem>>) -> (i32, i32, i32, i32) {
    %c0_i32 = arith.constant 0 : i32
    %c0_i32_0 = arith.constant 0 : i32
    return %arg0, %arg1, %arg2, %c0_i32 : i32, i32, i32, i32
  }
}

module attributes {stable_mosaic.version = 11 : i64} {
  func.func @kernel(%arg0: i32, %arg1: i32, %arg2: i32, %arg3: memref<16x32xbf16, #tpu.memory_space<vmem>>, %arg4: memref<32x64xbf16, #tpu.memory_space<vmem>>, %arg5: memref<1x64xf32, #tpu.memory_space<vmem>>, %arg6: memref<16x64xbf16, #tpu.memory_space<vmem>>, %arg7: memref<16x64xf32, #tpu.memory_space<vmem>>) attributes {dimension_semantics = [#tpu.dimension_semantics<parallel>, #tpu.dimension_semantics<parallel>, #tpu.dimension_semantics<arbitrary>], iteration_bounds = array<i64: 1, 1, 1>, scalar_prefetch = 0 : i64, scratch_operands = 1 : i64, tpu.core_type = #tpu.core_type<tc>, window_params = [{transform_indices = @transform_0, window_bounds = array<i64: 16, 32>}, {transform_indices = @transform_1, window_bounds = array<i64: 32, 64>}, {transform_indices = @transform_2, window_bounds = array<i64: 1, 64>}, {transform_indices = @transform_3, window_bounds = array<i64: 16, 64>}]} {
    %c0_i32 = arith.constant 0 : i32
    %0 = arith.cmpi eq, %arg2, %c0_i32 : i32
    %1 = arith.extui %0 : i1 to i32
    %c0_i32_0 = arith.constant 0 : i32
    %2 = arith.cmpi ne, %1, %c0_i32_0 : i32
    scf.if %2 {
      %cst_10 = arith.constant 0.000000e+00 : f32
      %12 = vector.broadcast %cst_10 : f32 to vector<16x64xf32>
      %c0_11 = arith.constant 0 : index
      %c0_12 = arith.constant 0 : index
      %13 = vector.load %arg7[%c0_11, %c0_12] : memref<16x64xf32, #tpu.memory_space<vmem>>, vector<16x64xf32>
      tpu.vector_store %arg7[%c0_11, %c0_12], %12 {strides = array<i32>} : memref<16x64xf32, #tpu.memory_space<vmem>>, vector<16x64xf32>,
    } else {
    }
    %c0 = arith.constant 0 : index
    %c0_1 = arith.constant 0 : index
    %3 = vector.load %arg7[%c0, %c0_1] : memref<16x64xf32, #tpu.memory_space<vmem>>, vector<16x64xf32>
    %c0_2 = arith.constant 0 : index
    %c0_3 = arith.constant 0 : index
    %4 = vector.load %arg3[%c0_2, %c0_3] : memref<16x32xbf16, #tpu.memory_space<vmem>>, vector<16x32xbf16>
    %c0_4 = arith.constant 0 : index
    %c0_5 = arith.constant 0 : index
    %5 = vector.load %arg4[%c0_4, %c0_5] : memref<32x64xbf16, #tpu.memory_space<vmem>>, vector<32x64xbf16>
    %cst = arith.constant dense<0.000000e+00> : vector<16x64xf32>
    %6 = tpu.matmul %4, %5, %cst {dimension_numbers = #tpu.dot_dimension_numbers<[1], [0], [0], [1], [0, 0, 1, 1], [], []>} : vector<16x32xbf16>, vector<32x64xbf16>, vector<16x64xf32> -> vector<16x64xf32>
    %7 = arith.addf %3, %6 : vector<16x64xf32>
    %c0_6 = arith.constant 0 : index
    %c0_7 = arith.constant 0 : index
    %8 = vector.load %arg7[%c0_6, %c0_7] : memref<16x64xf32, #tpu.memory_space<vmem>>, vector<16x64xf32>
    tpu.vector_store %arg7[%c0_6, %c0_7], %7 {strides = array<i32>} : memref<16x64xf32, #tpu.memory_space<vmem>>, vector<16x64xf32>,
    %c0_i32_8 = arith.constant 0 : i32
    %9 = arith.cmpi eq, %arg2, %c0_i32_8 : i32
    %10 = arith.extui %9 : i1 to i32
    %c0_i32_9 = arith.constant 0 : i32
    %11 = arith.cmpi ne, %10, %c0_i32_9 : i32
    scf.if %11 {
      %c0_10 = arith.constant 0 : index
      %c0_11 = arith.constant 0 : index
      %12 = vector.load %arg7[%c0_10, %c0_11] : memref<16x64xf32, #tpu.memory_space<vmem>>, vector<16x64xf32>
      %c0_12 = arith.constant 0 : index
      %c0_13 = arith.constant 0 : index
      %13 = vector.load %arg5[%c0_12, %c0_13] : memref<1x64xf32, #tpu.memory_space<vmem>>, vector<1x64xf32>
      %14 = vector.broadcast %13 : vector<1x64xf32> to vector<16x64xf32>
      %15 = arith.addf %12, %14 : vector<16x64xf32>
      %cst_14 = arith.constant 0.000000e+00 : f32
      %16 = vector.broadcast %cst_14 : f32 to vector<16x64xf32>
      %17 = arith.maximumf %15, %16 : vector<16x64xf32>
      %18 = arith.truncf %17 : vector<16x64xf32> to vector<16x64xbf16>
      %c0_15 = arith.constant 0 : index
      %c0_16 = arith.constant 0 : index
      %19 = vector.load %arg6[%c0_15, %c0_16] : memref<16x64xbf16, #tpu.memory_space<vmem>>, vector<16x64xbf16>
      tpu.vector_store %arg6[%c0_15, %c0_16], %18 {strides = array<i32>} : memref<16x64xbf16, #tpu.memory_space<vmem>>, vector<16x64xbf16>,
    } else {
    }
    return
  }
  func.func @transform_0(%arg0: i32, %arg1: i32, %arg2: i32) -> (i32, i32) {
    %c0_i32 = arith.constant 0 : i32
    return %arg0, %arg2 : i32, i32
  }
  func.func @transform_1(%arg0: i32, %arg1: i32, %arg2: i32) -> (i32, i32) {
    %c0_i32 = arith.constant 0 : i32
    return %arg2, %arg1 : i32, i32
  }
  func.func @transform_2(%arg0: i32, %arg1: i32, %arg2: i32) -> (i32, i32) {
    %c0_i32 = arith.constant 0 : i32
    %c0_i32_0 = arith.constant 0 : i32
    return %c0_i32, %arg1 : i32, i32
  }
  func.func @transform_3(%arg0: i32, %arg1: i32, %arg2: i32) -> (i32, i32) {
    %c0_i32 = arith.constant 0 : i32
    return %arg0, %arg1 : i32, i32
  }
}

module attributes {stable_mosaic.version = 11 : i64} {
  func.func @kernel(%arg0: i32, %arg1: i32, %arg2: i32, %arg3: i32, %arg4: memref<2xi32, #tpu.memory_space<smem>>, %arg5: memref<1x1x8x8xbf16, #tpu.memory_space<vmem>>, %arg6: memref<1x1x8x8xbf16, #tpu.memory_space<vmem>>, %arg7: memref<1x1x8x1xf32, #tpu.memory_space<vmem>>, %arg8: memref<1x1x8x8xf32, #tpu.memory_space<vmem>>) attributes {dimension_semantics = [#tpu.dimension_semantics<parallel>, #tpu.dimension_semantics<parallel>, #tpu.dimension_semantics<parallel>, #tpu.dimension_semantics<arbitrary>], iteration_bounds = array<i64: 2, 4, 1, 1>, scalar_prefetch = 1 : i64, scratch_operands = 0 : i64, tpu.core_type = #tpu.core_type<tc>, window_params = [{transform_indices = @transform_0, window_bounds = array<i64: 1, 1, 8, 8>}, {transform_indices = @transform_1, window_bounds = array<i64: 1, 1, 8, 8>}, {transform_indices = @transform_2, window_bounds = array<i64: 1, 1, 8, 1>}, {transform_indices = @transform_3, window_bounds = array<i64: 1, 1, 8, 8>}]} {
    %c0 = arith.constant 0 : index
    %c0_0 = arith.constant 0 : index
    %c0_1 = arith.constant 0 : index
    %c0_2 = arith.constant 0 : index
    %0 = vector.load %arg5[%c0, %c0_0, %c0_1, %c0_2] : memref<1x1x8x8xbf16, #tpu.memory_space<vmem>>, vector<1x1x8x8xbf16>
    %1 = vector.shape_cast %0 : vector<1x1x8x8xbf16> to vector<8x8xbf16>
    %c0_3 = arith.constant 0 : index
    %c0_4 = arith.constant 0 : index
    %c0_5 = arith.constant 0 : index
    %c0_6 = arith.constant 0 : index
    %2 = vector.load %arg6[%c0_3, %c0_4, %c0_5, %c0_6] : memref<1x1x8x8xbf16, #tpu.memory_space<vmem>>, vector<1x1x8x8xbf16>
    %3 = vector.shape_cast %2 : vector<1x1x8x8xbf16> to vector<8x8xbf16>
    %cst = arith.constant dense<0.000000e+00> : vector<8x8xf32>
    %4 = tpu.matmul %1, %3, %cst {dimension_numbers = #tpu.dot_dimension_numbers<[1], [1], [0], [0], [0, 0, 1, 0], [], []>} : vector<8x8xbf16>, vector<8x8xbf16>, vector<8x8xf32> -> vector<8x8xf32>
    %cst_7 = arith.constant 0.353553385 : f32
    %5 = vector.broadcast %cst_7 : f32 to vector<8x8xf32>
    %6 = arith.mulf %4, %5 : vector<8x8xf32>
    %7 = tpu.iota {dimensions = array<i32: 1>} : vector<8x8xi32>
    %c8_i32 = arith.constant 8 : i32
    %8 = arith.muli %arg3, %c8_i32 : i32
    %9 = vector.broadcast %8 : i32 to vector<8x8xi32>
    %10 = arith.addi %7, %9 : vector<8x8xi32>
    %11 = arith.index_cast %arg0 : i32 to index
    %12 = memref.load %arg4[%11] : memref<2xi32, #tpu.memory_space<smem>>
    %13 = vector.broadcast %12 : i32 to vector<8x8xi32>
    %14 = arith.cmpi slt, %10, %13 : vector<8x8xi32>
    %c0_8 = arith.constant 0 : index
    %c0_9 = arith.constant 0 : index
    %c0_10 = arith.constant 0 : index
    %c0_11 = arith.constant 0 : index
    %15 = vector.load %arg7[%c0_8, %c0_9, %c0_10, %c0_11] : memref<1x1x8x1xf32, #tpu.memory_space<vmem>>, vector<1x1x8x1xf32>
    %16 = vector.shape_cast %15 : vector<1x1x8x1xf32> to vector<8x1xf32>
    %17 = vector.broadcast %16 : vector<8x1xf32> to vector<8x8xf32>
    %18 = arith.subf %6, %17 : vector<8x8xf32>
    %19 = math.exp %18 : vector<8x8xf32>
    %cst_12 = arith.constant 0.000000e+00 : f32
    %20 = vector.broadcast %cst_12 : f32 to vector<8x8xf32>
    %21 = arith.select %14, %19, %20 : vector<8x8xi1>, vector<8x8xf32>
    %c0_13 = arith.constant 0 : index
    %c0_14 = arith.constant 0 : index
    %c0_15 = arith.constant 0 : index
    %c0_16 = arith.constant 0 : index
    %22 = vector.load %arg8[%c0_13, %c0_14, %c0_15, %c0_16] : memref<1x1x8x8xf32, #tpu.memory_space<vmem>>, vector<1x1x8x8xf32>
    %23 = vector.shape_cast %22 : vector<1x1x8x8xf32> to vector<8x8xf32>
    %24 = vector.shape_cast %21 : vector<8x8xf32> to vector<1x1x8x8xf32>
    tpu.vector_store %arg8[%c0_13, %c0_14, %c0_15, %c0_16], %24 {strides = array<i32>} : memref<1x1x8x8xf32, #tpu.memory_space<vmem>>, vector<1x1x8x8xf32>,
    return
  }
  func.func @transform_0(%arg0: i32, %arg1: i32, %arg2: i32, %arg3: i32, %arg4: memref<2xi32, #tpu.memory_space<smem>>) -> (i32, i32, i32, i32) {
    %c0_i32 = arith.constant 0 : i32
    %c0_i32_0 = arith.constant 0 : i32
    return %arg0, %arg1, %arg2, %c0_i32 : i32, i32, i32, i32
  }
  func.func @transform_1(%arg0: i32, %arg1: i32, %arg2: i32, %arg3: i32, %arg4: memref<2xi32, #tpu.memory_space<smem>>) -> (i32, i32, i32, i32) {
    %c0_i32 = arith.constant 0 : i32
    %c0_i32_0 = arith.constant 0 : i32
    return %arg0, %arg1, %arg3, %c0_i32 : i32, i32, i32, i32
  }
  func.func @transform_2(%arg0: i32, %arg1: i32, %arg2: i32, %arg3: i32, %arg4: memref<2xi32, #tpu.memory_space<smem>>) -> (i32, i32, i32, i32) {
    %c0_i32 = arith.constant 0 : i32
    %c0_i32_0 = arith.constant 0 : i32
    return %arg0, %arg1, %arg2, %c0_i32 : i32, i32, i32, i32
  }
  func.func @transform_3(%arg0: i32, %arg1: i32, %arg2: i32, %arg3: i32, %arg4: memref<2xi32, #tpu.memory_space<smem>>) -> (i32, i32, i32, i32) {
    %c0_i32 = arith.constant 0 : i32
    return %arg0, %arg1, %arg2, %arg3 : i32, i32, i32, i32
  }
}

module attributes {stable_mosaic.version = 11 : i64} {
  func.func @kernel(%arg0: i32, %arg1: i32, %arg2: i32, %arg3: i32, %arg4: memref<2xi32, #tpu.memory_space<smem>>, %arg5: memref<1x1x8x8xbf16, #tpu.memory_space<vmem>>, %arg6: memref<1x1x8x8xbf16, #tpu.memory_space<vmem>>, %arg7: memref<1x1x8x8xbf16, #tpu.memory_space<vmem>>, %arg8: memref<1x1x8x8xbf16, #tpu.memory_space<vmem>>, %arg9: memref<1x1x8x1xf32, #tpu.memory_space<vmem>>, %arg10: memref<8x128xf32, #tpu.memory_space<vmem>>, %arg11: memref<8x128xf32, #tpu.memory_space<vmem>>, %arg12: memref<8x8xf32, #tpu.memory_space<vmem>>) attributes {dimension_semantics = [#tpu.dimension_semantics<parallel>, #tpu.dimension_semantics<parallel>, #tpu.dimension_semantics<parallel>, #tpu.dimension_semantics<arbitrary>], iteration_bounds = array<i64: 2, 4, 1, 1>, scalar_prefetch = 1 : i64, scratch_operands = 3 : i64, tpu.core_type = #tpu.core_type<tc>, window_params = [{transform_indices = @transform_0, window_bounds = array<i64: 1, 1, 8, 8>}, {transform_indices = @transform_1, window_bounds = array<i64: 1, 1, 8, 8>}, {transform_indices = @transform_2, window_bounds = array<i64: 1, 1, 8, 8>}, {transform_indices = @transform_3, window_bounds = array<i64: 1, 1, 8, 8>}, {transform_indices = @transform_4, window_bounds = array<i64: 1, 1, 8, 1>}]} {
    %c0_i32 = arith.constant 0 : i32
    %0 = arith.cmpi eq, %arg3, %c0_i32 : i32
    %1 = arith.extui %0 : i1 to i32
    %c0_i32_0 = arith.constant 0 : i32
    %2 = arith.cmpi ne, %1, %c0_i32_0 : i32
    scf.if %2 {
      %cst = arith.constant 0xFF800000 : f32
      %12 = vector.broadcast %cst : f32 to vector<8x128xf32>
      %c0 = arith.constant 0 : index
      %c0_4 = arith.constant 0 : index
      %13 = vector.load %arg10[%c0, %c0_4] : memref<8x128xf32, #tpu.memory_space<vmem>>, vector<8x128xf32>
      tpu.vector_store %arg10[%c0, %c0_4], %12 {strides = array<i32>} : memref<8x128xf32, #tpu.memory_space<vmem>>, vector<8x128xf32>,
      %cst_5 = arith.constant 0.000000e+00 : f32
      %14 = vector.broadcast %cst_5 : f32 to vector<8x128xf32>
      %c0_6 = arith.constant 0 : index
      %c0_7 = arith.constant 0 : index
      %15 = vector.load %arg11[%c0_6, %c0_7] : memref<8x128xf32, #tpu.memory_space<vmem>>, vector<8x128xf32>
      tpu.vector_store %arg11[%c0_6, %c0_7], %14 {strides = array<i32>} : memref<8x128xf32, #tpu.memory_space<vmem>>, vector<8x128xf32>,
      %cst_8 = arith.constant 0.000000e+00 : f32
      %16 = vector.broadcast %cst_8 : f32 to vector<8x8xf32>
      %c0_9 = arith.constant 0 : index
      %c0_10 = arith.constant 0 : index
      %17 = vector.load %arg12[%c0_9, %c0_10] : memref<8x8xf32, #tpu.memory_space<vmem>>, vector<8x8xf32>
      tpu.vector_store %arg12[%c0_9, %c0_10], %16 {strides = array<i32>} : memref<8x8xf32, #tpu.memory_space<vmem>>, vector<8x8xf32>,
    } else {
    }
    %3 = arith.index_cast %arg0 : i32 to index
    %4 = memref.load %arg4[%3] : memref<2xi32, #tpu.memory_space<smem>>
    %c8_i32 = arith.constant 8 : i32
    %5 = arith.muli %arg3, %c8_i32 : i32
    %6 = arith.cmpi slt, %5, %4 : i32
    %7 = arith.extui %6 : i1 to i32
    %c0_i32_1 = arith.constant 0 : i32
    %8 = arith.cmpi ne, %7, %c0_i32_1 : i32
    scf.if %8 {
      %c0 = arith.constant 0 : index
      %c0_4 = arith.constant 0 : index
      %c0_5 = arith.constant 0 : index
      %c0_6 = arith.constant 0 : index
      %12 = vector.load %arg5[%c0, %c0_4, %c0_5, %c0_6] : memref<1x1x8x8xbf16, #tpu.memory_space<vmem>>, vector<1x1x8x8xbf16>
      %13 = vector.shape_cast %12 : vector<1x1x8x8xbf16> to vector<8x8xbf16>
      %c0_7 = arith.constant 0 : index
      %c0_8 = arith.constant 0 : index
      %c0_9 = arith.constant 0 : index
      %c0_10 = arith.constant 0 : index
      %14 = vector.load %arg6[%c0_7, %c0_8, %c0_9, %c0_10] : memref<1x1x8x8xbf16, #tpu.memory_space<vmem>>, vector<1x1x8x8xbf16>
      %15 = vector.shape_cast %14 : vector<1x1x8x8xbf16> to vector<8x8xbf16>
      %c0_11 = arith.constant 0 : index
      %c0_12 = arith.constant 0 : index
      %c0_13 = arith.constant 0 : index
      %c0_14 = arith.constant 0 : index
      %16 = vector.load %arg7[%c0_11, %c0_12, %c0_13, %c0_14] : memref<1x1x8x8xbf16, #tpu.memory_space<vmem>>, vector<1x1x8x8xbf16>
      %17 = vector.shape_cast %16 : vector<1x1x8x8xbf16> to vector<8x8xbf16>
      %cst = arith.constant dense<0.000000e+00> : vector<8x8xf32>
      %18 = tpu.matmul %13, %15, %cst {dimension_numbers = #tpu.dot_dimension_numbers<[1], [1], [0], [0], [0, 0, 1, 0], [], []>} : vector<8x8xbf16>, vector<8x8xbf16>, vector<8x8xf32> -> vector<8x8xf32>
      %cst_15 = arith.constant 0.353553385 : f32
      %19 = vector.broadcast %cst_15 : f32 to vector<8x8xf32>
      %20 = arith.mulf %18, %19 : vector<8x8xf32>
      %21 = tpu.iota {dimensions = array<i32: 1>} : vector<8x8xi32>
      %22 = vector.broadcast %5 : i32 to vector<8x8xi32>
      %23 = arith.addi %21, %22 : vector<8x8xi32>
      %24 = vector.broadcast %4 : i32 to vector<8x8xi32>
      %25 = arith.cmpi slt, %23, %24 : vector<8x8xi32>
      %cst_16 = arith.constant -1.000000e+30 : f32
      %26 = vector.broadcast %cst_16 : f32 to vector<8x8xf32>
      %27 = arith.select %25, %20, %26 : vector<8x8xi1>, vector<8x8xf32>
      %c0_17 = arith.constant 0 : index
      %c0_18 = arith.constant 0 : index
      %28 = vector.load %arg10[%c0_17, %c0_18] : memref<8x128xf32, #tpu.memory_space<vmem>>, vector<8x128xf32>
      %cst_19 = arith.constant dense<0xFF800000> : vector<8xf32>
      %29 = vector.multi_reduction <maximumf>, %27, %cst_19 [1] : vector<8x8xf32> to vector<8xf32>
      %30 = vector.shape_cast %29 : vector<8xf32> to vector<8x1xf32>
      %31 = vector.broadcast %30 : vector<8x1xf32> to vector<8x128xf32>
      %32 = arith.maximumf %28, %31 : vector<8x128xf32>
      %33 = arith.subf %28, %32 : vector<8x128xf32>
      %34 = math.exp %33 : vector<8x128xf32>
      %35 = vector.extract_strided_slice %32 {offsets = [0, 0], sizes = [8, 1], strides = [1, 1]} : vector<8x128xf32> to vector<8x1xf32>
      %36 = vector.broadcast %35 : vector<8x1xf32> to vector<8x8xf32>
      %37 = arith.subf %27, %36 : vector<8x8xf32>
      %38 = math.exp %37 : vector<8x8xf32>
      %c0_20 = arith.constant 0 : index
      %c0_21 = arith.constant 0 : index
      %39 = vector.load %arg11[%c0_20, %c0_21] : memref<8x128xf32, #tpu.memory_space<vmem>>, vector<8x128xf32>
      %40 = arith.mulf %34, %39 : vector<8x128xf32>
      %cst_22 = arith.constant dense<0.000000e+00> : vector<8xf32>
      %41 = vector.multi_reduction <add>, %38, %cst_22 [1] : vector<8x8xf32> to vector<8xf32>
      %42 = vector.shape_cast %41 : vector<8xf32> to vector<8x1xf32>
      %43 = vector.broadcast %42 : vector<8x1xf32> to vector<8x128xf32>
      %44 = arith.addf %40, %43 : vector<8x128xf32>
      %c0_23 = arith.constant 0 : index
      %c0_24 = arith.constant 0 : index
      %45 = vector.load %arg11[%c0_23, %c0_24] : memref<8x128xf32, #tpu.memory_space<vmem>>, vector<8x128xf32>
      tpu.vector_store %arg11[%c0_23, %c0_24], %44 {strides = array<i32>} : memref<8x128xf32, #tpu.memory_space<vmem>>, vector<8x128xf32>,
      %c0_25 = arith.constant 0 : index
      %c0_26 = arith.constant 0 : index
      %46 = vector.load %arg10[%c0_25, %c0_26] : memref<8x128xf32, #tpu.memory_space<vmem>>, vector<8x128xf32>
      tpu.vector_store %arg10[%c0_25, %c0_26], %32 {strides = array<i32>} : memref<8x128xf32, #tpu.memory_space<vmem>>, vector<8x128xf32>,
      %c0_27 = arith.constant 0 : index
      %c0_28 = arith.constant 0 : index
      %47 = vector.load %arg12[%c0_27, %c0_28] : memref<8x8xf32, #tpu.memory_space<vmem>>, vector<8x8xf32>
      %48 = vector.extract_strided_slice %34 {offsets = [0, 0], sizes = [8, 1], strides = [1, 1]} : vector<8x128xf32> to vector<8x1xf32>
      %49 = vector.broadcast %48 : vector<8x1xf32> to vector<8x8xf32>
      %50 = arith.mulf %47, %49 : vector<8x8xf32>
      %51 = arith.truncf %38 : vector<8x8xf32> to vector<8x8xbf16>
      %cst_29 = arith.constant dense<0.000000e+00> : vector<8x8xf32>
      %52 = tpu.matmul %51, %17, %cst_29 {dimension_numbers = #tpu.dot_dimension_numbers<[1], [0], [0], [1], [0, 0, 1, 1], [], []>} : vector<8x8xbf16>, vector<8x8xbf16>, vector<8x8xf32> -> vector<8x8xf32>
      %53 = arith.addf %50, %52 : vector<8x8xf32>
      %c0_30 = arith.constant 0 : index
      %c0_31 = arith.constant 0 : index
      %54 = vector.load %arg12[%c0_30, %c0_31] : memref<8x8xf32, #tpu.memory_space<vmem>>, vector<8x8xf32>
      tpu.vector_store %arg12[%c0_30, %c0_31], %53 {strides = array<i32>} : memref<8x8xf32, #tpu.memory_space<vmem>>, vector<8x8xf32>,
    } else {
    }
    %c0_i32_2 = arith.constant 0 : i32
    %9 = arith.cmpi eq, %arg3, %c0_i32_2 : i32
    %10 = arith.extui %9 : i1 to i32
    %c0_i32_3 = arith.constant 0 : i32
    %11 = arith.cmpi ne, %10, %c0_i32_3 : i32
    scf.if %11 {
      %c0 = arith.constant 0 : index
      %c0_4 = arith.constant 0 : index
      %12 = vector.load %arg11[%c0, %c0_4] : memref<8x128xf32, #tpu.memory_space<vmem>>, vector<8x128xf32>
      %cst = arith.constant 0.000000e+00 : f32
      %13 = vector.broadcast %cst : f32 to vector<8x128xf32>
      %14 = arith.cmpf ole, %12, %13 : vector<8x128xf32>
      %c0_5 = arith.constant 0 : index
      %c0_6 = arith.constant 0 : index
      %15 = vector.load %arg11[%c0_5, %c0_6] : memref<8x128xf32, #tpu.memory_space<vmem>>, vector<8x128xf32>
      %cst_7 = arith.constant 1.000000e+00 : f32
      %16 = vector.broadcast %cst_7 : f32 to vector<8x128xf32>
      %17 = arith.select %14, %16, %15 : vector<8x128xi1>, vector<8x128xf32>
      %c0_8 = arith.constant 0 : index
      %c0_9 = arith.constant 0 : index
      %18 = vector.load %arg12[%c0_8, %c0_9] : memref<8x8xf32, #tpu.memory_space<vmem>>, vector<8x8xf32>
      %19 = vector.extract_strided_slice %17 {offsets = [0, 0], sizes = [8, 1], strides = [1, 1]} : vector<8x128xf32> to vector<8x1xf32>
      %20 = vector.broadcast %19 : vector<8x1xf32> to vector<8x8xf32>
      %21 = arith.divf %18, %20 : vector<8x8xf32>
      %22 = arith.truncf %21 : vector<8x8xf32> to vector<8x8xbf16>
      %c0_10 = arith.constant 0 : index
      %c0_11 = arith.constant 0 : index
      %c0_12 = arith.constant 0 : index
      %c0_13 = arith.constant 0 : index
      %23 = vector.load %arg8[%c0_10, %c0_11, %c0_12, %c0_13] : memref<1x1x8x8xbf16, #tpu.memory_space<vmem>>, vector<1x1x8x8xbf16>
      %24 = vector.shape_cast %23 : vector<1x1x8x8xbf16> to vector<8x8xbf16>
      %25 = vector.shape_cast %22 : vector<8x8xbf16> to vector<1x1x8x8xbf16>
      tpu.vector_store %arg8[%c0_10, %c0_11, %c0_12, %c0_13], %25 {strides = array<i32>} : memref<1x1x8x8xbf16, #tpu.memory_space<vmem>>, vector<1x1x8x8xbf16>,
      %c0_14 = arith.constant 0 : index
      %c0_15 = arith.constant 0 : index
      %26 = vector.load %arg11[%c0_14, %c0_15] : memref<8x128xf32, #tpu.memory_space<vmem>>, vector<8x1xf32>
      %cst_16 = arith.constant 0.000000e+00 : f32
      %27 = vector.broadcast %cst_16 : f32 to vector<8x1xf32>
      %28 = arith.cmpf ole, %26, %27 : vector<8x1xf32>
      %c0_17 = arith.constant 0 : index
      %c0_18 = arith.constant 0 : index
      %29 = vector.load %arg10[%c0_17, %c0_18] : memref<8x128xf32, #tpu.memory_space<vmem>>, vector<8x1xf32>
      %cst_19 = arith.constant 1.000000e-30 : f32
      %30 = vector.broadcast %cst_19 : f32 to vector<8x1xf32>
      %31 = arith.maximumf %26, %30 : vector<8x1xf32>
      %32 = math.log %31 : vector<8x1xf32>
      %33 = arith.addf %29, %32 : vector<8x1xf32>
      %cst_20 = arith.constant 0.000000e+00 : f32
      %34 = vector.broadcast %cst_20 : f32 to vector<8x1xf32>
      %35 = arith.select %28, %34, %33 : vector<8x1xi1>, vector<8x1xf32>
      %c0_21 = arith.constant 0 : index
      %c0_22 = arith.constant 0 : index
      %c0_23 = arith.constant 0 : index
      %c0_24 = arith.constant 0 : index
      %36 = vector.load %arg9[%c0_21, %c0_22, %c0_23, %c0_24] : memref<1x1x8x1xf32, #tpu.memory_space<vmem>>, vector<1x1x8x1xf32>
      %37 = vector.shape_cast %36 : vector<1x1x8x1xf32> to vector<8x1xf32>
      %38 = vector.shape_cast %35 : vector<8x1xf32> to vector<1x1x8x1xf32>
      tpu.vector_store %arg9[%c0_21, %c0_22, %c0_23, %c0_24], %38 {strides = array<i32>} : memref<1x1x8x1xf32, #tpu.memory_space<vmem>>, vector<1x1x8x1xf32>,
    } else {
    }
    return
  }
  func.func @transform_0(%arg0: i32, %arg1: i32, %arg2: i32, %arg3: i32, %arg4: memref<2xi32, #tpu.memory_space<smem>>) -> (i32, i32, i32, i32) {
    %c0_i32 = arith.constant 0 : i32
    %c0_i32_0 = arith.constant 0 : i32
    return %arg0, %arg1, %arg2, %c0_i32 : i32, i32, i32, i32
  }
  func.func @transform_1(%arg0: i32, %arg1: i32, %arg2: i32, %arg3: i32, %arg4: memref<2xi32, #tpu.memory_space<smem>>) -> (i32, i32, i32, i32) {
    %c0_i32 = arith.constant 0 : i32
    %c0_i32_0 = arith.constant 0 : i32
    return %arg0, %arg1, %arg3, %c0_i32 : i32, i32, i32, i32
  }
  func.func @transform_2(%arg0: i32, %arg1: i32, %arg2: i32, %arg3: i32, %arg4: memref<2xi32, #tpu.memory_space<smem>>) -> (i32, i32, i32, i32) {
    %c0_i32 = arith.constant 0 : i32
    %c0_i32_0 = arith.constant 0 : i32
    return %arg0, %arg1, %arg3, %c0_i32 : i32, i32, i32, i32
  }
  func.func @transform_3(%arg0: i32, %arg1: i32, %arg2: i32, %arg3: i32, %arg4: memref<2xi32, #tpu.memory_space<smem>>) -> (i32, i32, i32, i32) {
    %c0_i32 = arith.constant 0 : i32
    %c0_i32_0 = arith.constant 0 : i32
    return %arg0, %arg1, %arg2, %c0_i32 : i32, i32, i32, i32
  }
  func.func @transform_4(%arg0: i32, %arg1: i32, %arg2: i32, %arg3: i32, %arg4: memref<2xi32, #tpu.memory_space<smem>>) -> (i32, i32, i32, i32) {
    %c0_i32 = arith.constant 0 : i32
    %c0_i32_0 = arith.constant 0 : i32
    return %arg0, %arg1, %arg2, %c0_i32 : i32, i32, i32, i32
  }
}

module attributes {stable_mosaic.version = 11 : i64} {
  func.func @kernel(%arg0: i32, %arg1: i32, %arg2: i32, %arg3: memref<16x64xbf16, #tpu.memory_space<vmem>>, %arg4: memref<64x32xbf16, #tpu.memory_space<vmem>>, %arg5: memref<1x32xf32, #tpu.memory_space<vmem>>, %arg6: memref<16x32xbf16, #tpu.memory_space<vmem>>, %arg7: memref<1x32xf32, #tpu.memory_space<vmem>>, %arg8: memref<1x32xf32, #tpu.memory_space<vmem>>, %arg9: memref<16x32xbf16, #tpu.memory_space<vmem>>, %arg10: memref<16x32xf32, #tpu.memory_space<vmem>>) attributes {dimension_semantics = [#tpu.dimension_semantics<parallel>, #tpu.dimension_semantics<parallel>, #tpu.dimension_semantics<arbitrary>], iteration_bounds = array<i64: 1, 1, 1>, scalar_prefetch = 0 : i64, scratch_operands = 1 : i64, tpu.core_type = #tpu.core_type<tc>, window_params = [{transform_indices = @transform_0, window_bounds = array<i64: 16, 64>}, {transform_indices = @transform_1, window_bounds = array<i64: 64, 32>}, {transform_indices = @transform_2, window_bounds = array<i64: 1, 32>}, {transform_indices = @transform_3, window_bounds = array<i64: 16, 32>}, {transform_indices = @transform_4, window_bounds = array<i64: 1, 32>}, {transform_indices = @transform_5, window_bounds = array<i64: 1, 32>}, {transform_indices = @transform_6, window_bounds = array<i64: 16, 32>}]} {
    %c0_i32 = arith.constant 0 : i32
    %0 = arith.cmpi eq, %arg2, %c0_i32 : i32
    %1 = arith.extui %0 : i1 to i32
    %c0_i32_0 = arith.constant 0 : i32
    %2 = arith.cmpi ne, %1, %c0_i32_0 : i32
    scf.if %2 {
      %cst_10 = arith.constant 0.000000e+00 : f32
      %12 = vector.broadcast %cst_10 : f32 to vector<16x32xf32>
      %c0_11 = arith.constant 0 : index
      %c0_12 = arith.constant 0 : index
      %13 = vector.load %arg10[%c0_11, %c0_12] : memref<16x32xf32, #tpu.memory_space<vmem>>, vector<16x32xf32>
      tpu.vector_store %arg10[%c0_11, %c0_12], %12 {strides = array<i32>} : memref<16x32xf32, #tpu.memory_space<vmem>>, vector<16x32xf32>,
    } else {
    }
    %c0 = arith.constant 0 : index
    %c0_1 = arith.constant 0 : index
    %3 = vector.load %arg10[%c0, %c0_1] : memref<16x32xf32, #tpu.memory_space<vmem>>, vector<16x32xf32>
    %c0_2 = arith.constant 0 : index
    %c0_3 = arith.constant 0 : index
    %4 = vector.load %arg3[%c0_2, %c0_3] : memref<16x64xbf16, #tpu.memory_space<vmem>>, vector<16x64xbf16>
    %c0_4 = arith.constant 0 : index
    %c0_5 = arith.constant 0 : index
    %5 = vector.load %arg4[%c0_4, %c0_5] : memref<64x32xbf16, #tpu.memory_space<vmem>>, vector<64x32xbf16>
    %cst = arith.constant dense<0.000000e+00> : vector<16x32xf32>
    %6 = tpu.matmul %4, %5, %cst {dimension_numbers = #tpu.dot_dimension_numbers<[1], [0], [0], [1], [0, 0, 1, 1], [], []>} : vector<16x64xbf16>, vector<64x32xbf16>, vector<16x32xf32> -> vector<16x32xf32>
    %7 = arith.addf %3, %6 : vector<16x32xf32>
    %c0_6 = arith.constant 0 : index
    %c0_7 = arith.constant 0 : index
    %8 = vector.load %arg10[%c0_6, %c0_7] : memref<16x32xf32, #tpu.memory_space<vmem>>, vector<16x32xf32>
    tpu.vector_store %arg10[%c0_6, %c0_7], %7 {strides = array<i32>} : memref<16x32xf32, #tpu.memory_space<vmem>>, vector<16x32xf32>,
    %c0_i32_8 = arith.constant 0 : i32
    %9 = arith.cmpi eq, %arg2, %c0_i32_8 : i32
    %10 = arith.extui %9 : i1 to i32
    %c0_i32_9 = arith.constant 0 : i32
    %11 = arith.cmpi ne, %10, %c0_i32_9 : i32
    scf.if %11 {
      %c0_10 = arith.constant 0 : index
      %c0_11 = arith.constant 0 : index
      %12 = vector.load %arg10[%c0_10, %c0_11] : memref<16x32xf32, #tpu.memory_space<vmem>>, vector<16x32xf32>
      %c0_12 = arith.constant 0 : index
      %c0_13 = arith.constant 0 : index
      %13 = vector.load %arg5[%c0_12, %c0_13] : memref<1x32xf32, #tpu.memory_space<vmem>>, vector<1x32xf32>
      %14 = vector.broadcast %13 : vector<1x32xf32> to vector<16x32xf32>
      %15 = arith.addf %12, %14 : vector<16x32xf32>
      %c0_14 = arith.constant 0 : index
      %c0_15 = arith.constant 0 : index
      %16 = vector.load %arg6[%c0_14, %c0_15] : memref<16x32xbf16, #tpu.memory_space<vmem>>, vector<16x32xbf16>
      %17 = arith.extf %16 : vector<16x32xbf16> to vector<16x32xf32>
      %18 = arith.addf %15, %17 : vector<16x32xf32>
      %cst_16 = arith.constant dense<0.000000e+00> : vector<16xf32>
      %19 = vector.multi_reduction <add>, %18, %cst_16 [1] : vector<16x32xf32> to vector<16xf32>
      %20 = vector.shape_cast %19 : vector<16xf32> to vector<16x1xf32>
      %cst_17 = arith.constant 3.200000e+01 : f32
      %21 = vector.broadcast %cst_17 : f32 to vector<16x1xf32>
      %22 = arith.divf %20, %21 : vector<16x1xf32>
      %23 = arith.mulf %18, %18 : vector<16x32xf32>
      %cst_18 = arith.constant dense<0.000000e+00> : vector<16xf32>
      %24 = vector.multi_reduction <add>, %23, %cst_18 [1] : vector<16x32xf32> to vector<16xf32>
      %25 = vector.shape_cast %24 : vector<16xf32> to vector<16x1xf32>
      %cst_19 = arith.constant 3.200000e+01 : f32
      %26 = vector.broadcast %cst_19 : f32 to vector<16x1xf32>
      %27 = arith.divf %25, %26 : vector<16x1xf32>
      %28 = arith.mulf %22, %22 : vector<16x1xf32>
      %29 = arith.subf %27, %28 : vector<16x1xf32>
      %cst_20 = arith.constant 0.000000e+00 : f32
      %30 = vector.broadcast %cst_20 : f32 to vector<16x1xf32>
      %31 = arith.maximumf %29, %30 : vector<16x1xf32>
      %32 = vector.broadcast %22 : vector<16x1xf32> to vector<16x32xf32>
      %33 = arith.subf %18, %32 : vector<16x32xf32>
      %cst_21 = arith.constant 9.99999974E-6 : f32
      %34 = vector.broadcast %cst_21 : f32 to vector<16x1xf32>
      %35 = arith.addf %31, %34 : vector<16x1xf32>
      %36 = math.rsqrt %35 : vector<16x1xf32>
      %37 = vector.broadcast %36 : vector<16x1xf32> to vector<16x32xf32>
      %38 = arith.mulf %33, %37 : vector<16x32xf32>
      %c0_22 = arith.constant 0 : index
      %c0_23 = arith.constant 0 : index
      %39 = vector.load %arg7[%c0_22, %c0_23] : memref<1x32xf32, #tpu.memory_space<vmem>>, vector<1x32xf32>
      %40 = vector.broadcast %39 : vector<1x32xf32> to vector<16x32xf32>
      %41 = arith.mulf %38, %40 : vector<16x32xf32>
      %c0_24 = arith.constant 0 : index
      %c0_25 = arith.constant 0 : index
      %42 = vector.load %arg8[%c0_24, %c0_25] : memref<1x32xf32, #tpu.memory_space<vmem>>, vector<1x32xf32>
      %43 = vector.broadcast %42 : vector<1x32xf32> to vector<16x32xf32>
      %44 = arith.addf %41, %43 : vector<16x32xf32>
      %45 = arith.truncf %44 : vector<16x32xf32> to vector<16x32xbf16>
      %c0_26 = arith.constant 0 : index
      %c0_27 = arith.constant 0 : index
      %46 = vector.load %arg9[%c0_26, %c0_27] : memref<16x32xbf16, #tpu.memory_space<vmem>>, vector<16x32xbf16>
      tpu.vector_store %arg9[%c0_26, %c0_27], %45 {strides = array<i32>} : memref<16x32xbf16, #tpu.memory_space<vmem>>, vector<16x32xbf16>,
    } else {
    }
    return
  }
  func.func @transform_0(%arg0: i32, %arg1: i32, %arg2: i32) -> (i32, i32) {
    %c0_i32 = arith.constant 0 : i32
    return %arg0, %arg2 : i32, i32
  }
  func.func @transform_1(%arg0: i32, %arg1: i32, %arg2: i32) -> (i32, i32) {
    %c0_i32 = arith.constant 0 : i32
    return %arg2, %arg1 : i32, i32
  }
  func.func @transform_2(%arg0: i32, %arg1: i32, %arg2: i32) -> (i32, i32) {
    %c0_i32 = arith.constant 0 : i32
    %c0_i32_0 = arith.constant 0 : i32
    return %c0_i32, %arg1 : i32, i32
  }
  func.func @transform_3(%arg0: i32, %arg1: i32, %arg2: i32) -> (i32, i32) {
    %c0_i32 = arith.constant 0 : i32
    return %arg0, %arg1 : i32, i32
  }
  func.func @transform_4(%arg0: i32, %arg1: i32, %arg2: i32) -> (i32, i32) {
    %c0_i32 = arith.constant 0 : i32
    %c0_i32_0 = arith.constant 0 : i32
    return %c0_i32, %arg1 : i32, i32
  }
  func.func @transform_5(%arg0: i32, %arg1: i32, %arg2: i32) -> (i32, i32) {
    %c0_i32 = arith.constant 0 : i32
    %c0_i32_0 = arith.constant 0 : i32
    return %c0_i32, %arg1 : i32, i32
  }
  func.func @transform_6(%arg0: i32, %arg1: i32, %arg2: i32) -> (i32, i32) {
    %c0_i32 = arith.constant 0 : i32
    return %arg0, %arg1 : i32, i32
  }
}

</mosaic_0001>

<bundles_post_ra>
// kernel: decoder_forward.21
= control target key start
LH: loop header
LB: loop body
LE: loop exit
PB: predicated region body
PF: predicated region fallthrough
CT: control target
= control target key end

     0   :  { %vm19_vm0 = vcmask 523264   ;;  %v151_v0 = vmov 0.0   ;;  %vm152_vm1 = vmmov 0   ;;  %vm47_vm2 = vcmask 261120   ;;  %s195_s1 = inlined_call_operand.vmem [shape: bf16[32,64], index: 1, kind: input, shape index: {}]   ;;  %s196_s0 = inlined_call_operand.vmem [shape: bf16[16,32], index: 0, kind: input, shape index: {}]   ;;  %s197_s2 = inlined_call_operand.vmem [shape: f32[1,64], index: 2, kind: input, shape index: {}]   ;;  %s198_s3 = inlined_call_operand.vmem [shape: bf16[16,64], index: 3, kind: output, shape index: {}]  }
   0x1   :  { %138 = vmatprep.subr.bf16.mxu0 %v151_v0  ;;  %v148_v1 = vld [vmem:[%s195_s1] sm:$0xff]   ;;  %142 = vmatprep.mubr.msk.bf16.mxu0 %vm152_vm1, %v151_v0  ;;  %20 = vst.msk [vmem:[#allocation2] sm:$0xff] %vm19_vm0, %v151_v0  ;;  %21 = vst.msk [vmem:[#allocation2 + $0x8] sm:$0xff] %vm19_vm0, %v151_v0  ;;  %v149_v2 = vld [vmem:[%s195_s1 + $0x8] sm:$0xff]   ;;  %vm119_vm3 = vcmask 519168  }
   0x2   :  { %139 = vmatpush3.bf16.msra.mxu0 %v148_v1  ;;  %v150_v3 = vld [vmem:[%s196_s0] sm:$0xff]  }
   0x3   :  { %140 = vmatprep.subr.bf16.mxu0 %v151_v0  ;;  %v130_v12 = vld [vmem:[%s197_s2] ss:$0 sm:$0xff] }
   0x6   :  { %141 = vmatpush3.bf16.msra.mxu0 %v149_v2 }
   0x8   :  { %v22_v4 = vld [vmem:[#allocation2] sm:$0xff]  ;;  %v23_v6 = vld [vmem:[#allocation2 + $0x8] sm:$0xff] }
   0x9   :  { %143 = vmatmul.mubr.msk.bf16.vlgmr.msra.gmra.mrb[0].mxu0 %vm47_vm2, %v150_v3 }
  0xdc   :  { %v85_v5 = vpop.f32.mrb[0].mxu0 }
  0xdd   :  { %v92_v7 = vadd.f32 %v85_v5, %v22_v4  ;;  %v144_v8 = vpop.f32.mrb[1].mxu0 }
  0xde   :  { %v88_v9 = vpop.f32.mrb[2].mxu0 }
  0xdf   :  { %95 = vst.msk [vmem:[#allocation2] sm:$0xff] %vm19_vm0, %v92_v7  ;;  %v93_v10 = vadd.f32 %v88_v9, %v23_v6  ;;  %v145_v11 = vpop.f32.mrb[3].mxu0 }
  0xe1   :  { %96 = vst.msk [vmem:[#allocation2 + $0x8] sm:$0xff] %vm19_vm0, %v93_v10 }
  0xe6   :  { %v100_v13 = vld [vmem:[#allocation2] sm:$0xff] }
  0xe7   :  { %v109_v14 = vadd.f32 %v130_v12, %v100_v13 }
  0xe8   :  { %v101_v15 = vld [vmem:[#allocation2 + $0x8] sm:$0xff] }
  0xe9   :  { %v133_v16 = vpack.c.bf16 %v109_v14, %v109_v14  ;;  %v110_v17 = vadd.f32 %v130_v12, %v101_v15 }
  0xeb   :  { %120 = vst.msk [vmem:[%s198_s3] sm:$0xf] %vm119_vm3, %v133_v16  ;;  %v134_v18 = vpack.c.bf16 %v110_v17, %v110_v17 }
  0xed   :  { %121 = vst.msk [vmem:[%s198_s3 + $0x4] sm:$0xf] %vm119_vm3, %v134_v18 }

// kernel: decoder_forward.23
= control target key start
LH: loop header
LB: loop body
LE: loop exit
PB: predicated region body
PF: predicated region fallthrough
CT: control target
= control target key end

     0   :  { %vm19_vm0 = vcmask 785408   ;;  %v151_v0 = vmov 0.0   ;;  %vm152_vm1 = vmmov 0   ;;  %vm47_vm2 = vcmask 261120   ;;  %s195_s1 = inlined_call_operand.vmem [shape: bf16[32,96], index: 1, kind: input, shape index: {}]   ;;  %s196_s0 = inlined_call_operand.vmem [shape: bf16[16,32], index: 0, kind: input, shape index: {}]   ;;  %s197_s2 = inlined_call_operand.vmem [shape: f32[1,96], index: 2, kind: input, shape index: {}]   ;;  %s198_s3 = inlined_call_operand.vmem [shape: bf16[16,96], index: 3, kind: output, shape index: {}]  }
   0x1   :  { %138 = vmatprep.subr.bf16.mxu0 %v151_v0  ;;  %v148_v1 = vld [vmem:[%s195_s1] sm:$0xff]   ;;  %142 = vmatprep.mubr.msk.bf16.mxu0 %vm152_vm1, %v151_v0  ;;  %20 = vst.msk [vmem:[#allocation2] sm:$0xff] %vm19_vm0, %v151_v0  ;;  %21 = vst.msk [vmem:[#allocation2 + $0x8] sm:$0xff] %vm19_vm0, %v151_v0  ;;  %v149_v2 = vld [vmem:[%s195_s1 + $0x8] sm:$0xff]   ;;  %vm119_vm3 = vcmask 781312  }
   0x2   :  { %139 = vmatpush3.bf16.msra.mxu0 %v148_v1  ;;  %v150_v3 = vld [vmem:[%s196_s0] sm:$0xff]  }
   0x3   :  { %140 = vmatprep.subr.bf16.mxu0 %v151_v0  ;;  %v130_v12 = vld [vmem:[%s197_s2] ss:$0 sm:$0xff] }
   0x6   :  { %141 = vmatpush3.bf16.msra.mxu0 %v149_v2 }
   0x8   :  { %v22_v4 = vld [vmem:[#allocation2] sm:$0xff]  ;;  %v23_v6 = vld [vmem:[#allocation2 + $0x8] sm:$0xff] }
   0x9   :  { %143 = vmatmul.mubr.msk.bf16.vlgmr.msra.gmra.mrb[0].mxu0 %vm47_vm2, %v150_v3 }
  0xdc   :  { %v85_v5 = vpop.f32.mrb[0].mxu0 }
  0xdd   :  { %v92_v7 = vadd.f32 %v85_v5, %v22_v4  ;;  %v144_v8 = vpop.f32.mrb[1].mxu0 }
  0xde   :  { %v88_v9 = vpop.f32.mrb[2].mxu0 }
  0xdf   :  { %95 = vst.msk [vmem:[#allocation2] sm:$0xff] %vm19_vm0, %v92_v7  ;;  %v93_v10 = vadd.f32 %v88_v9, %v23_v6  ;;  %v145_v11 = vpop.f32.mrb[3].mxu0 }
  0xe1   :  { %96 = vst.msk [vmem:[#allocation2 + $0x8] sm:$0xff] %vm19_vm0, %v93_v10 }
  0xe6   :  { %v100_v13 = vld [vmem:[#allocation2] sm:$0xff] }
  0xe7   :  { %v109_v14 = vadd.f32 %v130_v12, %v100_v13 }
  0xe8   :  { %v101_v15 = vld [vmem:[#allocation2 + $0x8] sm:$0xff] }
  0xe9   :  { %v133_v16 = vpack.c.bf16 %v109_v14, %v109_v14  ;;  %v110_v17 = vadd.f32 %v130_v12, %v101_v15 }
  0xeb   :  { %120 = vst.msk [vmem:[%s198_s3] sm:$0xf] %vm119_vm3, %v133_v16  ;;  %v134_v18 = vpack.c.bf16 %v110_v17, %v110_v17 }
  0xed   :  { %121 = vst.msk [vmem:[%s198_s3 + $0x4] sm:$0xf] %vm119_vm3, %v134_v18 }

// kernel: decoder_forward.25
= control target key start
LH: loop header
LB: loop body
LE: loop exit
PB: predicated region body
PF: predicated region fallthrough
CT: control target
= control target key end

     0   :  { %s719_s21 = smov 0   ;;  %s721_s22 = smov 0   ;;  %s809_s0 = inlined_call_operand.vmem [shape: bf16[2,4,8,8], index: 0, kind: input, shape index: {}]   ;;  %s810_s1 = inlined_call_operand.vmem [shape: bf16[4,8,32], index: 1, kind: input, shape index: {}]   ;;  %s811_s2 = inlined_call_operand.vmem [shape: f32[1,32], index: 2, kind: input, shape index: {}]   ;;  %s812_s3 = inlined_call_operand.vmem [shape: bf16[2,8,32], index: 3, kind: input, shape index: {}]   ;;  %s813_s4 = inlined_call_operand.vmem [shape: f32[1,32], index: 4, kind: input, shape index: {}]   ;;  %s814_s5 = inlined_call_operand.vmem [shape: f32[1,32], index: 5, kind: input, shape index: {}]   ;;  %s815_s6 = inlined_call_operand.vmem [shape: bf16[2,8,32], index: 6, kind: output, shape index: {}]  }
   0x1   :  { %s723_s23 = smov 0   ;;  %s725_s24 = smov 0  }
   0x2   :  { %s727_s25 = smov 0  }
   0x3 LB: > { %s28_s26 = sadd.s32 1, %s671_s23  ;;  %s35_s27 = sadd.s32 1, %s675_s24  ;;  %s679_s25 = sphi %s727_s25, %s16_s25   ;;  %s675_s24 = sphi %s725_s24, %s819_s24   ;;  %s671_s23 = sphi %s723_s23, %s818_s23   ;;  %s667_s22 = sphi %s721_s22, %s817_s22   ;;  %s663_s21 = sphi %s719_s21, %s816_s21  }
   0x4   : > { %p29_p0 = scmp.ge.s32.totalorder %s28_s26, 4  ;;  %p574_p1 = scmp.ge.s32.totalorder %s679_s25, 1 }
   0x5   : > { %p266_p2 = scmp.lt.s32.totalorder %s679_s25, 9 }
   0x6   : > { %s821_s26 = smov (%p29_p0, %s28_s26), 0  ;;  %s823_s27 = smov (!%p29_p0, %s35_s27), %s675_s24 }
   0x7   : > { %p267_p3 = pnand %p574_p1, %p266_p2  ;;  %p37_p4 = scmp.ge.s32.totalorder %s823_s27, 2 }
   0x8   : > { %p315_p5 = scmp.lt.s32.totalorder (!%p267_p3), %s667_s22, 1  ;;  %p317_p6 = scmp.lt.s32.totalorder (!%p267_p3), %s663_s21, 3 }
   0x9   : > { %s825_s27 = smov (%p37_p4, %s823_s27), 0  ;;  %270 = sbr.rel (%p267_p3) target bundleno = 429 (0x1ad), region = 44 }
   0xa   : > { %p580_p7 = scmp.ne.s32.totalorder (!%p267_p3), %s663_s21, 0 }
  0x10   : > { %s827_s22 = smov (!%p315_p5, %s667_s22), 1  ;;  %348 = sbr.rel (%p580_p7) target bundleno = 23 (0x17), region = 48 }
  0x11   : > { %s318_s28 = scalar_select %p317_p6, %s663_s21, 3 }
  0x12   : > { %s753_s29 = sshll.u32 %s827_s22, 2  ;;  %vm349_vm0 = vcmask (!%p580_p7), 261120   ;;  %v681_v0 = vmov (!%p580_p7), 0.0  }
  0x13   : > { %s323_s30 = sadd.s32 %s753_s29, %s318_s28  ;;  %s577_s7 = sshll.u32 %s318_s28, 2  ;;  %350 = vst.msk [vmem:[#allocation2] sm:$0xff] (!%p580_p7), %vm349_vm0, %v681_v0 }
  0x14   : > { %s576_s8 = sshll.u32 %s323_s30, 2  ;;  %s329_s11 = scalar_lea.vmem %s810_s1, %s577_s7 }
  0x15   : > { %s325_s14 = scalar_lea.vmem %s809_s0, %s576_s8  ;;  %s336_s17 = scalar_lea.vmem %s812_s3, %s753_s29 }
  0x16   : > { %s343_s20 = scalar_lea.vmem %s815_s6, %s753_s29 }
  0x17 PF: > { %v352_v1 = vld [vmem:[%s329_s11] sm:$0xf]  ;;  %vm357_vm1 = vcmask 1043456   ;;  %v682_v2 = vmov 0.0   ;;  %vm683_vm2 = vmmov 0   ;;  %vm353_vm3 = vcmask 64512  }
  0x18   : > { %590 = vmatprep.subr.bf16.mxu0 %v682_v2  ;;  %v359_v3 = vsel %vm357_vm1, %v352_v1, 0  ;;  %592 = vmatprep.mubr.msk.bf16.mxu0 %vm683_vm2, %v682_v2  ;;  %v351_v4 = vld [vmem:[%s325_s14] sm:$0xf]  ;;  %vm403_vm4 = vcmask 261120   ;;  %p582_p8 = scmp.ne.s32.totalorder %s663_s21, 3 }
  0x19   : > { %591 = vmatpush3.bf16.msra.mxu0 %v359_v3  ;;  %v583_v12 = vld [vmem:[%s811_s2] ss:$0 sm:$0xff] (!%p582_p8)  ;;  %vm455_vm5 = vcmask (!%p582_p8), 257024  }
  0x1a   : > { %v401_v5 = vld [vmem:[#allocation2] sm:$0xff] }
  0x1b   : > { %v418_v13 = vld [vmem:[%s336_s17] sm:$0xf] (!%p582_p8) }
  0x1c   : > { %593 = vmatmul.mubr.msk.bf16.vlgmr.msra.gmra.mrb[0].mxu0 %vm353_vm3, %v351_v4  ;;  %v419_v15 = vunpack.c.l.bf16 (!%p582_p8), %v418_v13  ;;  %v584_v30 = vld [vmem:[%s813_s4] ss:$0 sm:$0xff] (!%p582_p8) }
  0x1d   : > { %v585_v32 = vld [vmem:[%s814_s5] ss:$0 sm:$0xff] (!%p582_p8) }
  0xec   : > { %408 = sbr.rel (%p582_p8) target bundleno = 429 (0x1ad), region = 52 }
  0xef   : > { %v395_v6 = vpop.f32.mrb[0].mxu0 }
  0xf0   : > { %v402_v7 = vadd.f32 %v401_v5, %v395_v6  ;;  %v594_v8 = vpop.f32.mrb[1].mxu0 }
  0xf1   : > { %v398_v9 = vpop.f32.mrb[2].mxu0 }
  0xf2   : > { %404 = vst.msk [vmem:[#allocation2] sm:$0xff] %vm403_vm4, %v402_v7  ;;  %v595_v10 = vpop.f32.mrb[3].mxu0 }
  0xf9   : > { %v409_v11 = vld [vmem:[#allocation2] sm:$0xff] }
  0xfa   : > { %v417_v14 = vadd.f32 %v583_v12, %v409_v11 }
  0xfc   : > { %v420_v16 = vadd.f32 %v419_v15, %v417_v14 }
  0xfe   : > { %v421_v17 = vsel %vm403_vm4, %v420_v16, 0.0  ;;  %v426_v18 = vmul.f32 %v420_v16, %v420_v16 }
  0xff   : > { %422 = vadd.xlane.f32.xlu0 %v421_v17 }
 0x100   : > { %v427_v19 = vsel %vm403_vm4, %v426_v18, 0.0 }
 0x103   : > { %428 = vadd.xlane.f32.xlu0 %v427_v19 }
 0x18c   : > { %v423_v20 = vpop.xlane.xlu0 %422 }
 0x18d   : > { %v425_v21 = vmul.f32 0.03125, %v423_v20 }
 0x18f   : > { %v431_v23 = vmul.f32 %v425_v21, %v425_v21  ;;  %v434_v28 = vsub.f32 %v420_v16, %v425_v21 }
 0x190   : > { %v429_v22 = vpop.xlane.xlu0 %428 }
 0x191   : > { %v430_v24 = vmul.f32 0.03125, %v429_v22 }
 0x193   : > { %v432_v25 = vsub.f32 %v430_v24, %v431_v23 }
 0x195   : > { %v433_v26 = vmax.f32 %v432_v25, 0.0 }
 0x197   : > { %v435_v27 = vadd.f32 1e-05, %v433_v26 }
 0x199   : > { %639 = vrsqrt.f32 %v435_v27 }
 0x1a3   : > { %v640_v29 = vpop.eup %639 }
 0x1a4   : > { %v437_v31 = vmul.f32 %v640_v29, %v434_v28 }
 0x1a6   : > { %v445_v33 = vmul.f32 %v584_v30, %v437_v31 }
 0x1a8   : > { %v453_v34 = vadd.f32 %v585_v32, %v445_v33 }
 0x1aa   : > { %v454_v35 = vpack.c.bf16 %v453_v34, %v453_v34 }
 0x1ac   : > { %456 = vst.msk [vmem:[%s343_s20] sm:$0xf] %vm455_vm5, %v454_v35 }
 0x1ad PF: > { %s16_s25 = sadd.s32 1, %s679_s25   ;;  %s816_s21 = smov %s671_s23 }
 0x1ae   : > { %p13_p9 = scmp.ge.s32.totalorder %s16_s25, 10   ;;  %s817_s22 = smov %s675_s24 }
 0x1af   : > { %s818_s23 = smov %s821_s26  ;;  %s819_s24 = smov %s825_s27 }
 0x1b0   :  { %15 = sbr.rel (!%p13_p9) target bundleno = 3 (0x3), region = 88 }

// kernel: decoder_forward.24
= control target key start
LH: loop header
LB: loop body
LE: loop exit
PB: predicated region body
PF: predicated region fallthrough
CT: control target
= control target key end

     0   :  { %s915_s0 = inlined_call_operand.vmem [shape: s32[2], index: 0, kind: input, shape index: {}]   ;;  %s916_s1 = inlined_call_operand.vmem [shape: bf16[2,4,8,8], index: 1, kind: input, shape index: {}]   ;;  %s917_s2 = inlined_call_operand.vmem [shape: bf16[2,4,8,8], index: 2, kind: input, shape index: {}]   ;;  %s918_s3 = inlined_call_operand.vmem [shape: bf16[2,4,8,8], index: 3, kind: input, shape index: {}]   ;;  %s919_s4 = inlined_call_operand.vmem [shape: bf16[2,4,8,8], index: 4, kind: output, shape index: {}]  }
   0x1   :  { %s9_s17 = sshll.u32 %s915_s0, 4  ;;  %s10_s17 = int_to_ptr.vmem [resolvable:$true] %s9_s17 }
   0x2   :  { %s746_s18 = scalar_lea.vmem %s10_s17, 16  ;;  %p751_p1 = scmp.lt.s32.totalorder %s10_s17, %s10_s17 }
   0x3   :  { %p747_p0 = scmp.ne.s32.totalorder %s10_s17, %s746_s18  ;;  %p752_p2 = scmp.lt.s32.totalorder %s746_s18, %s746_s18 }
   0x5   :  { %p753_p3 = por %p752_p2, %p751_p1 }
   0x7   :  { %p754_p4 = pnand %p753_p3, %p747_p0 }
   0x9   :  { %757 = shalt.err (!%p754_p4)  }
   0xa   :  { %s800_s19 = smov [#allocation6]  }
   0xb   :  { %12 = dma.vmem_to_smem %s10_s17, 16, %s800_s19, [#allocation5] }
   0xc   :  { %778 = dma.done.wait [#allocation5], 16 }
   0xd   :  { %779 = vsyncadd [#allocation5], 4294967280 }
   0xe   :  { %14 = sfence }
   0xf   :  { %s835_s20 = smov 0   ;;  %s837_s21 = smov 0  }
  0x10   :  { %s839_s22 = smov 0   ;;  %s841_s0 = smov 0  }
  0x11   :  { %s843_s23 = smov 0  }
  0x12 LB: > { %s42_s24 = sadd.s32 1, %s790_s22  ;;  %s46_s25 = sadd.s32 1, %s794_s0  ;;  %s798_s23 = sphi %s843_s23, %s20_s23   ;;  %s794_s0 = sphi %s841_s0, %s923_s0   ;;  %s790_s22 = sphi %s839_s22, %s922_s22   ;;  %s786_s21 = sphi %s837_s21, %s921_s21   ;;  %s782_s20 = sphi %s835_s20, %s920_s20  }
  0x13   : > { %p44_p5 = scmp.ge.s32.totalorder %s42_s24, 4  ;;  %p658_p6 = scmp.ge.s32.totalorder %s798_s23, 1 }
  0x14   : > { %p224_p7 = scmp.lt.s32.totalorder %s798_s23, 9 }
  0x15   : > { %s925_s24 = smov (%p44_p5, %s42_s24), 0  ;;  %s927_s25 = smov (!%p44_p5, %s46_s25), %s794_s0 }
  0x16   : > { %p225_p8 = pnand %p658_p6, %p224_p7  ;;  %p48_p9 = scmp.ge.s32.totalorder %s927_s25, 2 }
  0x17   : > { %p282_p10 = scmp.lt.s32.totalorder (!%p225_p8), %s786_s21, 1  ;;  %p284_p11 = scmp.lt.s32.totalorder (!%p225_p8), %s782_s20, 3  ;;  %vm333_vm0 = vcmask (!%p225_p8), 64512   ;;  %v801_v0 = vmov (!%p225_p8), -inf   ;;  %v802_v1 = vmov (!%p225_p8), 0.0  }
  0x18   : > { %s929_s25 = smov (%p48_p9, %s927_s25), 0  ;;  %228 = sbr.rel (%p225_p8) target bundleno = 912 (0x390), region = 32 }
  0x19   : > { %331 = vst [vmem:[#allocation2] sm:$0xff] (!%p225_p8), %v801_v0  ;;  %332 = vst [vmem:[#allocation3] sm:$0xff] (!%p225_p8), %v802_v1  ;;  %s335_s26 = sld [smem:[#allocation6 + %s786_s21]] (!%p225_p8) }
  0x1a   : > { %334 = vst.msk [vmem:[#allocation4] sm:$0xff] (!%p225_p8), %vm333_vm0, %v802_v1 }
  0x1f   : > { %s931_s21 = smov (!%p282_p10, %s786_s21), 1  ;;  %s933_s20 = smov (!%p284_p11, %s782_s20), 3 }
  0x20   : > { %s659_s27 = sshll.u32 %s931_s21, 2  ;;  %p667_p12 = scmp.gt.s32.totalorder %s335_s26, 0 }
  0x21   : > { %s290_s28 = sadd.s32 %s659_s27, %s933_s20  ;;  %v803_v3 = vmov (%p667_p12), 0.0   ;;  %vm804_vm1 = vmmov (%p667_p12), 0   ;;  %v396_v6 = vlaneseq (%p667_p12)  ;;  %v400_v9 = vstv (%p667_p12), %s335_s26  ;;  %v409_v18 = vld [vmem:[#allocation2] sm:$0xff] (%p667_p12)  ;;  %v425_v32 = vld [vmem:[#allocation3] sm:$0xff] (%p667_p12)  ;;  %v433_v36 = vld [vmem:[#allocation4] sm:$0xff] (%p667_p12) }
  0x22   : > { %s866_s29 = sshll.u32 %s290_s28, 2  ;;  %344 = sbr.rel (!%p667_p12) target bundleno = 765 (0x2fd), region = 40  ;;  %678 = vmatprep.subr.bf16.mxu0 (%p667_p12), %v803_v3  ;;  %680 = vmatprep.mubr.msk.bf16.mxu0 (%p667_p12), %vm804_vm1, %v803_v3  ;;  %v805_v17 = vmov (%p667_p12), 0   ;;  %vm444_vm5 = vcmask (%p667_p12), 1043456  }
  0x23   : > { %s292_s6 = scalar_lea.vmem %s916_s1, %s866_s29  ;;  %s303_s9 = scalar_lea.vmem %s917_s2, %s866_s29  ;;  %684 = vmatprep.subr.bf16.mxu1 (%p667_p12), %v803_v3  ;;  %686 = vmatprep.mubr.msk.bf16.mxu1 (%p667_p12), %vm804_vm1, %v803_v3  ;;  %v397_v7 = vand.u32 (%p667_p12), 127, %v396_v6  ;;  %v403_v8 = vshrl.u32 (%p667_p12), %v396_v6, 7 }
  0x24   : > { %s314_s12 = scalar_lea.vmem %s918_s3, %s866_s29  ;;  %s325_s15 = scalar_lea.vmem %s919_s4, %s866_s29  ;;  %v346_v2 = vld [vmem:[%s303_s9] sm:$0xf] (%p667_p12)  ;;  %737 = vset.pattern.permute.xlu0 (%p667_p12), %v805_v17  ;;  %738 = vset.pattern.permute.xlu1 (%p667_p12), %v805_v17 }
  0x25   : > { %v353_v4 = vsel (%p667_p12), %vm333_vm0, %v346_v2, 0  ;;  %v345_v5 = vld [vmem:[%s292_s6] sm:$0xf] (%p667_p12)  ;;  %vm401_vm2 = vcmp.lt.s32.totalorder (%p667_p12), %v397_v7, %v400_v9  ;;  %vm406_vm3 = vcmp.le.s32.totalorder (%p667_p12), %v397_v7, %v403_v8 }
  0x26   : > { %679 = vmatpush3.bf16.xpose.msra.mxu0 (%p667_p12), %v353_v4  ;;  %vm407_vm4 = vmand (%p667_p12), %vm401_vm2, %vm406_vm3  ;;  %v347_v22 = vld [vmem:[%s314_s12] sm:$0xf] (%p667_p12) }
  0x27   : > { %v446_v23 = vsel (%p667_p12), %vm444_vm5, %v347_v22, 0 }
  0x28   : > { %685 = vmatpush3.bf16.msra.mxu1 (%p667_p12), %v446_v23 }
  0x2d   : > { %681 = vmatmul.mubr.msk.bf16.vlgmr.msra.gmra.mrb[0].mxu0 %vm333_vm0, %v345_v5 }
 0x100   : > { %v389_v10 = vpop.f32.mrb[0].mxu0 }
 0x101   : > { %v395_v11 = vmul.f32 0.35355338, %v389_v10  ;;  %v682_v12 = vpop.f32.mrb[1].mxu0 }
 0x102   : > { %v392_v13 = vpop.f32.mrb[2].mxu0 }
 0x103   : > { %v683_v14 = vpop.f32.mrb[3].mxu0  ;;  %v408_v15 = vsel %vm407_vm4, %v395_v11, -1e+30 }
 0x104   : > { %v410_v16 = vsel %vm333_vm0, %v408_v15, -inf }
 0x105   : > { %411 = vmax.xlane.f32.xlu0 %v410_v16 }
 0x192   : > { %v412_v19 = vpop.xlane.xlu0 %411 }
 0x193   : > { %v413_v20 = vmax.f32 %v409_v18, %v412_v19 }
 0x195   : > { %v414_v21 = vsub.f32 %v409_v18, %v413_v20  ;;  %432 = vst [vmem:[#allocation2] sm:$0xff] %v413_v20  ;;  %419 = vperm.xlu0 %737, %v413_v20  }
 0x197   : > { %v415_v30 = vmul.f32 1.442695, %v414_v21 }
 0x214   : > { %v420_v24 = vpop.permute.xlu0 %419 }
 0x215   : > { %v422_v25 = vsub.f32 %v408_v15, %v420_v24 }
 0x217   : > { %v423_v26 = vmul.f32 1.442695, %v422_v25 }
 0x219   : > { %739 = vpow2.f32 %v423_v26 }
 0x21a   : > { %741 = vpow2.f32 %v415_v30 }
 0x223   : > { %v740_v27 = vpop.eup %739 }
 0x224   : > { %v427_v28 = vsel %vm333_vm0, %v740_v27, 0.0  ;;  %v440_v29 = vpack.c.bf16 %v740_v27, %v740_v27  ;;  %v742_v31 = vpop.eup %741 }
 0x225   : > { %428 = vadd.xlane.f32.xlu1 %v427_v28  ;;  %v426_v33 = vmul.f32 %v742_v31, %v425_v32 }
 0x226   : > { %687 = vmatmul.mubr.msk.bf16.vlgmr.msra.gmra.mrb[0].mxu1 %vm333_vm0, %v440_v29 }
 0x236   : > { %436 = vperm.xlu1 %738, %v742_v31  }
 0x2b2   : > { %v429_v34 = vpop.xlane.xlu1 %428 }
 0x2b3   : > { %v430_v35 = vadd.f32 %v429_v34, %v426_v33 }
 0x2b5   : > { %431 = vst [vmem:[#allocation3] sm:$0xff] %v430_v35 }
 0x2b6   : > { %v437_v37 = vpop.permute.xlu1 %436 }
 0x2b7   : > { %v439_v38 = vmul.f32 %v437_v37, %v433_v36 }
 0x2f9   : > { %v482_v39 = vpop.f32.mrb[0].mxu1 }
 0x2fa   : > { %v488_v40 = vadd.f32 %v482_v39, %v439_v38  ;;  %v688_v41 = vpop.f32.mrb[1].mxu1 }
 0x2fb   : > { %v485_v42 = vpop.f32.mrb[2].mxu1 }
 0x2fc   : > { %489 = vst.msk [vmem:[#allocation4] sm:$0xff] %vm333_vm0, %v488_v40  ;;  %v689_v43 = vpop.f32.mrb[3].mxu1 }
 0x2fd PF: > { %v493_v44 = vld [vmem:[#allocation3] sm:$0xff]  ;;  %v806_v45 = vmov 0   ;;  %vm505_vm7 = vcmask 60416  }
 0x2fe   : > { %743 = vset.pattern.permute.xlu0 %v806_v45  ;;  %vm494_vm6 = vcmp.le.f32.partialorder %v493_v44, 0.0 }
 0x2ff   : > { %v495_v46 = vsel %vm494_vm6, 1.0, %v493_v44 }
 0x300   : > { %499 = vperm.xlu0 %743, %v495_v46  }
 0x303   : > { %v496_v48 = vld [vmem:[#allocation4] sm:$0xff] }
 0x37f   : > { %v500_v47 = vpop.permute.xlu0 %499 }
 0x380   : > { %744 = vrcp.f32 %v500_v47 }
 0x38a   : > { %v745_v49 = vpop.eup %744 }
 0x38b   : > { %v503_v50 = vmul.f32 %v745_v49, %v496_v48 }
 0x38d   : > { %v504_v51 = vpack.c.bf16 %v503_v50, %v503_v50 }
 0x38f   : > { %506 = vst.msk [vmem:[%s325_s15] sm:$0xf] %vm505_vm7, %v504_v51 }
 0x390 PF: > { %s20_s23 = sadd.s32 1, %s798_s23   ;;  %s920_s20 = smov %s790_s22 }
 0x391   : > { %p17_p13 = scmp.ge.s32.totalorder %s20_s23, 10   ;;  %s921_s21 = smov %s794_s0 }
 0x392   : > { %s922_s22 = smov %s925_s24  ;;  %s923_s0 = smov %s929_s25 }
 0x393   :  { %19 = sbr.rel (!%p17_p13) target bundleno = 18 (0x12), region = 80 }

// kernel: decoder_forward.29
= control target key start
LH: loop header
LB: loop body
LE: loop exit
PB: predicated region body
PF: predicated region fallthrough
CT: control target
= control target key end

     0   :  { %s935_s27 = smov 0   ;;  %s937_s28 = smov 0   ;;  %s1031_s0 = inlined_call_operand.vmem [shape: bf16[2,4,8,8], index: 0, kind: input, shape index: {}]   ;;  %s1032_s1 = inlined_call_operand.vmem [shape: bf16[2,4,8,8], index: 1, kind: input, shape index: {}]   ;;  %s1033_s2 = inlined_call_operand.vmem [shape: bf16[4,8,32], index: 2, kind: input, shape index: {}]   ;;  %s1034_s3 = inlined_call_operand.vmem [shape: bf16[4,8,32], index: 3, kind: input, shape index: {}]   ;;  %s1035_s4 = inlined_call_operand.vmem [shape: f32[1,32], index: 4, kind: input, shape index: {}]   ;;  %s1036_s5 = inlined_call_operand.vmem [shape: bf16[2,8,32], index: 5, kind: input, shape index: {}]   ;;  %s1037_s6 = inlined_call_operand.vmem [shape: f32[1,32], index: 6, kind: input, shape index: {}]   ;;  %s1038_s7 = inlined_call_operand.vmem [shape: f32[1,32], index: 7, kind: input, shape index: {}]   ;;  %s1039_s8 = inlined_call_operand.vmem [shape: bf16[2,8,32], index: 8, kind: output, shape index: {}]  }
   0x1   :  { %s939_s29 = smov 0   ;;  %s941_s30 = smov 0  }
   0x2   :  { %s943_s9 = smov 0  }
   0x3 LB: > { %1042 = sst [smem:[#allocation3_spill]] %s877_s29  ;;  %s30_s10 = sadd.s32 1, %s877_s29  ;;  %s885_s9 = sphi %s943_s9, %s18_s9   ;;  %s881_s30 = sphi %s941_s30, %s1049_s30   ;;  %s877_s29 = sphi %s939_s29, %s1048_s29   ;;  %s873_s28 = sphi %s937_s28, %s1047_s28   ;;  %s869_s27 = sphi %s935_s27, %s1046_s27  }
   0x4   : > { %1043 = sst [smem:[#allocation4_spill]] %s881_s30  ;;  %s37_s11 = sadd.s32 1, %s881_s30 }
   0x5   : > { %p31_p0 = scmp.ge.s32.totalorder %s30_s10, 4  ;;  %p768_p1 = scmp.ge.s32.totalorder %s885_s9, 1 }
   0x6   : > { %p345_p2 = scmp.lt.s32.totalorder %s885_s9, 9 }
   0x7   : > { %s1051_s10 = smov (%p31_p0, %s30_s10), 0  ;;  %s1053_s11 = smov (!%p31_p0, %s37_s11), %s881_s30 }
   0x8   : > { %1044 = sst [smem:[#allocation5_spill]] %s1051_s10  ;;  %p346_p3 = pnand %p768_p1, %p345_p2 }
   0x9   : > { %p39_p4 = scmp.ge.s32.totalorder %s1053_s11, 2  ;;  %p413_p5 = scmp.lt.s32.totalorder (!%p346_p3), %s873_s28, 1 }
   0xa   : > { %349 = sbr.rel (%p346_p3) target bundleno = 435 (0x1b3), region = 52  ;;  %p415_p6 = scmp.lt.s32.totalorder (!%p346_p3), %s869_s27, 3 }
   0xb   : > { %s1055_s11 = smov (%p39_p4, %s1053_s11), 0  ;;  %p777_p7 = scmp.ne.s32.totalorder (!%p346_p3), %s869_s27, 0 }
   0xc   : > { %1045 = sst [smem:[#allocation6_spill]] %s1055_s11 }
  0x11   : > { %s1057_s28 = smov (!%p413_p5, %s873_s28), 1  ;;  %vm462_vm0 = vcmask (!%p777_p7), 261120   ;;  %v887_v0 = vmov (!%p777_p7), 0.0  }
  0x12   : > { %s416_s12 = scalar_select %p415_p6, %s869_s27, 3 }
  0x13   : > { %s969_s13 = sshll.u32 %s1057_s28, 2  ;;  %461 = sbr.rel (%p777_p7) target bundleno = 26 (0x1a), region = 56  ;;  %463 = vst.msk [vmem:[#allocation2] sm:$0xff] (!%p777_p7), %vm462_vm0, %v887_v0 }
  0x14   : > { %s421_s14 = sadd.s32 %s969_s13, %s416_s12  ;;  %s773_s15 = sshll.u32 %s416_s12, 2 }
  0x15   : > { %s770_s16 = sshll.u32 %s421_s14, 2  ;;  %s438_s19 = scalar_lea.vmem %s1033_s2, %s773_s15 }
  0x16   : > { %s423_s22 = scalar_lea.vmem %s1031_s0, %s770_s16  ;;  %s434_s25 = scalar_lea.vmem %s1032_s1, %s770_s16 }
  0x17   : > { %s442_s11 = scalar_lea.vmem %s1034_s3, %s773_s15  ;;  %s449_s12 = scalar_lea.vmem %s1036_s5, %s969_s13 }
  0x18   : > { %s456_s17 = scalar_lea.vmem %s1039_s8, %s969_s13 }
  0x1a PF: > { %v467_v1 = vld [vmem:[%s442_s11] sm:$0xf]  ;;  %vm472_vm1 = vcmask 1043456   ;;  %v888_v3 = vmov 0.0   ;;  %vm468_vm2 = vcmask 64512   ;;  %vm889_vm3 = vmmov 0  }
  0x1b   : > { %v465_v2 = vld [vmem:[%s438_s19] sm:$0xf]  ;;  %790 = vmatprep.subr.bf16.mxu0 %v888_v3  ;;  %796 = vmatprep.subr.bf16.mxu1 %v888_v3  ;;  %v474_v4 = vsel %vm472_vm1, %v467_v1, 0  ;;  %vm564_vm4 = vcmask 261120   ;;  %p780_p8 = scmp.ne.s32.totalorder %s869_s27, 3 }
  0x1c   : > { %v520_v5 = vsel %vm472_vm1, %v465_v2, 0  ;;  %791 = vmatpush3.bf16.msra.mxu0 %v474_v4  ;;  %v466_v6 = vld [vmem:[%s434_s25] sm:$0xf]  ;;  %792 = vmatprep.mubr.msk.bf16.mxu0 %vm889_vm3, %v888_v3  ;;  %vm616_vm5 = vcmask (!%p780_p8), 257024  }
  0x1d   : > { %797 = vmatpush3.bf16.msra.mxu1 %v520_v5  ;;  %v464_v7 = vld [vmem:[%s423_s22] sm:$0xf]  ;;  %798 = vmatprep.mubr.msk.bf16.mxu1 %vm889_vm3, %v888_v3 }
  0x1e   : > { %v562_v10 = vld [vmem:[#allocation2] sm:$0xff] }
  0x1f   : > { %793 = vmatmul.mubr.msk.bf16.vlgmr.msra.gmra.mrb[0].mxu0 %vm468_vm2, %v466_v6  ;;  %v781_v20 = vld [vmem:[%s1035_s4] ss:$0 sm:$0xff] (!%p780_p8) }
  0x20   : > { %799 = vmatmul.mubr.msk.bf16.vlgmr.msra.gmra.mrb[0].mxu1 %vm468_vm2, %v464_v7  ;;  %v579_v21 = vld [vmem:[%s449_s12] sm:$0xf] (!%p780_p8) }
  0x21   : > { %v580_v23 = vunpack.c.l.bf16 (!%p780_p8), %v579_v21  ;;  %v782_v38 = vld [vmem:[%s1037_s6] ss:$0 sm:$0xff] (!%p780_p8) }
  0x22   : > { %v783_v40 = vld [vmem:[%s1038_s7] ss:$0 sm:$0xff] (!%p780_p8) }
  0xf2   : > { %v510_v8 = vpop.f32.mrb[0].mxu0  ;;  %569 = sbr.rel (%p780_p8) target bundleno = 435 (0x1b3), region = 60 }
  0xf3   : > { %v556_v9 = vpop.f32.mrb[0].mxu1  ;;  %v794_v12 = vpop.f32.mrb[1].mxu0 }
  0xf4   : > { %v557_v11 = vadd.f32 %v556_v9, %v510_v8  ;;  %v800_v13 = vpop.f32.mrb[1].mxu1  ;;  %v513_v14 = vpop.f32.mrb[2].mxu0 }
  0xf5   : > { %v559_v15 = vpop.f32.mrb[2].mxu1  ;;  %v795_v17 = vpop.f32.mrb[3].mxu0 }
  0xf6   : > { %v563_v16 = vadd.f32 %v562_v10, %v557_v11  ;;  %v801_v18 = vpop.f32.mrb[3].mxu1 }
  0xf8   : > { %565 = vst.msk [vmem:[#allocation2] sm:$0xff] %vm564_vm4, %v563_v16 }
  0xff   : > { %v570_v19 = vld [vmem:[#allocation2] sm:$0xff] }
 0x100   : > { %v578_v22 = vadd.f32 %v781_v20, %v570_v19 }
 0x102   : > { %v581_v24 = vadd.f32 %v580_v23, %v578_v22 }
 0x104   : > { %v582_v25 = vsel %vm564_vm4, %v581_v24, 0.0  ;;  %v587_v26 = vmul.f32 %v581_v24, %v581_v24 }
 0x105   : > { %583 = vadd.xlane.f32.xlu0 %v582_v25 }
 0x106   : > { %v588_v27 = vsel %vm564_vm4, %v587_v26, 0.0 }
 0x109   : > { %589 = vadd.xlane.f32.xlu0 %v588_v27 }
 0x192   : > { %v584_v28 = vpop.xlane.xlu0 %583 }
 0x193   : > { %v586_v29 = vmul.f32 0.03125, %v584_v28 }
 0x195   : > { %v592_v31 = vmul.f32 %v586_v29, %v586_v29  ;;  %v595_v36 = vsub.f32 %v581_v24, %v586_v29 }
 0x196   : > { %v590_v30 = vpop.xlane.xlu0 %589 }
 0x197   : > { %v591_v32 = vmul.f32 0.03125, %v590_v30 }
 0x199   : > { %v593_v33 = vsub.f32 %v591_v32, %v592_v31 }
 0x19b   : > { %v594_v34 = vmax.f32 %v593_v33, 0.0 }
 0x19d   : > { %v596_v35 = vadd.f32 1e-05, %v594_v34 }
 0x19f   : > { %845 = vrsqrt.f32 %v596_v35 }
 0x1a9   : > { %v846_v37 = vpop.eup %845 }
 0x1aa   : > { %v598_v39 = vmul.f32 %v846_v37, %v595_v36 }
 0x1ac   : > { %v606_v41 = vmul.f32 %v782_v38, %v598_v39 }
 0x1ae   : > { %v614_v42 = vadd.f32 %v783_v40, %v606_v41 }
 0x1b0   : > { %v615_v43 = vpack.c.bf16 %v614_v42, %v614_v42 }
 0x1b2   : > { %617 = vst.msk [vmem:[%s456_s17] sm:$0xf] %vm616_vm5, %v615_v43 }
 0x1b3 PF: > { %s18_s9 = sadd.s32 1, %s885_s9   ;;  %s1046_s27 = sld [smem:[#allocation3_spill]] }
 0x1b4   : > { %p15_p9 = scmp.ge.s32.totalorder %s18_s9, 10   ;;  %s1047_s28 = sld [smem:[#allocation4_spill]] }
 0x1b5   : > { %s1048_s29 = sld [smem:[#allocation5_spill]]  ;;  %s1049_s30 = sld [smem:[#allocation6_spill]] }
 0x1b6   :  { %17 = sbr.rel (!%p15_p9) target bundleno = 3 (0x3), region = 102 }

// kernel: decoder_forward.28
= control target key start
LH: loop header
LB: loop body
LE: loop exit
PB: predicated region body
PF: predicated region fallthrough
CT: control target
= control target key end

     0   :  { %s904_s0 = inlined_call_operand.vmem [shape: s32[2], index: 0, kind: input, shape index: {}]   ;;  %s905_s1 = inlined_call_operand.vmem [shape: bf16[2,4,8,8], index: 1, kind: input, shape index: {}]   ;;  %s906_s2 = inlined_call_operand.vmem [shape: bf16[2,4,8,8], index: 2, kind: input, shape index: {}]   ;;  %s907_s3 = inlined_call_operand.vmem [shape: bf16[2,4,8,8], index: 3, kind: input, shape index: {}]   ;;  %s908_s4 = inlined_call_operand.vmem [shape: bf16[2,4,8,8], index: 4, kind: output, shape index: {}]  }
   0x1   :  { %s9_s17 = sshll.u32 %s904_s0, 4  ;;  %s10_s17 = int_to_ptr.vmem [resolvable:$true] %s9_s17 }
   0x2   :  { %s735_s18 = scalar_lea.vmem %s10_s17, 16  ;;  %p740_p1 = scmp.lt.s32.totalorder %s10_s17, %s10_s17 }
   0x3   :  { %p736_p0 = scmp.ne.s32.totalorder %s10_s17, %s735_s18  ;;  %p741_p2 = scmp.lt.s32.totalorder %s735_s18, %s735_s18 }
   0x5   :  { %p742_p3 = por %p741_p2, %p740_p1 }
   0x7   :  { %p743_p4 = pnand %p742_p3, %p736_p0 }
   0x9   :  { %746 = shalt.err (!%p743_p4)  }
   0xa   :  { %s789_s19 = smov [#allocation6]  }
   0xb   :  { %12 = dma.vmem_to_smem %s10_s17, 16, %s789_s19, [#allocation5] }
   0xc   :  { %767 = dma.done.wait [#allocation5], 16 }
   0xd   :  { %768 = vsyncadd [#allocation5], 4294967280 }
   0xe   :  { %14 = sfence }
   0xf   :  { %s824_s20 = smov 0   ;;  %s826_s21 = smov 0  }
  0x10   :  { %s828_s22 = smov 0   ;;  %s830_s0 = smov 0  }
  0x11   :  { %s832_s23 = smov 0  }
  0x12 LB: > { %s42_s24 = sadd.s32 1, %s779_s22  ;;  %s46_s25 = sadd.s32 1, %s783_s0  ;;  %s787_s23 = sphi %s832_s23, %s20_s23   ;;  %s783_s0 = sphi %s830_s0, %s912_s0   ;;  %s779_s22 = sphi %s828_s22, %s911_s22   ;;  %s775_s21 = sphi %s826_s21, %s910_s21   ;;  %s771_s20 = sphi %s824_s20, %s909_s20  }
  0x13   : > { %p44_p5 = scmp.ge.s32.totalorder %s42_s24, 4  ;;  %p648_p6 = scmp.ge.s32.totalorder %s787_s23, 1 }
  0x14   : > { %p224_p7 = scmp.lt.s32.totalorder %s787_s23, 9 }
  0x15   : > { %s914_s24 = smov (%p44_p5, %s42_s24), 0  ;;  %s916_s25 = smov (!%p44_p5, %s46_s25), %s783_s0 }
  0x16   : > { %p225_p8 = pnand %p648_p6, %p224_p7  ;;  %p48_p9 = scmp.ge.s32.totalorder %s916_s25, 2 }
  0x17   : > { %p282_p10 = scmp.lt.s32.totalorder (!%p225_p8), %s775_s21, 1  ;;  %p284_p11 = scmp.lt.s32.totalorder (!%p225_p8), %s771_s20, 3  ;;  %vm333_vm0 = vcmask (!%p225_p8), 64512   ;;  %v790_v0 = vmov (!%p225_p8), -inf   ;;  %v791_v1 = vmov (!%p225_p8), 0.0  }
  0x18   : > { %s918_s25 = smov (%p48_p9, %s916_s25), 0  ;;  %228 = sbr.rel (%p225_p8) target bundleno = 912 (0x390), region = 32 }
  0x19   : > { %331 = vst [vmem:[#allocation2] sm:$0xff] (!%p225_p8), %v790_v0  ;;  %332 = vst [vmem:[#allocation3] sm:$0xff] (!%p225_p8), %v791_v1  ;;  %s335_s26 = sld [smem:[#allocation6 + %s775_s21]] (!%p225_p8) }
  0x1a   : > { %334 = vst.msk [vmem:[#allocation4] sm:$0xff] (!%p225_p8), %vm333_vm0, %v791_v1 }
  0x1f   : > { %s920_s21 = smov (!%p282_p10, %s775_s21), 1  ;;  %s922_s20 = smov (!%p284_p11, %s771_s20), 3 }
  0x20   : > { %s649_s27 = sshll.u32 %s920_s21, 2  ;;  %p658_p12 = scmp.le.s32.totalorder %s335_s26, 0 }
  0x21   : > { %s290_s28 = sadd.s32 %s649_s27, %s922_s20  ;;  %v792_v3 = vmov (!%p658_p12), 0.0   ;;  %vm793_vm1 = vmmov (!%p658_p12), 0   ;;  %v392_v6 = vlaneseq (!%p658_p12)  ;;  %v396_v8 = vstv (!%p658_p12), %s335_s26  ;;  %v399_v17 = vld [vmem:[#allocation2] sm:$0xff] (!%p658_p12)  ;;  %v415_v31 = vld [vmem:[#allocation3] sm:$0xff] (!%p658_p12)  ;;  %v423_v35 = vld [vmem:[#allocation4] sm:$0xff] (!%p658_p12) }
  0x22   : > { %s855_s29 = sshll.u32 %s290_s28, 2  ;;  %340 = sbr.rel (%p658_p12) target bundleno = 765 (0x2fd), region = 40  ;;  %667 = vmatprep.subr.bf16.mxu0 (!%p658_p12), %v792_v3  ;;  %669 = vmatprep.mubr.msk.bf16.mxu0 (!%p658_p12), %vm793_vm1, %v792_v3  ;;  %v794_v16 = vmov (!%p658_p12), 0   ;;  %vm434_vm3 = vcmask (!%p658_p12), 1043456  }
  0x23   : > { %s292_s6 = scalar_lea.vmem %s905_s1, %s855_s29  ;;  %s303_s9 = scalar_lea.vmem %s906_s2, %s855_s29  ;;  %673 = vmatprep.subr.bf16.mxu1 (!%p658_p12), %v792_v3  ;;  %675 = vmatprep.mubr.msk.bf16.mxu1 (!%p658_p12), %vm793_vm1, %v792_v3  ;;  %v393_v7 = vand.u32 (!%p658_p12), 127, %v392_v6 }
  0x24   : > { %s314_s12 = scalar_lea.vmem %s907_s3, %s855_s29  ;;  %s325_s15 = scalar_lea.vmem %s908_s4, %s855_s29  ;;  %v342_v2 = vld [vmem:[%s303_s9] sm:$0xf] (!%p658_p12)  ;;  %726 = vset.pattern.permute.xlu0 (!%p658_p12), %v794_v16  ;;  %727 = vset.pattern.permute.xlu1 (!%p658_p12), %v794_v16 }
  0x25   : > { %v349_v4 = vsel (!%p658_p12), %vm333_vm0, %v342_v2, 0  ;;  %v341_v5 = vld [vmem:[%s292_s6] sm:$0xf] (!%p658_p12)  ;;  %vm397_vm2 = vcmp.lt.s32.totalorder (!%p658_p12), %v393_v7, %v396_v8 }
  0x26   : > { %668 = vmatpush3.bf16.xpose.msra.mxu0 (!%p658_p12), %v349_v4  ;;  %v343_v21 = vld [vmem:[%s314_s12] sm:$0xf] (!%p658_p12) }
  0x27   : > { %v436_v22 = vsel (!%p658_p12), %vm434_vm3, %v343_v21, 0 }
  0x28   : > { %674 = vmatpush3.bf16.msra.mxu1 (!%p658_p12), %v436_v22 }
  0x2d   : > { %670 = vmatmul.mubr.msk.bf16.vlgmr.msra.gmra.mrb[0].mxu0 %vm333_vm0, %v341_v5 }
 0x100   : > { %v385_v9 = vpop.f32.mrb[0].mxu0 }
 0x101   : > { %v391_v10 = vmul.f32 0.35355338, %v385_v9  ;;  %v671_v11 = vpop.f32.mrb[1].mxu0 }
 0x102   : > { %v388_v12 = vpop.f32.mrb[2].mxu0 }
 0x103   : > { %v672_v13 = vpop.f32.mrb[3].mxu0  ;;  %v398_v14 = vsel %vm397_vm2, %v391_v10, -1e+30 }
 0x104   : > { %v400_v15 = vsel %vm333_vm0, %v398_v14, -inf }
 0x105   : > { %401 = vmax.xlane.f32.xlu0 %v400_v15 }
 0x192   : > { %v402_v18 = vpop.xlane.xlu0 %401 }
 0x193   : > { %v403_v19 = vmax.f32 %v399_v17, %v402_v18 }
 0x195   : > { %v404_v20 = vsub.f32 %v399_v17, %v403_v19  ;;  %422 = vst [vmem:[#allocation2] sm:$0xff] %v403_v19  ;;  %409 = vperm.xlu0 %726, %v403_v19  }
 0x197   : > { %v405_v29 = vmul.f32 1.442695, %v404_v20 }
 0x214   : > { %v410_v23 = vpop.permute.xlu0 %409 }
 0x215   : > { %v412_v24 = vsub.f32 %v398_v14, %v410_v23 }
 0x217   : > { %v413_v25 = vmul.f32 1.442695, %v412_v24 }
 0x219   : > { %728 = vpow2.f32 %v413_v25 }
 0x21a   : > { %730 = vpow2.f32 %v405_v29 }
 0x223   : > { %v729_v26 = vpop.eup %728 }
 0x224   : > { %v417_v27 = vsel %vm333_vm0, %v729_v26, 0.0  ;;  %v430_v28 = vpack.c.bf16 %v729_v26, %v729_v26  ;;  %v731_v30 = vpop.eup %730 }
 0x225   : > { %418 = vadd.xlane.f32.xlu1 %v417_v27  ;;  %v416_v32 = vmul.f32 %v731_v30, %v415_v31 }
 0x226   : > { %676 = vmatmul.mubr.msk.bf16.vlgmr.msra.gmra.mrb[0].mxu1 %vm333_vm0, %v430_v28 }
 0x236   : > { %426 = vperm.xlu1 %727, %v731_v30  }
 0x2b2   : > { %v419_v33 = vpop.xlane.xlu1 %418 }
 0x2b3   : > { %v420_v34 = vadd.f32 %v419_v33, %v416_v32 }
 0x2b5   : > { %421 = vst [vmem:[#allocation3] sm:$0xff] %v420_v34 }
 0x2b6   : > { %v427_v36 = vpop.permute.xlu1 %426 }
 0x2b7   : > { %v429_v37 = vmul.f32 %v427_v36, %v423_v35 }
 0x2f9   : > { %v472_v38 = vpop.f32.mrb[0].mxu1 }
 0x2fa   : > { %v478_v39 = vadd.f32 %v472_v38, %v429_v37  ;;  %v677_v40 = vpop.f32.mrb[1].mxu1 }
 0x2fb   : > { %v475_v41 = vpop.f32.mrb[2].mxu1 }
 0x2fc   : > { %479 = vst.msk [vmem:[#allocation4] sm:$0xff] %vm333_vm0, %v478_v39  ;;  %v678_v42 = vpop.f32.mrb[3].mxu1 }
 0x2fd PF: > { %v483_v43 = vld [vmem:[#allocation3] sm:$0xff]  ;;  %v795_v44 = vmov 0   ;;  %vm495_vm5 = vcmask 60416  }
 0x2fe   : > { %732 = vset.pattern.permute.xlu0 %v795_v44  ;;  %vm484_vm4 = vcmp.le.f32.partialorder %v483_v43, 0.0 }
 0x2ff   : > { %v485_v45 = vsel %vm484_vm4, 1.0, %v483_v43 }
 0x300   : > { %489 = vperm.xlu0 %732, %v485_v45  }
 0x303   : > { %v486_v47 = vld [vmem:[#allocation4] sm:$0xff] }
 0x37f   : > { %v490_v46 = vpop.permute.xlu0 %489 }
 0x380   : > { %733 = vrcp.f32 %v490_v46 }
 0x38a   : > { %v734_v48 = vpop.eup %733 }
 0x38b   : > { %v493_v49 = vmul.f32 %v734_v48, %v486_v47 }
 0x38d   : > { %v494_v50 = vpack.c.bf16 %v493_v49, %v493_v49 }
 0x38f   : > { %496 = vst.msk [vmem:[%s325_s15] sm:$0xf] %vm495_vm5, %v494_v50 }
 0x390 PF: > { %s20_s23 = sadd.s32 1, %s787_s23   ;;  %s909_s20 = smov %s779_s22 }
 0x391   : > { %p17_p13 = scmp.ge.s32.totalorder %s20_s23, 10   ;;  %s910_s21 = smov %s783_s0 }
 0x392   : > { %s911_s22 = smov %s914_s24  ;;  %s912_s0 = smov %s918_s25 }
 0x393   :  { %19 = sbr.rel (!%p17_p13) target bundleno = 18 (0x12), region = 80 }

// kernel: decoder_forward.30
= control target key start
LH: loop header
LB: loop body
LE: loop exit
PB: predicated region body
PF: predicated region fallthrough
CT: control target
= control target key end

     0   :  { %vm19_vm0 = vcmask 523264   ;;  %v153_v0 = vmov 0.0   ;;  %vm154_vm1 = vmmov 0   ;;  %vm47_vm2 = vcmask 261120   ;;  %s197_s1 = inlined_call_operand.vmem [shape: bf16[32,64], index: 1, kind: input, shape index: {}]   ;;  %s198_s0 = inlined_call_operand.vmem [shape: bf16[16,32], index: 0, kind: input, shape index: {}]   ;;  %s199_s2 = inlined_call_operand.vmem [shape: f32[1,64], index: 2, kind: input, shape index: {}]   ;;  %s200_s3 = inlined_call_operand.vmem [shape: bf16[16,64], index: 3, kind: output, shape index: {}]  }
   0x1   :  { %140 = vmatprep.subr.bf16.mxu0 %v153_v0  ;;  %v150_v1 = vld [vmem:[%s197_s1] sm:$0xff]   ;;  %144 = vmatprep.mubr.msk.bf16.mxu0 %vm154_vm1, %v153_v0  ;;  %20 = vst.msk [vmem:[#allocation2] sm:$0xff] %vm19_vm0, %v153_v0  ;;  %21 = vst.msk [vmem:[#allocation2 + $0x8] sm:$0xff] %vm19_vm0, %v153_v0  ;;  %v151_v2 = vld [vmem:[%s197_s1 + $0x8] sm:$0xff]   ;;  %vm121_vm3 = vcmask 519168  }
   0x2   :  { %141 = vmatpush3.bf16.msra.mxu0 %v150_v1  ;;  %v152_v3 = vld [vmem:[%s198_s0] sm:$0xff]  }
   0x3   :  { %142 = vmatprep.subr.bf16.mxu0 %v153_v0  ;;  %v132_v12 = vld [vmem:[%s199_s2] ss:$0 sm:$0xff] }
   0x6   :  { %143 = vmatpush3.bf16.msra.mxu0 %v151_v2 }
   0x8   :  { %v22_v4 = vld [vmem:[#allocation2] sm:$0xff]  ;;  %v23_v6 = vld [vmem:[#allocation2 + $0x8] sm:$0xff] }
   0x9   :  { %145 = vmatmul.mubr.msk.bf16.vlgmr.msra.gmra.mrb[0].mxu0 %vm47_vm2, %v152_v3 }
  0xdc   :  { %v85_v5 = vpop.f32.mrb[0].mxu0 }
  0xdd   :  { %v92_v7 = vadd.f32 %v85_v5, %v22_v4  ;;  %v146_v8 = vpop.f32.mrb[1].mxu0 }
  0xde   :  { %v88_v9 = vpop.f32.mrb[2].mxu0 }
  0xdf   :  { %95 = vst.msk [vmem:[#allocation2] sm:$0xff] %vm19_vm0, %v92_v7  ;;  %v93_v10 = vadd.f32 %v88_v9, %v23_v6  ;;  %v147_v11 = vpop.f32.mrb[3].mxu0 }
  0xe1   :  { %96 = vst.msk [vmem:[#allocation2 + $0x8] sm:$0xff] %vm19_vm0, %v93_v10 }
  0xe6   :  { %v100_v13 = vld [vmem:[#allocation2] sm:$0xff] }
  0xe7   :  { %v109_v14 = vadd.f32 %v132_v12, %v100_v13 }
  0xe8   :  { %v101_v15 = vld [vmem:[#allocation2 + $0x8] sm:$0xff] }
  0xe9   :  { %v111_v16 = vmax.f32 %v109_v14, 0.0  ;;  %v110_v17 = vadd.f32 %v132_v12, %v101_v15 }
  0xeb   :  { %v135_v18 = vpack.c.bf16 %v111_v16, %v111_v16  ;;  %v112_v19 = vmax.f32 %v110_v17, 0.0 }
  0xed   :  { %122 = vst.msk [vmem:[%s200_s3] sm:$0xf] %vm121_vm3, %v135_v18  ;;  %v136_v20 = vpack.c.bf16 %v112_v19, %v112_v19 }
  0xef   :  { %123 = vst.msk [vmem:[%s200_s3 + $0x4] sm:$0xf] %vm121_vm3, %v136_v20 }

// kernel: decoder_forward.37
= control target key start
LH: loop header
LB: loop body
LE: loop exit
PB: predicated region body
PF: predicated region fallthrough
CT: control target
= control target key end

     0   :  { %s927_s0 = inlined_call_operand.vmem [shape: s32[2], index: 0, kind: input, shape index: {}]   ;;  %s928_s1 = inlined_call_operand.vmem [shape: bf16[2,4,8,8], index: 1, kind: input, shape index: {}]   ;;  %s929_s2 = inlined_call_operand.vmem [shape: bf16[2,4,8,8], index: 2, kind: input, shape index: {}]   ;;  %s930_s3 = inlined_call_operand.vmem [shape: f32[2,4,8,1], index: 3, kind: input, shape index: {}]   ;;  %s931_s4 = inlined_call_operand.hbm [shape: f32[2,4,8,8], index: 4, kind: output, shape index: {}]  }
   0x1   :  { %s9_s17 = sshll.u32 %s927_s0, 4  ;;  %s10_s17 = int_to_ptr.vmem [resolvable:$true] %s9_s17 }
   0x2   :  { %s637_s18 = scalar_lea.vmem %s10_s17, 16  ;;  %p642_p1 = scmp.lt.s32.totalorder %s10_s17, %s10_s17 }
   0x3   :  { %p638_p0 = scmp.ne.s32.totalorder %s10_s17, %s637_s18  ;;  %p643_p2 = scmp.lt.s32.totalorder %s637_s18, %s637_s18 }
   0x5   :  { %p644_p3 = por %p643_p2, %p642_p1 }
   0x7   :  { %p645_p4 = pnand %p644_p3, %p638_p0 }
   0x9   :  { %648 = shalt.err (!%p645_p4)  }
   0xa   :  { %s747_s19 = smov [#allocation3]  }
   0xb   :  { %12 = dma.vmem_to_smem %s10_s17, 16, %s747_s19, [#allocation2] }
   0xc   :  { %709 = dma.done.wait [#allocation2], 16 }
   0xd   :  { %710 = vsyncadd [#allocation2], 4294967280 }
   0xe   :  { %14 = sfence }
   0xf   :  { %15 = vsyncpa [#allocation5], 0 }
  0x10   :  { %17 = vsyncpa [#allocation5 + $0x1], 0  ;;  %s780_s20 = smov 0   ;;  %s782_s21 = smov 0  }
  0x11   :  { %s784_s0 = smov 0   ;;  %s786_s22 = smov 0  }
  0x12   :  { %s788_s23 = smov 0   ;;  %s790_s24 = smov 0  }
  0x13   :  { %s792_s25 = smov 0   ;;  %s794_s26 = smov 0  }
  0x14 LB: > { %s533_s27 = sadd.s32 4294967295, %s745_s26   ;;  %s534_s28 = sadd.s32 4294967294, %s745_s26   ;;  %s745_s26 = sphi %s794_s26, %s23_s26   ;;  %s741_s25 = sphi %s792_s25, %s940_s25   ;;  %s737_s24 = sphi %s790_s24, %s939_s24   ;;  %s733_s23 = sphi %s788_s23, %s938_s23   ;;  %s729_s22 = sphi %s786_s22, %s937_s22   ;;  %s725_s0 = sphi %s784_s0, %s936_s0   ;;  %s721_s21 = sphi %s782_s21, %s935_s21   ;;  %s717_s20 = sphi %s780_s20, %s934_s20  }
  0x15   : > { %s45_s29 = sadd.s32 1, %s737_s24  ;;  %s49_s30 = sadd.s32 1, %s741_s25 }
  0x16   : > { %p47_p5 = scmp.ge.s32.totalorder %s45_s29, 4  ;;  %p162_p6 = scmp.ne.s32.totalorder %s725_s0, %s721_s21 }
  0x17   : > { %p163_p7 = scmp.eq.s32.totalorder %s533_s27, 7  ;;  %p168_p10 = scmp.ne.s32.totalorder %s721_s21, %s717_s20 }
  0x18   : > { %s942_s29 = smov (%p47_p5, %s45_s29), 0  ;;  %s944_s30 = smov (!%p47_p5, %s49_s30), %s741_s25 }
  0x19   : > { %s144_s5 = ssub.s32 %s737_s24, %s942_s29  ;;  %p831_p8 = por %p163_p7, %p162_p6 }
  0x1a   : > { %p51_p9 = scmp.ge.s32.totalorder %s944_s30, 2  ;;  %p169_p11 = scmp.eq.s32.totalorder %s534_s28, 7 }
  0x1b   : > { %p537_p12 = scmp.ge.s32.totalorder %s745_s26, 1  ;;  %p229_p0 = scmp.lt.s32.totalorder %s745_s26, 9 }
  0x1c   : > { %s946_s30 = smov (%p51_p9, %s944_s30), 0  ;;  %p840_p13 = por %p169_p11, %p168_p10 }
  0x1d   : > { %s143_s8 = ssub.s32 %s741_s25, %s946_s30  ;;  %s152_s9 = sadd.s32 1, %s725_s0 }
  0x1e   : > { %s145_s10 = sor.u32 %s144_s5, %s143_s8  ;;  %p230_p1 = pnand %p537_p12, %p229_p0 }
  0x1f   : > { %p150_p2 = scmp.eq.s32.totalorder %s145_s10, 0  ;;  %p281_p3 = scmp.lt.s32.totalorder (!%p230_p1), %s733_s23, 1  ;;  %v748_v0 = vmov (!%p230_p1), 0.0   ;;  %vm749_vm0 = vmmov (!%p230_p1), 0   ;;  %v750_v1 = vmov (!%p230_p1), 0   ;;  %vm317_vm1 = vcmask (!%p230_p1), 64512  }
  0x20   : > { %233 = sbr.rel (%p230_p1) target bundleno = 298 (0x12a), region = 32  ;;  %p283_p4 = scmp.lt.s32.totalorder (!%p230_p1), %s729_s22, 3  ;;  %553 = vmatprep.subr.bf16.mxu0 (!%p230_p1), %v748_v0  ;;  %555 = vmatprep.mubr.msk.bf16.mxu0 (!%p230_p1), %vm749_vm0, %v748_v0  ;;  %v365_v14 = vlaneseq (!%p230_p1) }
  0x21   : > { %s849_s11 = scalar_select %p150_p2, %s725_s0, %s152_s9  }
  0x22   : > { %634 = vset.pattern.permute.xlu0 (!%p230_p1), %v750_v1  ;;  %v366_v15 = vand.u32 (!%p230_p1), 127, %v365_v14  ;;  %s751_s9 = smov (!%p230_p1), [#allocation4]  }
  0x23   : > { %s653_s10 = sshll.u32 (!%p230_p1), %s751_s9, 4  ;;  %s654_s10 = int_to_ptr.vmem [resolvable:$false] %s653_s10 }
  0x27   : > { %s282_s12 = scalar_select %p281_p3, %s733_s23, 1 }
  0x28   : > { %s284_s13 = scalar_select %p283_p4, %s729_s22, 3 }
  0x29   : > { %s539_s14 = sshll.u32 %s282_s12, 2 }
  0x2a   : > { %s289_s15 = sadd.s32 %s539_s14, %s284_s13  ;;  %s370_s13 = sld [smem:[#allocation3 + %s733_s23]] }
  0x2b   : > { %s540_s16 = sshll.u32 %s289_s15, 2  ;;  %s544_s17 = sshll.u32 %s289_s15, 3 }
  0x2c   : > { %s302_s27 = scalar_lea.vmem %s929_s2, %s540_s16  ;;  %s313_s8 = scalar_lea.vmem %s930_s3, %s544_s17 }
  0x2d   : > { %v316_v2 = vld [vmem:[%s302_s27] sm:$0xf]  ;;  %s291_s12 = scalar_lea.vmem %s928_s1, %s540_s16  ;;  %s278_s14 = sand.u32 1, %s721_s21  }
  0x2e   : > { %v322_v3 = vsel %vm317_vm1, %v316_v2, 0  ;;  %v373_v4 = vld [vmem:[%s313_s8] sm:$0xff]  ;;  %s538_s15 = sshll.u32 %s278_s14, 3  ;;  %s547_s17 = sshll.u32 %s733_s23, 2 }
  0x2f   : > { %554 = vmatpush3.bf16.xpose.msra.mxu0 %v322_v3  ;;  %376 = vperm.xlu0 %634, %v373_v4   ;;  %v315_v5 = vld [vmem:[%s291_s12] sm:$0xf]  ;;  %s398_s16 = sadd.s32 %s729_s22, %s547_s17  ;;  %s280_s19 = scalar_lea.vmem [#allocation4], %s538_s15 }
  0x30   : > { %v371_v16 = vstv %s370_s13  ;;  %s548_s18 = sshll.u32 %s398_s16, 7  ;;  %s402_s27 = sshll.u32 %s280_s19, 4  ;;  %s875_s27 = int_to_ptr.vmem [resolvable:$true] %s402_s27 }
  0x31   : > { %vm372_vm2 = vcmp.lt.s32.totalorder %v366_v15, %v371_v16  ;;  %s873_s8 = scalar_lea.hbm %s931_s4, %s548_s18  ;;  %s385_s22 = scalar_lea.sflag [#allocation5], %s278_s14 }
  0x32   : > { %s649_s23 = scalar_lea.vmem %s875_s27, 128  ;;  %s655_s12 = scalar_lea.vmem %s654_s10, 256 }
  0x33   : > { %p650_p5 = scmp.ne.s32.totalorder %s875_s27, %s649_s23  ;;  %p656_p9 = scmp.lt.s32.totalorder %s875_s27, %s654_s10 }
  0x34   : > { %p657_p10 = scmp.lt.s32.totalorder %s655_s12, %s649_s23 }
  0x35   : > { %p651_p6 = pnand %p650_p5, %p831_p8 }
  0x36   : > { %556 = vmatmul.mubr.msk.bf16.vlgmr.msra.gmra.mrb[0].mxu0 %vm317_vm1, %v315_v5  ;;  %p658_p11 = por %p657_p10, %p656_p9 }
  0x37   : > { %p652_p7 = pneg %p651_p6 }
  0x39   : > { %p659_p12 = pnand %p658_p11, %p652_p7 }
  0xae   : > { %v377_v7 = vpop.permute.xlu0 %376 }
 0x109   : > { %v358_v6 = vpop.f32.mrb[0].mxu0 }
 0x10a   : > { %v364_v8 = vmul.f32 0.35355338, %v358_v6  ;;  %v557_v9 = vpop.f32.mrb[1].mxu0 }
 0x10b   : > { %v361_v10 = vpop.f32.mrb[2].mxu0 }
 0x10c   : > { %v379_v11 = vsub.f32 %v364_v8, %v377_v7  ;;  %v558_v12 = vpop.f32.mrb[3].mxu0 }
 0x10e   : > { %v380_v13 = vmul.f32 1.442695, %v379_v11 }
 0x110   : > { %635 = vpow2.f32 %v380_v13 }
 0x11a   : > { %v636_v17 = vpop.eup %635 }
 0x11b   : > { %v382_v18 = vsel %vm372_vm2, %v636_v17, 0.0 }
 0x11c   : > { %383 = vst.msk [vmem:[%s280_s19] sm:$0xff] %vm317_vm1, %v382_v18 }
 0x11d   : > { %662 = shalt.err (!%p659_p12)
}
 0x11e   : > { %s663_s13 = scalar_lea.hbm %s873_s8, 128  ;;  %s667_s17 = scalar_lea.hbm %s931_s4, 1024 }
 0x11f   : > { %p664_p0 = scmp.ne.s32.totalorder %s873_s8, %s663_s13  ;;  %p668_p3 = scmp.lt.u32.totalorder %s873_s8, %s931_s4 }
 0x120   : > { %p669_p4 = scmp.lt.u32.totalorder %s667_s17, %s663_s13  ;;  %p671_p6 = scmp.lt.u32.totalorder %s663_s13, %s873_s8 }
 0x121   : > { %p665_p1 = pnand %p664_p0, %p831_p8 }
 0x122   : > { %p670_p5 = por %p669_p4, %p668_p3 }
 0x123   : > { %p666_p2 = pneg %p665_p1 }
 0x124   : > { %p672_p7 = por %p671_p6, %p670_p5 }
 0x126   : > { %p673_p9 = pnand %p672_p7, %p666_p2 }
 0x128   : > { %676 = shalt.err (!%p673_p9)
}
 0x129   : > { %559 = dma.vmem_to_hbm [thread:$0]  (%p831_p8), %s875_s27, 128, %s873_s8, %s385_s22  }
 0x12a PF: > { %p565_p10 = scmp.ge.s32.totalorder %s745_s26, 2  ;;  %s414_s19 = sand.u32 1, %s717_s20  }
 0x12b   : > { %s415_s28 = scalar_lea.sflag [#allocation5], %s414_s19 }
 0x12c   : > { %p562_p11 = pnand %p565_p10, %p840_p13 }
 0x12e   : > { %712 = dma.done.wait (!%p562_p11), %s415_s28, 128  }
 0x12f   : > { %714 = vsyncadd (!%p562_p11), %s415_s28, 4294967168  ;;  %s23_s26 = sadd.s32 1, %s745_s26   ;;  %s934_s20 = smov %s721_s21 }
 0x130   : > { %p20_p12 = scmp.ge.s32.totalorder %s23_s26, 10   ;;  %s935_s21 = smov %s725_s0 }
 0x131   : > { %s936_s0 = smov %s849_s11  ;;  %s937_s22 = smov %s737_s24 }
 0x132   : > { %s938_s23 = smov %s741_s25  ;;  %s939_s24 = smov %s942_s29 }
 0x133   : > { %s940_s25 = smov %s946_s30  ;;  %22 = sbr.rel (!%p20_p12) target bundleno = 20 (0x14), region = 73 }
 0x13a   :  { %420 = vsyncpa [#allocation5], 1 }
 0x13b   :  { %422 = vsyncpa [#allocation5 + $0x1], 1 }

// kernel: decoder_forward.36
= control target key start
LH: loop header
LB: loop body
LE: loop exit
PB: predicated region body
PF: predicated region fallthrough
CT: control target
= control target key end

     0   :  { %s1042_s0 = inlined_call_operand.vmem [shape: s32[2], index: 0, kind: input, shape index: {}]   ;;  %s1043_s1 = inlined_call_operand.vmem [shape: bf16[2,4,8,8], index: 1, kind: input, shape index: {}]   ;;  %s1044_s2 = inlined_call_operand.vmem [shape: bf16[2,4,8,8], index: 2, kind: input, shape index: {}]   ;;  %s1045_s3 = inlined_call_operand.vmem [shape: bf16[2,4,8,8], index: 3, kind: input, shape index: {}]   ;;  %s1046_s4 = inlined_call_operand.vmem [shape: bf16[2,4,8,8], index: 4, kind: output, shape index: {0}]   ;;  %s1047_s5 = inlined_call_operand.vmem [shape: f32[2,4,8,1], index: 5, kind: output, shape index: {1}]  }
   0x1   :  { %s11_s20 = sshll.u32 %s1042_s0, 4  ;;  %s12_s20 = int_to_ptr.vmem [resolvable:$true] %s11_s20 }
   0x2   :  { %s862_s21 = scalar_lea.vmem %s12_s20, 16  ;;  %p867_p1 = scmp.lt.s32.totalorder %s12_s20, %s12_s20 }
   0x3   :  { %p863_p0 = scmp.ne.s32.totalorder %s12_s20, %s862_s21  ;;  %p868_p2 = scmp.lt.s32.totalorder %s862_s21, %s862_s21 }
   0x5   :  { %p869_p3 = por %p868_p2, %p867_p1 }
   0x7   :  { %p870_p4 = pnand %p869_p3, %p863_p0 }
   0x9   :  { %873 = shalt.err (!%p870_p4)  }
   0xa   :  { %s916_s22 = smov [#allocation6]  }
   0xb   :  { %14 = dma.vmem_to_smem %s12_s20, 16, %s916_s22, [#allocation5] }
   0xc   :  { %894 = dma.done.wait [#allocation5], 16 }
   0xd   :  { %895 = vsyncadd [#allocation5], 4294967280 }
   0xe   :  { %16 = sfence }
   0xf   :  { %s956_s23 = smov 0   ;;  %s958_s24 = smov 0  }
  0x10   :  { %s960_s25 = smov 0   ;;  %s962_s0 = smov 0  }
  0x11   :  { %s964_s26 = smov 0  }
  0x12 LB: > { %s44_s27 = sadd.s32 1, %s906_s25  ;;  %s48_s28 = sadd.s32 1, %s910_s0  ;;  %s914_s26 = sphi %s964_s26, %s22_s26   ;;  %s910_s0 = sphi %s962_s0, %s1051_s0   ;;  %s906_s25 = sphi %s960_s25, %s1050_s25   ;;  %s902_s24 = sphi %s958_s24, %s1049_s24   ;;  %s898_s23 = sphi %s956_s23, %s1048_s23  }
  0x13   : > { %p46_p5 = scmp.ge.s32.totalorder %s44_s27, 4  ;;  %p771_p6 = scmp.ge.s32.totalorder %s914_s26, 1 }
  0x14   : > { %p256_p7 = scmp.lt.s32.totalorder %s914_s26, 9 }
  0x15   : > { %s1053_s27 = smov (%p46_p5, %s44_s27), 0  ;;  %s1055_s28 = smov (!%p46_p5, %s48_s28), %s910_s0 }
  0x16   : > { %p257_p8 = pnand %p771_p6, %p256_p7  ;;  %p50_p9 = scmp.ge.s32.totalorder %s1055_s28, 2 }
  0x17   : > { %p327_p10 = scmp.lt.s32.totalorder (!%p257_p8), %s902_s24, 1  ;;  %p329_p11 = scmp.lt.s32.totalorder (!%p257_p8), %s898_s23, 3  ;;  %vm389_vm0 = vcmask (!%p257_p8), 64512   ;;  %v917_v0 = vmov (!%p257_p8), -inf   ;;  %v918_v1 = vmov (!%p257_p8), 0.0  }
  0x18   : > { %s1057_s28 = smov (%p50_p9, %s1055_s28), 0  ;;  %260 = sbr.rel (%p257_p8) target bundleno = 912 (0x390), region = 32 }
  0x19   : > { %387 = vst [vmem:[#allocation2] sm:$0xff] (!%p257_p8), %v917_v0  ;;  %388 = vst [vmem:[#allocation3] sm:$0xff] (!%p257_p8), %v918_v1  ;;  %s391_s29 = sld [smem:[#allocation6 + %s902_s24]] (!%p257_p8) }
  0x1a   : > { %390 = vst.msk [vmem:[#allocation4] sm:$0xff] (!%p257_p8), %vm389_vm0, %v918_v1 }
  0x1f   : > { %s1059_s24 = smov (!%p327_p10, %s902_s24), 1  ;;  %s1061_s23 = smov (!%p329_p11, %s898_s23), 3 }
  0x20   : > { %s772_s30 = sshll.u32 %s1059_s24, 2  ;;  %p783_p12 = scmp.le.s32.totalorder %s391_s29, 0 }
  0x21   : > { %s335_s6 = sadd.s32 %s772_s30, %s1061_s23  ;;  %v919_v3 = vmov (!%p783_p12), 0.0   ;;  %vm920_vm1 = vmmov (!%p783_p12), 0   ;;  %v448_v6 = vlaneseq (!%p783_p12)  ;;  %v452_v8 = vstv (!%p783_p12), %s391_s29  ;;  %v455_v17 = vld [vmem:[#allocation2] sm:$0xff] (!%p783_p12)  ;;  %v471_v31 = vld [vmem:[#allocation3] sm:$0xff] (!%p783_p12)  ;;  %v479_v35 = vld [vmem:[#allocation4] sm:$0xff] (!%p783_p12) }
  0x22   : > { %s987_s7 = sshll.u32 %s335_s6, 2  ;;  %s781_s8 = sshll.u32 %s335_s6, 3  ;;  %792 = vmatprep.subr.bf16.mxu0 (!%p783_p12), %v919_v3  ;;  %794 = vmatprep.mubr.msk.bf16.mxu0 (!%p783_p12), %vm920_vm1, %v919_v3  ;;  %v921_v16 = vmov (!%p783_p12), 0   ;;  %vm490_vm3 = vcmask (!%p783_p12), 1043456  }
  0x23   : > { %s337_s11 = scalar_lea.vmem %s1043_s1, %s987_s7  ;;  %s348_s14 = scalar_lea.vmem %s1044_s2, %s987_s7  ;;  %798 = vmatprep.subr.bf16.mxu1 (!%p783_p12), %v919_v3  ;;  %800 = vmatprep.mubr.msk.bf16.mxu1 (!%p783_p12), %vm920_vm1, %v919_v3  ;;  %v449_v7 = vand.u32 (!%p783_p12), 127, %v448_v6 }
  0x24   : > { %s359_s17 = scalar_lea.vmem %s1045_s3, %s987_s7  ;;  %s370_s20 = scalar_lea.vmem %s1046_s4, %s987_s7  ;;  %v398_v2 = vld [vmem:[%s348_s14] sm:$0xf] (!%p783_p12)  ;;  %851 = vset.pattern.permute.xlu0 (!%p783_p12), %v921_v16  ;;  %852 = vset.pattern.permute.xlu1 (!%p783_p12), %v921_v16 }
  0x25   : > { %s1008_s23 = scalar_lea.vmem %s1047_s5, %s781_s8  ;;  %396 = sbr.rel (%p783_p12) target bundleno = 765 (0x2fd), region = 40  ;;  %v405_v4 = vsel (!%p783_p12), %vm389_vm0, %v398_v2, 0  ;;  %v397_v5 = vld [vmem:[%s337_s11] sm:$0xf] (!%p783_p12)  ;;  %vm453_vm2 = vcmp.lt.s32.totalorder (!%p783_p12), %v449_v7, %v452_v8 }
  0x26   : > { %793 = vmatpush3.bf16.xpose.msra.mxu0 (!%p783_p12), %v405_v4  ;;  %v399_v21 = vld [vmem:[%s359_s17] sm:$0xf] (!%p783_p12) }
  0x27   : > { %v492_v22 = vsel (!%p783_p12), %vm490_vm3, %v399_v21, 0 }
  0x28   : > { %799 = vmatpush3.bf16.msra.mxu1 (!%p783_p12), %v492_v22 }
  0x2d   : > { %795 = vmatmul.mubr.msk.bf16.vlgmr.msra.gmra.mrb[0].mxu0 %vm389_vm0, %v397_v5 }
 0x100   : > { %v441_v9 = vpop.f32.mrb[0].mxu0 }
 0x101   : > { %v447_v10 = vmul.f32 0.35355338, %v441_v9  ;;  %v796_v11 = vpop.f32.mrb[1].mxu0 }
 0x102   : > { %v444_v12 = vpop.f32.mrb[2].mxu0 }
 0x103   : > { %v797_v13 = vpop.f32.mrb[3].mxu0  ;;  %v454_v14 = vsel %vm453_vm2, %v447_v10, -1e+30 }
 0x104   : > { %v456_v15 = vsel %vm389_vm0, %v454_v14, -inf }
 0x105   : > { %457 = vmax.xlane.f32.xlu0 %v456_v15 }
 0x192   : > { %v458_v18 = vpop.xlane.xlu0 %457 }
 0x193   : > { %v459_v19 = vmax.f32 %v455_v17, %v458_v18 }
 0x195   : > { %v460_v20 = vsub.f32 %v455_v17, %v459_v19  ;;  %478 = vst [vmem:[#allocation2] sm:$0xff] %v459_v19  ;;  %465 = vperm.xlu0 %851, %v459_v19  }
 0x197   : > { %v461_v29 = vmul.f32 1.442695, %v460_v20 }
 0x214   : > { %v466_v23 = vpop.permute.xlu0 %465 }
 0x215   : > { %v468_v24 = vsub.f32 %v454_v14, %v466_v23 }
 0x217   : > { %v469_v25 = vmul.f32 1.442695, %v468_v24 }
 0x219   : > { %853 = vpow2.f32 %v469_v25 }
 0x21a   : > { %855 = vpow2.f32 %v461_v29 }
 0x223   : > { %v854_v26 = vpop.eup %853 }
 0x224   : > { %v473_v27 = vsel %vm389_vm0, %v854_v26, 0.0  ;;  %v486_v28 = vpack.c.bf16 %v854_v26, %v854_v26  ;;  %v856_v30 = vpop.eup %855 }
 0x225   : > { %474 = vadd.xlane.f32.xlu1 %v473_v27  ;;  %v472_v32 = vmul.f32 %v856_v30, %v471_v31 }
 0x226   : > { %801 = vmatmul.mubr.msk.bf16.vlgmr.msra.gmra.mrb[0].mxu1 %vm389_vm0, %v486_v28 }
 0x236   : > { %482 = vperm.xlu1 %852, %v856_v30  }
 0x2b2   : > { %v475_v33 = vpop.xlane.xlu1 %474 }
 0x2b3   : > { %v476_v34 = vadd.f32 %v475_v33, %v472_v32 }
 0x2b5   : > { %477 = vst [vmem:[#allocation3] sm:$0xff] %v476_v34 }
 0x2b6   : > { %v483_v36 = vpop.permute.xlu1 %482 }
 0x2b7   : > { %v485_v37 = vmul.f32 %v483_v36, %v479_v35 }
 0x2f9   : > { %v528_v38 = vpop.f32.mrb[0].mxu1 }
 0x2fa   : > { %v534_v39 = vadd.f32 %v528_v38, %v485_v37  ;;  %v802_v40 = vpop.f32.mrb[1].mxu1 }
 0x2fb   : > { %v531_v41 = vpop.f32.mrb[2].mxu1 }
 0x2fc   : > { %535 = vst.msk [vmem:[#allocation4] sm:$0xff] %vm389_vm0, %v534_v39  ;;  %v803_v42 = vpop.f32.mrb[3].mxu1 }
 0x2fd PF: > { %v539_v43 = vld [vmem:[#allocation3] sm:$0xff]  ;;  %v922_v44 = vmov 0   ;;  %v555_v48 = vld [vmem:[#allocation2] sm:$0xff]  ;;  %vm561_vm5 = vcmask 7168   ;;  %vm551_vm6 = vcmask 60416  }
 0x2fe   : > { %857 = vset.pattern.permute.xlu0 %v922_v44  ;;  %vm540_vm4 = vcmp.le.f32.partialorder %v539_v43, 0.0  ;;  %v556_v45 = vmax.f32 %v539_v43, 1e-30 }
 0x2ff   : > { %v541_v46 = vsel %vm540_vm4, 1.0, %v539_v43 }
 0x300   : > { %545 = vperm.xlu0 %857, %v541_v46   ;;  %858 = vlog2.f32 %v556_v45 }
 0x303   : > { %v542_v53 = vld [vmem:[#allocation4] sm:$0xff] }
 0x30a   : > { %v859_v47 = vpop.eup %858 }
 0x30b   : > { %v558_v49 = vmul.f32 0.6931472, %v859_v47 }
 0x30d   : > { %v559_v50 = vadd.f32 %v558_v49, %v555_v48 }
 0x30f   : > { %v560_v51 = vsel %vm540_vm4, 0.0, %v559_v50 }
 0x310   : > { %562 = vst.msk [vmem:[%s1008_s23] sm:$0xff] %vm561_vm5, %v560_v51 }
 0x37f   : > { %v546_v52 = vpop.permute.xlu0 %545 }
 0x380   : > { %860 = vrcp.f32 %v546_v52 }
 0x38a   : > { %v861_v54 = vpop.eup %860 }
 0x38b   : > { %v549_v55 = vmul.f32 %v861_v54, %v542_v53 }
 0x38d   : > { %v550_v56 = vpack.c.bf16 %v549_v55, %v549_v55 }
 0x38f   : > { %552 = vst.msk [vmem:[%s370_s20] sm:$0xf] %vm551_vm6, %v550_v56 }
 0x390 PF: > { %s22_s26 = sadd.s32 1, %s914_s26   ;;  %s1048_s23 = smov %s906_s25 }
 0x391   : > { %p19_p13 = scmp.ge.s32.totalorder %s22_s26, 10   ;;  %s1049_s24 = smov %s910_s0 }
 0x392   : > { %s1050_s25 = smov %s1053_s27  ;;  %s1051_s0 = smov %s1057_s28 }
 0x393   :  { %21 = sbr.rel (!%p19_p13) target bundleno = 18 (0x12), region = 92 }

// kernel: decoder_forward.31
= control target key start
LH: loop header
LB: loop body
LE: loop exit
PB: predicated region body
PF: predicated region fallthrough
CT: control target
= control target key end

     0   :  { %vm28_vm0 = vcmask 261120   ;;  %v253_v0 = vmov 0.0   ;;  %vm254_vm1 = vmmov 0   ;;  %vm72_vm2 = vcmask 523264   ;;  %s331_s1 = inlined_call_operand.vmem [shape: bf16[64,32], index: 1, kind: input, shape index: {}]   ;;  %s332_s0 = inlined_call_operand.vmem [shape: bf16[16,64], index: 0, kind: input, shape index: {}]   ;;  %s333_s3 = inlined_call_operand.vmem [shape: bf16[16,32], index: 3, kind: input, shape index: {}]   ;;  %s334_s2 = inlined_call_operand.vmem [shape: f32[1,32], index: 2, kind: input, shape index: {}]   ;;  %s335_s4 = inlined_call_operand.vmem [shape: f32[1,32], index: 4, kind: input, shape index: {}]   ;;  %s336_s5 = inlined_call_operand.vmem [shape: f32[1,32], index: 5, kind: input, shape index: {}]   ;;  %s337_s6 = inlined_call_operand.vmem [shape: bf16[16,32], index: 6, kind: output, shape index: {}]  }
   0x1   :  { %230 = vmatprep.subr.bf16.mxu0 %v253_v0  ;;  %v244_v1 = vld [vmem:[%s331_s1] sm:$0xff]   ;;  %238 = vmatprep.mubr.msk.bf16.mxu0 %vm254_vm1, %v253_v0  ;;  %29 = vst.msk [vmem:[#allocation2] sm:$0xff] %vm28_vm0, %v253_v0  ;;  %30 = vst.msk [vmem:[#allocation2 + $0x8] sm:$0xff] %vm28_vm0, %v253_v0  ;;  %v245_v2 = vld [vmem:[%s331_s1 + $0x8] sm:$0xff]   ;;  %vm201_vm3 = vcmask 257024  }
   0x2   :  { %231 = vmatpush3.bf16.msra.mxu0 %v244_v1  ;;  %v246_v3 = vld [vmem:[%s331_s1 + $0x10] sm:$0xff]   ;;  %v247_v4 = vld [vmem:[%s331_s1 + $0x18] sm:$0xff]   ;;  %v248_v5 = vld [vmem:[%s332_s0] sm:$0xff]  }
   0x3   :  { %232 = vmatprep.subr.bf16.mxu0 %v253_v0  ;;  %v222_v14 = vld [vmem:[%s333_s3] sm:$0xff]  }
   0x4   :  { %v214_v15 = vld [vmem:[%s334_s2] ss:$0 sm:$0xff]  ;;  %v223_v16 = vunpack.c.l.bf16 %v222_v14  ;;  %v224_v19 = vunpack.c.h.bf16 %v222_v14 }
   0x5   :  { %v215_v48 = vld [vmem:[%s335_s4] ss:$0 sm:$0xff] }
   0x6   :  { %233 = vmatpush3.bf16.msra.mxu0 %v245_v2  ;;  %v216_v50 = vld [vmem:[%s336_s5] ss:$0 sm:$0xff] }
   0x7   :  { %234 = vmatprep.subr.bf16.mxu0 %v253_v0 }
   0x8   :  { %v31_v6 = vld [vmem:[#allocation2] sm:$0xff]  ;;  %v32_v8 = vld [vmem:[#allocation2 + $0x8] sm:$0xff] }
   0xa   :  { %235 = vmatpush3.bf16.msra.mxu0 %v246_v3 }
   0xb   :  { %236 = vmatprep.subr.bf16.mxu0 %v253_v0 }
   0xe   :  { %237 = vmatpush3.bf16.msra.mxu0 %v247_v4 }
  0x11   :  { %239 = vmatmul.mubr.msk.bf16.vlgmr.msra.gmra.mrb[0].mxu0 %vm72_vm2, %v248_v5 }
  0xe4   :  { %v110_v7 = vpop.f32.mrb[0].mxu0 }
  0xe5   :  { %v117_v9 = vadd.f32 %v110_v7, %v31_v6  ;;  %v240_v10 = vpop.f32.mrb[1].mxu0 }
  0xe6   :  { %v113_v11 = vpop.f32.mrb[2].mxu0 }
  0xe7   :  { %120 = vst.msk [vmem:[#allocation2] sm:$0xff] %vm28_vm0, %v117_v9  ;;  %v118_v12 = vadd.f32 %v113_v11, %v32_v8  ;;  %v241_v13 = vpop.f32.mrb[3].mxu0 }
  0xe9   :  { %121 = vst.msk [vmem:[#allocation2 + $0x8] sm:$0xff] %vm28_vm0, %v118_v12 }
  0xee   :  { %v125_v17 = vld [vmem:[#allocation2] sm:$0xff] }
  0xef   :  { %v134_v18 = vadd.f32 %v214_v15, %v125_v17 }
  0xf0   :  { %v126_v20 = vld [vmem:[#allocation2 + $0x8] sm:$0xff] }
  0xf1   :  { %v140_v21 = vadd.f32 %v223_v16, %v134_v18  ;;  %v135_v22 = vadd.f32 %v214_v15, %v126_v20 }
  0xf3   :  { %v142_v23 = vsel %vm28_vm0, %v140_v21, 0.0  ;;  %v151_v24 = vmul.f32 %v140_v21, %v140_v21  ;;  %v141_v25 = vadd.f32 %v224_v19, %v135_v22 }
  0xf4   :  { %143 = vadd.xlane.f32.xlu0 %v142_v23 }
  0xf5   :  { %v153_v26 = vsel %vm28_vm0, %v151_v24, 0.0  ;;  %v152_v27 = vmul.f32 %v141_v25, %v141_v25  ;;  %v145_v28 = vsel %vm28_vm0, %v141_v25, 0.0 }
  0xf6   :  { %154 = vadd.xlane.f32.xlu1 %v153_v26 }
  0xf7   :  { %v156_v29 = vsel %vm28_vm0, %v152_v27, 0.0 }
  0xf8   :  { %146 = vadd.xlane.f32.xlu0 %v145_v28 }
  0xfa   :  { %157 = vadd.xlane.f32.xlu1 %v156_v29 }
 0x181   :  { %v144_v30 = vpop.xlane.xlu0 %143 }
 0x182   :  { %v149_v31 = vmul.f32 0.03125, %v144_v30 }
 0x183   :  { %v155_v32 = vpop.xlane.xlu1 %154 }
 0x184   :  { %v161_v33 = vmul.f32 %v149_v31, %v149_v31  ;;  %v159_v34 = vmul.f32 0.03125, %v155_v32  ;;  %v167_v46 = vsub.f32 %v140_v21, %v149_v31 }
 0x185   :  { %v147_v35 = vpop.xlane.xlu0 %146 }
 0x186   :  { %v163_v36 = vsub.f32 %v159_v34, %v161_v33  ;;  %v150_v37 = vmul.f32 0.03125, %v147_v35 }
 0x187   :  { %v158_v38 = vpop.xlane.xlu1 %157 }
 0x188   :  { %v165_v39 = vmax.f32 %v163_v36, 0.0  ;;  %v162_v40 = vmul.f32 %v150_v37, %v150_v37  ;;  %v160_v41 = vmul.f32 0.03125, %v158_v38  ;;  %v168_v52 = vsub.f32 %v141_v25, %v150_v37 }
 0x18a   :  { %v169_v42 = vadd.f32 1e-05, %v165_v39  ;;  %v164_v43 = vsub.f32 %v160_v41, %v162_v40 }
 0x18c   :  { %249 = vrsqrt.f32 %v169_v42  ;;  %v166_v44 = vmax.f32 %v164_v43, 0.0 }
 0x18e   :  { %v170_v45 = vadd.f32 1e-05, %v166_v44 }
 0x190   :  { %251 = vrsqrt.f32 %v170_v45 }
 0x196   :  { %v250_v47 = vpop.eup %249 }
 0x197   :  { %v173_v49 = vmul.f32 %v250_v47, %v167_v46 }
 0x199   :  { %v182_v51 = vmul.f32 %v215_v48, %v173_v49 }
 0x19a   :  { %v252_v53 = vpop.eup %251 }
 0x19b   :  { %v191_v54 = vadd.f32 %v216_v50, %v182_v51  ;;  %v174_v55 = vmul.f32 %v252_v53, %v168_v52 }
 0x19d   :  { %v219_v56 = vpack.c.bf16 %v191_v54, %v191_v54  ;;  %v183_v57 = vmul.f32 %v215_v48, %v174_v55 }
 0x19f   :  { %202 = vst.msk [vmem:[%s337_s6] sm:$0xf] %vm201_vm3, %v219_v56  ;;  %v192_v58 = vadd.f32 %v216_v50, %v183_v57 }
 0x1a1   :  { %v220_v59 = vpack.c.bf16 %v192_v58, %v192_v58 }
 0x1a3   :  { %203 = vst.msk [vmem:[%s337_s6 + $0x4] sm:$0xf] %vm201_vm3, %v220_v59 }

</bundles_post_ra>
